<compile_context>
chip_gen: v7x
topology: tpu7x:2x2x1
jax: 0.10.0
libtpu: 0.0.40
codegen_flags: <defaults>
</compile_context>

<pallas_src>
import functools

import jax
import jax.numpy as jnp
from jax.experimental import pallas as pl
from jax.experimental.pallas import tpu as pltpu


def _round_up(x, m):
    return (x + m - 1) // m * m


def _tpu_vmem_capacity_bytes():
    """Per-TensorCore VMEM capacity, with a conservative fallback (v7x: 64 MiB per core)."""
    try:
        return int(pltpu.get_tpu_info().vmem_capacity_bytes)
    except Exception:
        return 64 << 20


@functools.lru_cache(maxsize=None)
def _lane_sublane_reshape_supported(H, W):
    """Probe whether Mosaic lowers (1, H*W) <-> (H, W) value reshapes inside a kernel."""
    HW = H * W

    def probe(x_ref, a_ref, b_ref):
        v = x_ref[...].reshape(H, W)
        a_ref[...] = v
        b_ref[...] = (v + 0.0).reshape(1, HW)

    try:
        x = jnp.arange(HW, dtype=jnp.float32).reshape(1, HW)
        a, b = pl.pallas_call(
            probe,
            out_shape=(jax.ShapeDtypeStruct((H, W), jnp.float32),
                       jax.ShapeDtypeStruct((1, HW), jnp.float32)),
        )(x)
        a, b = jax.block_until_ready((a, b))
        return bool(jnp.array_equal(a, x.reshape(H, W))) and bool(jnp.array_equal(b, x))
    except Exception:
        return False


def _pick_b_tile(n, bytes_per_image, budget, min_steps):
    """Largest divisor of n whose block fits `budget` while keeping >= min(n, min_steps) steps."""
    best = 1
    want_steps = min(n, min_steps)
    for bt in range(1, n + 1):
        if n % bt:
            continue
        if bt * bytes_per_image > budget:
            continue
        if n // bt < want_steps:
            continue
        best = bt
    return best


def _pick_c_chunk(c, bytes_per_channel, budget=128 << 10):
    """Largest divisor of c whose f32 chunk stays within ~32 vregs of live state."""
    best = 1
    for cc in range(1, c + 1):
        if c % cc:
            continue
        if cc * bytes_per_channel <= budget:
            best = cc
    return best


def _spatial_attention_kernel(w_ref, x_ref, o_ref, roll_ref, attn_ref, *,
                              ks, pad, H, W, c_chunk, b_tile, use_reshape):
    """One grid step = b_tile batch images.

    w_ref    : SMEM f32[2*ks*ks]               flattened conv weight (in=2, ks, ks)
    x_ref    : VMEM [b_tile, C, H*W]           lane-dense input tile
    o_ref    : VMEM [b_tile, C, H*W]           lane-dense output tile
    roll_ref : VMEM f32[2, ks, H+2*pad, Wp]    kw-pre-rolled zero-padded (mean, max) slabs
    attn_ref : VMEM f32[1, H*W]                flat attention map (for the broadcast gate)
    """
    f32 = jnp.float32
    C = x_ref.shape[1]
    HW = H * W
    Hp = H + 2 * pad
    Wp = roll_ref.shape[3]
    n_cchunks = C // c_chunk
    inv_c = 1.0 / C

    # ---- zero the kw==0 (unrolled) slabs once per grid step: only the halo must stay zero,
    #      the interior is rewritten per image and the kw>0 slabs are fully rewritten by the
    #      per-image roll staging.  Two full-lane unmasked stores. ----
    for c in range(2):
        roll_ref[c, 0, :, :] = jnp.zeros((Hp, Wp), f32)

    # ---- hoist all conv-weight scalar reads out of every loop ----
    wv = [[[w_ref[(c * ks + kh) * ks + kw] for kw in range(ks)]
           for kh in range(ks)] for c in range(2)]

    def _process_image(b):
        # ---- pass 1: channel-wise mean & max (chunked over C; short live ranges) ----
        if n_cchunks == 1:
            xc = x_ref[b, :, :].astype(f32)                        # (C, HW)
            s = jnp.sum(xc, axis=0, keepdims=True)
            m = jnp.max(xc, axis=0, keepdims=True)
        else:
            def stat_body(ci, carry):
                s_acc, m_acc = carry
                c0 = pl.multiple_of(ci * c_chunk, c_chunk)
                xc = x_ref[b, pl.ds(c0, c_chunk), :].astype(f32)   # (c_chunk, HW)
                return (s_acc + jnp.sum(xc, axis=0, keepdims=True),
                        jnp.maximum(m_acc, jnp.max(xc, axis=0, keepdims=True)))
            s, m = jax.lax.fori_loop(
                0, n_cchunks, stat_body,
                (jnp.zeros((1, HW), f32), jnp.full((1, HW), -jnp.inf, f32)))
        feats = (s * inv_c, m)                                     # (mean, max), each (1, HW)

        # ---- stage padded slabs: one relayout + store per feature, then ks-1 full-slab lane
        #      rolls per feature (XLU); kh offsets become free sublane-offset loads later ----
        for c in range(2):
            if use_reshape:
                roll_ref[c, 0, pad:pad + H, pad:pad + W] = feats[c].reshape(H, W)
            else:
                # Fallback for Mosaic versions without lane<->sublane reshape: per-row stores.
                for h in range(H):
                    roll_ref[c, 0, pad + h:pad + h + 1, pad:pad + W] = \
                        feats[c][:, h * W:(h + 1) * W]
            base = roll_ref[c, 0, :, :]                            # (Hp, Wp)
            for kw in range(1, ks):
                roll_ref[c, kw, :, :] = pltpu.roll(base, shift=Wp - kw, axis=1)

        # ---- pass 2: ks x ks conv (2 -> 1 channel, no bias) as a vld + FMA stream ----
        # roll_ref[c, kw, kh + h, w] == padded[c, h + kh, w + kw]; accumulate at full lane
        # width (H, Wp) with 4 independent partials, slice [:, :W] once at the end.
        parts = [jnp.zeros((H, Wp), f32) for _ in range(4)]
        t = 0
        for c in range(2):
            for kh in range(ks):
                for kw in range(ks):
                    slab = roll_ref[c, kw, kh:kh + H, :]           # (H, Wp) sublane-offset vld
                    parts[t % 4] = parts[t % 4] + wv[c][kh][kw] * slab
                    t += 1
        conv = (parts[0] + parts[1]) + (parts[2] + parts[3])       # (H, Wp)
        attn2d = jax.nn.sigmoid(conv[:, :W])                       # (H, W)

        # ---- single relayout of the tiny attention map to the flat lane-dense layout ----
        if use_reshape:
            attn_ref[...] = attn2d.reshape(1, HW)
        else:
            for h in range(H):
                attn_ref[:, h * W:(h + 1) * W] = attn2d[h:h + 1, :]
        attn_g = attn_ref[...].astype(o_ref.dtype)                 # (1, HW), gate dtype

        # ---- pass 3: gate x (full-lane loads/stores, no f32 round trip) ----
        if n_cchunks == 1:
            o_ref[b, :, :] = (x_ref[b, :, :] * attn_g).astype(o_ref.dtype)
        else:
            attn_b = jnp.broadcast_to(attn_g, (c_chunk, HW))       # hoisted: no CSE in the loop
            def gate_body(ci, carry):
                c0 = pl.multiple_of(ci * c_chunk, c_chunk)
                xc = x_ref[b, pl.ds(c0, c_chunk), :]
                o_ref[b, pl.ds(c0, c_chunk), :] = (xc * attn_b).astype(o_ref.dtype)
                return carry
            jax.lax.fori_loop(0, n_cchunks, gate_body, 0)

    if b_tile == 1:
        _process_image(0)
    else:
        def b_body(b, carry):
            _process_image(b)
            return carry
        jax.lax.fori_loop(0, b_tile, b_body, 0)


def spatial_attention(x, weight, kernel_size=7, donate_x=False):
    """x: [N, C, H, W]; weight: (2, ks, ks) or (1, 2, ks, ks) (nn.Conv2d(2, 1, ks, bias=False))."""
    assert kernel_size in (3, 7), "kernel size must be 3 or 7"
    ks = kernel_size
    pad = 3 if ks == 7 else 1
    N, C, H, W = x.shape

    weight = jnp.asarray(weight)
    if weight.shape == (1, 2, ks, ks):
        weight = weight[0]
    assert weight.shape == (2, ks, ks), (
        f"weight must be (2, {ks}, {ks}) or (1, 2, {ks}, {ks}); got {weight.shape}")

    HW = H * W
    Hp = H + 2 * pad
    Wp = _round_up(W + 2 * pad, 128)

    xf = x.reshape(N, C, HW)                       # lane-dense layout for the heavy x/out stream
    w_flat = weight.reshape(-1).astype(jnp.float32)
    itemsize = x.dtype.itemsize

    # Generation-aware tiling: v5e/v6e have one TensorCore and 128 MiB VMEM (big blocks, few
    # steps); v7x has two TensorCores but only 64 MiB VMEM per core (>=2 steps, smaller blocks).
    vmem_cap = _tpu_vmem_capacity_bytes()
    if vmem_cap >= (100 << 20):
        block_budget, min_steps = 8 << 20, 1
    else:
        block_budget, min_steps = 4 << 20, 2

    b_tile = _pick_b_tile(N, C * HW * itemsize, budget=block_budget, min_steps=min_steps)
    c_chunk = _pick_c_chunk(C, HW * 4)

    block_bytes = b_tile * C * HW * itemsize
    scratch_bytes = (2 * ks * Hp * Wp + HW) * 4
    # x and out blocks are double-buffered by the pipeline -> up to 4 * block_bytes live.
    vmem_limit = min(vmem_cap, max(32 << 20, 4 * block_bytes + scratch_bytes + (4 << 20)))

    use_reshape = _lane_sublane_reshape_supported(H, W)

    kernel = functools.partial(_spatial_attention_kernel, ks=ks, pad=pad, H=H, W=W,
                               c_chunk=c_chunk, b_tile=b_tile, use_reshape=use_reshape)

    grid_spec = pltpu.PrefetchScalarGridSpec(
        num_scalar_prefetch=0,
        grid=(N // b_tile,),
        in_specs=[
            pl.BlockSpec(memory_space=pltpu.MemorySpace.SMEM),          # conv weights (scalars)
            pl.BlockSpec((b_tile, C, HW), lambda n: (n, 0, 0)),         # x, b_tile images / step
        ],
        out_specs=pl.BlockSpec((b_tile, C, HW), lambda n: (n, 0, 0)),
        scratch_shapes=[
            pltpu.VMEM((2, ks, Hp, Wp), jnp.float32),                   # kw-pre-rolled padded maps
            pltpu.VMEM((1, HW), jnp.float32),                           # flat attention map
        ],
    )

    out_flat = pl.pallas_call(
        kernel,
        out_shape=jax.ShapeDtypeStruct((N, C, HW), x.dtype),
        grid_spec=grid_spec,
        compiler_params=pltpu.CompilerParams(
            dimension_semantics=("parallel",),
            vmem_limit_bytes=int(vmem_limit),
        ),
        input_output_aliases=({1: 0} if donate_x else {}),
    )(w_flat, xf)
    return out_flat.reshape(N, C, H, W)


def spatial_attention_reference(x, weight, kernel_size=7):
    """Pure-JAX reference matching the PyTorch forward."""
    pad = 3 if kernel_size == 7 else 1
    mean_c = jnp.mean(x, axis=1, keepdims=True)
    max_c = jnp.max(x, axis=1, keepdims=True)
    feat = jnp.concatenate([mean_c, max_c], axis=1)          # (N, 2, H, W)
    conv = jax.lax.conv_general_dilated(
        feat, weight[None],                                  # (1, 2, ks, ks)
        window_strides=(1, 1),
        padding=[(pad, pad), (pad, pad)],
        dimension_numbers=("NCHW", "OIHW", "NCHW"),
    )
    return x * jax.nn.sigmoid(conv)


if __name__ == "__main__":
    key = jax.random.PRNGKey(0)
    kx, kwt = jax.random.split(key)

    N, C, H, W = 2, 4, 16, 16
    KS = 7

    x = jax.random.normal(kx, (N, C, H, W), dtype=jnp.float32)
    # nn.Conv2d(2, 1, 7, bias=False) weight: out-channel 0 of the (1, 2, 7, 7) tensor, uniform
    # init in the PyTorch default range +-1/sqrt(fan_in).
    bound = 1.0 / (2.0 * KS * KS) ** 0.5
    weight = jax.random.uniform(kwt, (2, KS, KS), dtype=jnp.float32, minval=-bound, maxval=bound)

    out = spatial_attention(x, weight, kernel_size=KS)
    out = jax.block_until_ready(out)

    ref = spatial_attention_reference(x, weight, kernel_size=KS)
    assert out.shape == (N, C, H, W)
    assert jnp.allclose(out, ref, atol=1e-5, rtol=1e-5), "mismatch vs reference"

    print("KERNEL_OK")
</pallas_src>

<mosaic_0001>
module attributes {stable_mosaic.version = 11 : i64} {
  func.func @probe(%arg0: memref<1x256xf32, #tpu.memory_space<vmem>>, %arg1: memref<16x16xf32, #tpu.memory_space<vmem>>, %arg2: memref<1x256xf32, #tpu.memory_space<vmem>>) attributes {dimension_semantics = [], scalar_prefetch = 0 : i64, scratch_operands = 0 : i64, tpu.core_type = #tpu.core_type<tc>} {
    %c0 = arith.constant 0 : index
    %c0_0 = arith.constant 0 : index
    %0 = vector.load %arg0[%c0, %c0_0] : memref<1x256xf32, #tpu.memory_space<vmem>>, vector<1x256xf32>
    %1 = vector.shape_cast %0 : vector<1x256xf32> to vector<16x16xf32>
    %c0_1 = arith.constant 0 : index
    %c0_2 = arith.constant 0 : index
    %2 = vector.load %arg1[%c0_1, %c0_2] : memref<16x16xf32, #tpu.memory_space<vmem>>, vector<16x16xf32>
    tpu.vector_store %arg1[%c0_1, %c0_2], %1 {strides = array<i32>} : memref<16x16xf32, #tpu.memory_space<vmem>>, vector<16x16xf32>,
    %cst = arith.constant 0.000000e+00 : f32
    %3 = vector.broadcast %cst : f32 to vector<16x16xf32>
    %4 = arith.addf %1, %3 : vector<16x16xf32>
    %5 = vector.shape_cast %4 : vector<16x16xf32> to vector<1x256xf32>
    %c0_3 = arith.constant 0 : index
    %c0_4 = arith.constant 0 : index
    %6 = vector.load %arg2[%c0_3, %c0_4] : memref<1x256xf32, #tpu.memory_space<vmem>>, vector<1x256xf32>
    tpu.vector_store %arg2[%c0_3, %c0_4], %5 {strides = array<i32>} : memref<1x256xf32, #tpu.memory_space<vmem>>, vector<1x256xf32>,
    return
  }
}

module attributes {stable_mosaic.version = 11 : i64} {
  func.func @_spatial_attention_kernel(%arg0: i32, %arg1: memref<98xf32, #tpu.memory_space<smem>>, %arg2: memref<1x4x256xf32, #tpu.memory_space<vmem>>, %arg3: memref<1x4x256xf32, #tpu.memory_space<vmem>>, %arg4: memref<2x7x22x128xf32, #tpu.memory_space<vmem>>, %arg5: memref<1x256xf32, #tpu.memory_space<vmem>>) attributes {dimension_semantics = [#tpu.dimension_semantics<parallel>], iteration_bounds = array<i64: 2>, scalar_prefetch = 0 : i64, scratch_operands = 2 : i64, tpu.core_type = #tpu.core_type<tc>, window_params = [{transform_indices = @transform_0, window_bounds = array<i64: 98>}, {transform_indices = @transform_1, window_bounds = array<i64: 1, 4, 256>}, {transform_indices = @transform_2, window_bounds = array<i64: 1, 4, 256>}]} {
    %cst = arith.constant 0.000000e+00 : f32
    %0 = vector.broadcast %cst : f32 to vector<22x128xf32>
    %c0 = arith.constant 0 : index
    %c0_0 = arith.constant 0 : index
    %c0_1 = arith.constant 0 : index
    %c0_2 = arith.constant 0 : index
    %1 = vector.load %arg4[%c0, %c0_0, %c0_1, %c0_2] : memref<2x7x22x128xf32, #tpu.memory_space<vmem>>, vector<1x1x22x128xf32>
    %2 = vector.shape_cast %1 : vector<1x1x22x128xf32> to vector<22x128xf32>
    %3 = vector.shape_cast %0 : vector<22x128xf32> to vector<1x1x22x128xf32>
    tpu.vector_store %arg4[%c0, %c0_0, %c0_1, %c0_2], %3 {strides = array<i32>} : memref<2x7x22x128xf32, #tpu.memory_space<vmem>>, vector<1x1x22x128xf32>,
    %cst_3 = arith.constant 0.000000e+00 : f32
    %4 = vector.broadcast %cst_3 : f32 to vector<22x128xf32>
    %c1 = arith.constant 1 : index
    %c0_4 = arith.constant 0 : index
    %c0_5 = arith.constant 0 : index
    %c0_6 = arith.constant 0 : index
    %5 = vector.load %arg4[%c1, %c0_4, %c0_5, %c0_6] : memref<2x7x22x128xf32, #tpu.memory_space<vmem>>, vector<1x1x22x128xf32>
    %6 = vector.shape_cast %5 : vector<1x1x22x128xf32> to vector<22x128xf32>
    %7 = vector.shape_cast %4 : vector<22x128xf32> to vector<1x1x22x128xf32>
    tpu.vector_store %arg4[%c1, %c0_4, %c0_5, %c0_6], %7 {strides = array<i32>} : memref<2x7x22x128xf32, #tpu.memory_space<vmem>>, vector<1x1x22x128xf32>,
    %c0_7 = arith.constant 0 : index
    %8 = memref.load %arg1[%c0_7] : memref<98xf32, #tpu.memory_space<smem>>
    %c1_8 = arith.constant 1 : index
    %9 = memref.load %arg1[%c1_8] : memref<98xf32, #tpu.memory_space<smem>>
    %c2 = arith.constant 2 : index
    %10 = memref.load %arg1[%c2] : memref<98xf32, #tpu.memory_space<smem>>
    %c3 = arith.constant 3 : index
    %11 = memref.load %arg1[%c3] : memref<98xf32, #tpu.memory_space<smem>>
    %c4 = arith.constant 4 : index
    %12 = memref.load %arg1[%c4] : memref<98xf32, #tpu.memory_space<smem>>
    %c5 = arith.constant 5 : index
    %13 = memref.load %arg1[%c5] : memref<98xf32, #tpu.memory_space<smem>>
    %c6 = arith.constant 6 : index
    %14 = memref.load %arg1[%c6] : memref<98xf32, #tpu.memory_space<smem>>
    %c7 = arith.constant 7 : index
    %15 = memref.load %arg1[%c7] : memref<98xf32, #tpu.memory_space<smem>>
    %c8 = arith.constant 8 : index
    %16 = memref.load %arg1[%c8] : memref<98xf32, #tpu.memory_space<smem>>
    %c9 = arith.constant 9 : index
    %17 = memref.load %arg1[%c9] : memref<98xf32, #tpu.memory_space<smem>>
    %c10 = arith.constant 10 : index
    %18 = memref.load %arg1[%c10] : memref<98xf32, #tpu.memory_space<smem>>
    %c11 = arith.constant 11 : index
    %19 = memref.load %arg1[%c11] : memref<98xf32, #tpu.memory_space<smem>>
    %c12 = arith.constant 12 : index
    %20 = memref.load %arg1[%c12] : memref<98xf32, #tpu.memory_space<smem>>
    %c13 = arith.constant 13 : index
    %21 = memref.load %arg1[%c13] : memref<98xf32, #tpu.memory_space<smem>>
    %c14 = arith.constant 14 : index
    %22 = memref.load %arg1[%c14] : memref<98xf32, #tpu.memory_space<smem>>
    %c15 = arith.constant 15 : index
    %23 = memref.load %arg1[%c15] : memref<98xf32, #tpu.memory_space<smem>>
    %c16 = arith.constant 16 : index
    %24 = memref.load %arg1[%c16] : memref<98xf32, #tpu.memory_space<smem>>
    %c17 = arith.constant 17 : index
    %25 = memref.load %arg1[%c17] : memref<98xf32, #tpu.memory_space<smem>>
    %c18 = arith.constant 18 : index
    %26 = memref.load %arg1[%c18] : memref<98xf32, #tpu.memory_space<smem>>
    %c19 = arith.constant 19 : index
    %27 = memref.load %arg1[%c19] : memref<98xf32, #tpu.memory_space<smem>>
    %c20 = arith.constant 20 : index
    %28 = memref.load %arg1[%c20] : memref<98xf32, #tpu.memory_space<smem>>
    %c21 = arith.constant 21 : index
    %29 = memref.load %arg1[%c21] : memref<98xf32, #tpu.memory_space<smem>>
    %c22 = arith.constant 22 : index
    %30 = memref.load %arg1[%c22] : memref<98xf32, #tpu.memory_space<smem>>
    %c23 = arith.constant 23 : index
    %31 = memref.load %arg1[%c23] : memref<98xf32, #tpu.memory_space<smem>>
    %c24 = arith.constant 24 : index
    %32 = memref.load %arg1[%c24] : memref<98xf32, #tpu.memory_space<smem>>
    %c25 = arith.constant 25 : index
    %33 = memref.load %arg1[%c25] : memref<98xf32, #tpu.memory_space<smem>>
    %c26 = arith.constant 26 : index
    %34 = memref.load %arg1[%c26] : memref<98xf32, #tpu.memory_space<smem>>
    %c27 = arith.constant 27 : index
    %35 = memref.load %arg1[%c27] : memref<98xf32, #tpu.memory_space<smem>>
    %c28 = arith.constant 28 : index
    %36 = memref.load %arg1[%c28] : memref<98xf32, #tpu.memory_space<smem>>
    %c29 = arith.constant 29 : index
    %37 = memref.load %arg1[%c29] : memref<98xf32, #tpu.memory_space<smem>>
    %c30 = arith.constant 30 : index
    %38 = memref.load %arg1[%c30] : memref<98xf32, #tpu.memory_space<smem>>
    %c31 = arith.constant 31 : index
    %39 = memref.load %arg1[%c31] : memref<98xf32, #tpu.memory_space<smem>>
    %c32 = arith.constant 32 : index
    %40 = memref.load %arg1[%c32] : memref<98xf32, #tpu.memory_space<smem>>
    %c33 = arith.constant 33 : index
    %41 = memref.load %arg1[%c33] : memref<98xf32, #tpu.memory_space<smem>>
    %c34 = arith.constant 34 : index
    %42 = memref.load %arg1[%c34] : memref<98xf32, #tpu.memory_space<smem>>
    %c35 = arith.constant 35 : index
    %43 = memref.load %arg1[%c35] : memref<98xf32, #tpu.memory_space<smem>>
    %c36 = arith.constant 36 : index
    %44 = memref.load %arg1[%c36] : memref<98xf32, #tpu.memory_space<smem>>
    %c37 = arith.constant 37 : index
    %45 = memref.load %arg1[%c37] : memref<98xf32, #tpu.memory_space<smem>>
    %c38 = arith.constant 38 : index
    %46 = memref.load %arg1[%c38] : memref<98xf32, #tpu.memory_space<smem>>
    %c39 = arith.constant 39 : index
    %47 = memref.load %arg1[%c39] : memref<98xf32, #tpu.memory_space<smem>>
    %c40 = arith.constant 40 : index
    %48 = memref.load %arg1[%c40] : memref<98xf32, #tpu.memory_space<smem>>
    %c41 = arith.constant 41 : index
    %49 = memref.load %arg1[%c41] : memref<98xf32, #tpu.memory_space<smem>>
    %c42 = arith.constant 42 : index
    %50 = memref.load %arg1[%c42] : memref<98xf32, #tpu.memory_space<smem>>
    %c43 = arith.constant 43 : index
    %51 = memref.load %arg1[%c43] : memref<98xf32, #tpu.memory_space<smem>>
    %c44 = arith.constant 44 : index
    %52 = memref.load %arg1[%c44] : memref<98xf32, #tpu.memory_space<smem>>
    %c45 = arith.constant 45 : index
    %53 = memref.load %arg1[%c45] : memref<98xf32, #tpu.memory_space<smem>>
    %c46 = arith.constant 46 : index
    %54 = memref.load %arg1[%c46] : memref<98xf32, #tpu.memory_space<smem>>
    %c47 = arith.constant 47 : index
    %55 = memref.load %arg1[%c47] : memref<98xf32, #tpu.memory_space<smem>>
    %c48 = arith.constant 48 : index
    %56 = memref.load %arg1[%c48] : memref<98xf32, #tpu.memory_space<smem>>
    %c49 = arith.constant 49 : index
    %57 = memref.load %arg1[%c49] : memref<98xf32, #tpu.memory_space<smem>>
    %c50 = arith.constant 50 : index
    %58 = memref.load %arg1[%c50] : memref<98xf32, #tpu.memory_space<smem>>
    %c51 = arith.constant 51 : index
    %59 = memref.load %arg1[%c51] : memref<98xf32, #tpu.memory_space<smem>>
    %c52 = arith.constant 52 : index
    %60 = memref.load %arg1[%c52] : memref<98xf32, #tpu.memory_space<smem>>
    %c53 = arith.constant 53 : index
    %61 = memref.load %arg1[%c53] : memref<98xf32, #tpu.memory_space<smem>>
    %c54 = arith.constant 54 : index
    %62 = memref.load %arg1[%c54] : memref<98xf32, #tpu.memory_space<smem>>
    %c55 = arith.constant 55 : index
    %63 = memref.load %arg1[%c55] : memref<98xf32, #tpu.memory_space<smem>>
    %c56 = arith.constant 56 : index
    %64 = memref.load %arg1[%c56] : memref<98xf32, #tpu.memory_space<smem>>
    %c57 = arith.constant 57 : index
    %65 = memref.load %arg1[%c57] : memref<98xf32, #tpu.memory_space<smem>>
    %c58 = arith.constant 58 : index
    %66 = memref.load %arg1[%c58] : memref<98xf32, #tpu.memory_space<smem>>
    %c59 = arith.constant 59 : index
    %67 = memref.load %arg1[%c59] : memref<98xf32, #tpu.memory_space<smem>>
    %c60 = arith.constant 60 : index
    %68 = memref.load %arg1[%c60] : memref<98xf32, #tpu.memory_space<smem>>
    %c61 = arith.constant 61 : index
    %69 = memref.load %arg1[%c61] : memref<98xf32, #tpu.memory_space<smem>>
    %c62 = arith.constant 62 : index
    %70 = memref.load %arg1[%c62] : memref<98xf32, #tpu.memory_space<smem>>
    %c63 = arith.constant 63 : index
    %71 = memref.load %arg1[%c63] : memref<98xf32, #tpu.memory_space<smem>>
    %c64 = arith.constant 64 : index
    %72 = memref.load %arg1[%c64] : memref<98xf32, #tpu.memory_space<smem>>
    %c65 = arith.constant 65 : index
    %73 = memref.load %arg1[%c65] : memref<98xf32, #tpu.memory_space<smem>>
    %c66 = arith.constant 66 : index
    %74 = memref.load %arg1[%c66] : memref<98xf32, #tpu.memory_space<smem>>
    %c67 = arith.constant 67 : index
    %75 = memref.load %arg1[%c67] : memref<98xf32, #tpu.memory_space<smem>>
    %c68 = arith.constant 68 : index
    %76 = memref.load %arg1[%c68] : memref<98xf32, #tpu.memory_space<smem>>
    %c69 = arith.constant 69 : index
    %77 = memref.load %arg1[%c69] : memref<98xf32, #tpu.memory_space<smem>>
    %c70 = arith.constant 70 : index
    %78 = memref.load %arg1[%c70] : memref<98xf32, #tpu.memory_space<smem>>
    %c71 = arith.constant 71 : index
    %79 = memref.load %arg1[%c71] : memref<98xf32, #tpu.memory_space<smem>>
    %c72 = arith.constant 72 : index
    %80 = memref.load %arg1[%c72] : memref<98xf32, #tpu.memory_space<smem>>
    %c73 = arith.constant 73 : index
    %81 = memref.load %arg1[%c73] : memref<98xf32, #tpu.memory_space<smem>>
    %c74 = arith.constant 74 : index
    %82 = memref.load %arg1[%c74] : memref<98xf32, #tpu.memory_space<smem>>
    %c75 = arith.constant 75 : index
    %83 = memref.load %arg1[%c75] : memref<98xf32, #tpu.memory_space<smem>>
    %c76 = arith.constant 76 : index
    %84 = memref.load %arg1[%c76] : memref<98xf32, #tpu.memory_space<smem>>
    %c77 = arith.constant 77 : index
    %85 = memref.load %arg1[%c77] : memref<98xf32, #tpu.memory_space<smem>>
    %c78 = arith.constant 78 : index
    %86 = memref.load %arg1[%c78] : memref<98xf32, #tpu.memory_space<smem>>
    %c79 = arith.constant 79 : index
    %87 = memref.load %arg1[%c79] : memref<98xf32, #tpu.memory_space<smem>>
    %c80 = arith.constant 80 : index
    %88 = memref.load %arg1[%c80] : memref<98xf32, #tpu.memory_space<smem>>
    %c81 = arith.constant 81 : index
    %89 = memref.load %arg1[%c81] : memref<98xf32, #tpu.memory_space<smem>>
    %c82 = arith.constant 82 : index
    %90 = memref.load %arg1[%c82] : memref<98xf32, #tpu.memory_space<smem>>
    %c83 = arith.constant 83 : index
    %91 = memref.load %arg1[%c83] : memref<98xf32, #tpu.memory_space<smem>>
    %c84 = arith.constant 84 : index
    %92 = memref.load %arg1[%c84] : memref<98xf32, #tpu.memory_space<smem>>
    %c85 = arith.constant 85 : index
    %93 = memref.load %arg1[%c85] : memref<98xf32, #tpu.memory_space<smem>>
    %c86 = arith.constant 86 : index
    %94 = memref.load %arg1[%c86] : memref<98xf32, #tpu.memory_space<smem>>
    %c87 = arith.constant 87 : index
    %95 = memref.load %arg1[%c87] : memref<98xf32, #tpu.memory_space<smem>>
    %c88 = arith.constant 88 : index
    %96 = memref.load %arg1[%c88] : memref<98xf32, #tpu.memory_space<smem>>
    %c89 = arith.constant 89 : index
    %97 = memref.load %arg1[%c89] : memref<98xf32, #tpu.memory_space<smem>>
    %c90 = arith.constant 90 : index
    %98 = memref.load %arg1[%c90] : memref<98xf32, #tpu.memory_space<smem>>
    %c91 = arith.constant 91 : index
    %99 = memref.load %arg1[%c91] : memref<98xf32, #tpu.memory_space<smem>>
    %c92 = arith.constant 92 : index
    %100 = memref.load %arg1[%c92] : memref<98xf32, #tpu.memory_space<smem>>
    %c93 = arith.constant 93 : index
    %101 = memref.load %arg1[%c93] : memref<98xf32, #tpu.memory_space<smem>>
    %c94 = arith.constant 94 : index
    %102 = memref.load %arg1[%c94] : memref<98xf32, #tpu.memory_space<smem>>
    %c95 = arith.constant 95 : index
    %103 = memref.load %arg1[%c95] : memref<98xf32, #tpu.memory_space<smem>>
    %c96 = arith.constant 96 : index
    %104 = memref.load %arg1[%c96] : memref<98xf32, #tpu.memory_space<smem>>
    %c97 = arith.constant 97 : index
    %105 = memref.load %arg1[%c97] : memref<98xf32, #tpu.memory_space<smem>>
    %c0_9 = arith.constant 0 : index
    %c0_10 = arith.constant 0 : index
    %c0_11 = arith.constant 0 : index
    %106 = vector.load %arg2[%c0_9, %c0_10, %c0_11] : memref<1x4x256xf32, #tpu.memory_space<vmem>>, vector<1x4x256xf32>
    %107 = vector.shape_cast %106 : vector<1x4x256xf32> to vector<4x256xf32>
    %cst_12 = arith.constant dense<0.000000e+00> : vector<256xf32>
    %108 = vector.multi_reduction <add>, %107, %cst_12 [0] : vector<4x256xf32> to vector<256xf32>
    %109 = vector.shape_cast %108 : vector<256xf32> to vector<1x256xf32>
    %cst_13 = arith.constant dense<0xFF800000> : vector<256xf32>
    %110 = vector.multi_reduction <maximumf>, %107, %cst_13 [0] : vector<4x256xf32> to vector<256xf32>
    %111 = vector.shape_cast %110 : vector<256xf32> to vector<1x256xf32>
    %cst_14 = arith.constant 2.500000e-01 : f32
    %112 = vector.broadcast %cst_14 : f32 to vector<1x256xf32>
    %113 = arith.mulf %109, %112 : vector<1x256xf32>
    %114 = vector.extract_strided_slice %113 {offsets = [0, 0], sizes = [1, 16], strides = [1, 1]} : vector<1x256xf32> to vector<1x16xf32>
    %c0_15 = arith.constant 0 : index
    %c0_16 = arith.constant 0 : index
    %c3_17 = arith.constant 3 : index
    %c3_18 = arith.constant 3 : index
    %115 = vector.load %arg4[%c0_15, %c0_16, %c3_17, %c3_18] : memref<2x7x22x128xf32, #tpu.memory_space<vmem>>, vector<1x1x1x16xf32>
    %116 = vector.shape_cast %115 : vector<1x1x1x16xf32> to vector<1x16xf32>
    %117 = vector.shape_cast %114 : vector<1x16xf32> to vector<1x1x1x16xf32>
    tpu.vector_store %arg4[%c0_15, %c0_16, %c3_17, %c3_18], %117 {strides = array<i32>} : memref<2x7x22x128xf32, #tpu.memory_space<vmem>>, vector<1x1x1x16xf32>,
    %118 = vector.extract_strided_slice %113 {offsets = [0, 16], sizes = [1, 16], strides = [1, 1]} : vector<1x256xf32> to vector<1x16xf32>
    %c0_19 = arith.constant 0 : index
    %c0_20 = arith.constant 0 : index
    %c4_21 = arith.constant 4 : index
    %c3_22 = arith.constant 3 : index
    %119 = vector.load %arg4[%c0_19, %c0_20, %c4_21, %c3_22] : memref<2x7x22x128xf32, #tpu.memory_space<vmem>>, vector<1x1x1x16xf32>
    %120 = vector.shape_cast %119 : vector<1x1x1x16xf32> to vector<1x16xf32>
    %121 = vector.shape_cast %118 : vector<1x16xf32> to vector<1x1x1x16xf32>
    tpu.vector_store %arg4[%c0_19, %c0_20, %c4_21, %c3_22], %121 {strides = array<i32>} : memref<2x7x22x128xf32, #tpu.memory_space<vmem>>, vector<1x1x1x16xf32>,
    %122 = vector.extract_strided_slice %113 {offsets = [0, 32], sizes = [1, 16], strides = [1, 1]} : vector<1x256xf32> to vector<1x16xf32>
    %c0_23 = arith.constant 0 : index
    %c0_24 = arith.constant 0 : index
    %c5_25 = arith.constant 5 : index
    %c3_26 = arith.constant 3 : index
    %123 = vector.load %arg4[%c0_23, %c0_24, %c5_25, %c3_26] : memref<2x7x22x128xf32, #tpu.memory_space<vmem>>, vector<1x1x1x16xf32>
    %124 = vector.shape_cast %123 : vector<1x1x1x16xf32> to vector<1x16xf32>
    %125 = vector.shape_cast %122 : vector<1x16xf32> to vector<1x1x1x16xf32>
    tpu.vector_store %arg4[%c0_23, %c0_24, %c5_25, %c3_26], %125 {strides = array<i32>} : memref<2x7x22x128xf32, #tpu.memory_space<vmem>>, vector<1x1x1x16xf32>,
    %126 = vector.extract_strided_slice %113 {offsets = [0, 48], sizes = [1, 16], strides = [1, 1]} : vector<1x256xf32> to vector<1x16xf32>
    %c0_27 = arith.constant 0 : index
    %c0_28 = arith.constant 0 : index
    %c6_29 = arith.constant 6 : index
    %c3_30 = arith.constant 3 : index
    %127 = vector.load %arg4[%c0_27, %c0_28, %c6_29, %c3_30] : memref<2x7x22x128xf32, #tpu.memory_space<vmem>>, vector<1x1x1x16xf32>
    %128 = vector.shape_cast %127 : vector<1x1x1x16xf32> to vector<1x16xf32>
    %129 = vector.shape_cast %126 : vector<1x16xf32> to vector<1x1x1x16xf32>
    tpu.vector_store %arg4[%c0_27, %c0_28, %c6_29, %c3_30], %129 {strides = array<i32>} : memref<2x7x22x128xf32, #tpu.memory_space<vmem>>, vector<1x1x1x16xf32>,
    %130 = vector.extract_strided_slice %113 {offsets = [0, 64], sizes = [1, 16], strides = [1, 1]} : vector<1x256xf32> to vector<1x16xf32>
    %c0_31 = arith.constant 0 : index
    %c0_32 = arith.constant 0 : index
    %c7_33 = arith.constant 7 : index
    %c3_34 = arith.constant 3 : index
    %131 = vector.load %arg4[%c0_31, %c0_32, %c7_33, %c3_34] : memref<2x7x22x128xf32, #tpu.memory_space<vmem>>, vector<1x1x1x16xf32>
    %132 = vector.shape_cast %131 : vector<1x1x1x16xf32> to vector<1x16xf32>
    %133 = vector.shape_cast %130 : vector<1x16xf32> to vector<1x1x1x16xf32>
    tpu.vector_store %arg4[%c0_31, %c0_32, %c7_33, %c3_34], %133 {strides = array<i32>} : memref<2x7x22x128xf32, #tpu.memory_space<vmem>>, vector<1x1x1x16xf32>,
    %134 = vector.extract_strided_slice %113 {offsets = [0, 80], sizes = [1, 16], strides = [1, 1]} : vector<1x256xf32> to vector<1x16xf32>
    %c0_35 = arith.constant 0 : index
    %c0_36 = arith.constant 0 : index
    %c8_37 = arith.constant 8 : index
    %c3_38 = arith.constant 3 : index
    %135 = vector.load %arg4[%c0_35, %c0_36, %c8_37, %c3_38] : memref<2x7x22x128xf32, #tpu.memory_space<vmem>>, vector<1x1x1x16xf32>
    %136 = vector.shape_cast %135 : vector<1x1x1x16xf32> to vector<1x16xf32>
    %137 = vector.shape_cast %134 : vector<1x16xf32> to vector<1x1x1x16xf32>
    tpu.vector_store %arg4[%c0_35, %c0_36, %c8_37, %c3_38], %137 {strides = array<i32>} : memref<2x7x22x128xf32, #tpu.memory_space<vmem>>, vector<1x1x1x16xf32>,
    %138 = vector.extract_strided_slice %113 {offsets = [0, 96], sizes = [1, 16], strides = [1, 1]} : vector<1x256xf32> to vector<1x16xf32>
    %c0_39 = arith.constant 0 : index
    %c0_40 = arith.constant 0 : index
    %c9_41 = arith.constant 9 : index
    %c3_42 = arith.constant 3 : index
    %139 = vector.load %arg4[%c0_39, %c0_40, %c9_41, %c3_42] : memref<2x7x22x128xf32, #tpu.memory_space<vmem>>, vector<1x1x1x16xf32>
    %140 = vector.shape_cast %139 : vector<1x1x1x16xf32> to vector<1x16xf32>
    %141 = vector.shape_cast %138 : vector<1x16xf32> to vector<1x1x1x16xf32>
    tpu.vector_store %arg4[%c0_39, %c0_40, %c9_41, %c3_42], %141 {strides = array<i32>} : memref<2x7x22x128xf32, #tpu.memory_space<vmem>>, vector<1x1x1x16xf32>,
    %142 = vector.extract_strided_slice %113 {offsets = [0, 112], sizes = [1, 16], strides = [1, 1]} : vector<1x256xf32> to vector<1x16xf32>
    %c0_43 = arith.constant 0 : index
    %c0_44 = arith.constant 0 : index
    %c10_45 = arith.constant 10 : index
    %c3_46 = arith.constant 3 : index
    %143 = vector.load %arg4[%c0_43, %c0_44, %c10_45, %c3_46] : memref<2x7x22x128xf32, #tpu.memory_space<vmem>>, vector<1x1x1x16xf32>
    %144 = vector.shape_cast %143 : vector<1x1x1x16xf32> to vector<1x16xf32>
    %145 = vector.shape_cast %142 : vector<1x16xf32> to vector<1x1x1x16xf32>
    tpu.vector_store %arg4[%c0_43, %c0_44, %c10_45, %c3_46], %145 {strides = array<i32>} : memref<2x7x22x128xf32, #tpu.memory_space<vmem>>, vector<1x1x1x16xf32>,
    %146 = vector.extract_strided_slice %113 {offsets = [0, 128], sizes = [1, 16], strides = [1, 1]} : vector<1x256xf32> to vector<1x16xf32>
    %c0_47 = arith.constant 0 : index
    %c0_48 = arith.constant 0 : index
    %c11_49 = arith.constant 11 : index
    %c3_50 = arith.constant 3 : index
    %147 = vector.load %arg4[%c0_47, %c0_48, %c11_49, %c3_50] : memref<2x7x22x128xf32, #tpu.memory_space<vmem>>, vector<1x1x1x16xf32>
    %148 = vector.shape_cast %147 : vector<1x1x1x16xf32> to vector<1x16xf32>
    %149 = vector.shape_cast %146 : vector<1x16xf32> to vector<1x1x1x16xf32>
    tpu.vector_store %arg4[%c0_47, %c0_48, %c11_49, %c3_50], %149 {strides = array<i32>} : memref<2x7x22x128xf32, #tpu.memory_space<vmem>>, vector<1x1x1x16xf32>,
    %150 = vector.extract_strided_slice %113 {offsets = [0, 144], sizes = [1, 16], strides = [1, 1]} : vector<1x256xf32> to vector<1x16xf32>
    %c0_51 = arith.constant 0 : index
    %c0_52 = arith.constant 0 : index
    %c12_53 = arith.constant 12 : index
    %c3_54 = arith.constant 3 : index
    %151 = vector.load %arg4[%c0_51, %c0_52, %c12_53, %c3_54] : memref<2x7x22x128xf32, #tpu.memory_space<vmem>>, vector<1x1x1x16xf32>
    %152 = vector.shape_cast %151 : vector<1x1x1x16xf32> to vector<1x16xf32>
    %153 = vector.shape_cast %150 : vector<1x16xf32> to vector<1x1x1x16xf32>
    tpu.vector_store %arg4[%c0_51, %c0_52, %c12_53, %c3_54], %153 {strides = array<i32>} : memref<2x7x22x128xf32, #tpu.memory_space<vmem>>, vector<1x1x1x16xf32>,
    %154 = vector.extract_strided_slice %113 {offsets = [0, 160], sizes = [1, 16], strides = [1, 1]} : vector<1x256xf32> to vector<1x16xf32>
    %c0_55 = arith.constant 0 : index
    %c0_56 = arith.constant 0 : index
    %c13_57 = arith.constant 13 : index
    %c3_58 = arith.constant 3 : index
    %155 = vector.load %arg4[%c0_55, %c0_56, %c13_57, %c3_58] : memref<2x7x22x128xf32, #tpu.memory_space<vmem>>, vector<1x1x1x16xf32>
    %156 = vector.shape_cast %155 : vector<1x1x1x16xf32> to vector<1x16xf32>
    %157 = vector.shape_cast %154 : vector<1x16xf32> to vector<1x1x1x16xf32>
    tpu.vector_store %arg4[%c0_55, %c0_56, %c13_57, %c3_58], %157 {strides = array<i32>} : memref<2x7x22x128xf32, #tpu.memory_space<vmem>>, vector<1x1x1x16xf32>,
    %158 = vector.extract_strided_slice %113 {offsets = [0, 176], sizes = [1, 16], strides = [1, 1]} : vector<1x256xf32> to vector<1x16xf32>
    %c0_59 = arith.constant 0 : index
    %c0_60 = arith.constant 0 : index
    %c14_61 = arith.constant 14 : index
    %c3_62 = arith.constant 3 : index
    %159 = vector.load %arg4[%c0_59, %c0_60, %c14_61, %c3_62] : memref<2x7x22x128xf32, #tpu.memory_space<vmem>>, vector<1x1x1x16xf32>
    %160 = vector.shape_cast %159 : vector<1x1x1x16xf32> to vector<1x16xf32>
    %161 = vector.shape_cast %158 : vector<1x16xf32> to vector<1x1x1x16xf32>
    tpu.vector_store %arg4[%c0_59, %c0_60, %c14_61, %c3_62], %161 {strides = array<i32>} : memref<2x7x22x128xf32, #tpu.memory_space<vmem>>, vector<1x1x1x16xf32>,
    %162 = vector.extract_strided_slice %113 {offsets = [0, 192], sizes = [1, 16], strides = [1, 1]} : vector<1x256xf32> to vector<1x16xf32>
    %c0_63 = arith.constant 0 : index
    %c0_64 = arith.constant 0 : index
    %c15_65 = arith.constant 15 : index
    %c3_66 = arith.constant 3 : index
    %163 = vector.load %arg4[%c0_63, %c0_64, %c15_65, %c3_66] : memref<2x7x22x128xf32, #tpu.memory_space<vmem>>, vector<1x1x1x16xf32>
    %164 = vector.shape_cast %163 : vector<1x1x1x16xf32> to vector<1x16xf32>
    %165 = vector.shape_cast %162 : vector<1x16xf32> to vector<1x1x1x16xf32>
    tpu.vector_store %arg4[%c0_63, %c0_64, %c15_65, %c3_66], %165 {strides = array<i32>} : memref<2x7x22x128xf32, #tpu.memory_space<vmem>>, vector<1x1x1x16xf32>,
    %166 = vector.extract_strided_slice %113 {offsets = [0, 208], sizes = [1, 16], strides = [1, 1]} : vector<1x256xf32> to vector<1x16xf32>
    %c0_67 = arith.constant 0 : index
    %c0_68 = arith.constant 0 : index
    %c16_69 = arith.constant 16 : index
    %c3_70 = arith.constant 3 : index
    %167 = vector.load %arg4[%c0_67, %c0_68, %c16_69, %c3_70] : memref<2x7x22x128xf32, #tpu.memory_space<vmem>>, vector<1x1x1x16xf32>
    %168 = vector.shape_cast %167 : vector<1x1x1x16xf32> to vector<1x16xf32>
    %169 = vector.shape_cast %166 : vector<1x16xf32> to vector<1x1x1x16xf32>
    tpu.vector_store %arg4[%c0_67, %c0_68, %c16_69, %c3_70], %169 {strides = array<i32>} : memref<2x7x22x128xf32, #tpu.memory_space<vmem>>, vector<1x1x1x16xf32>,
    %170 = vector.extract_strided_slice %113 {offsets = [0, 224], sizes = [1, 16], strides = [1, 1]} : vector<1x256xf32> to vector<1x16xf32>
    %c0_71 = arith.constant 0 : index
    %c0_72 = arith.constant 0 : index
    %c17_73 = arith.constant 17 : index
    %c3_74 = arith.constant 3 : index
    %171 = vector.load %arg4[%c0_71, %c0_72, %c17_73, %c3_74] : memref<2x7x22x128xf32, #tpu.memory_space<vmem>>, vector<1x1x1x16xf32>
    %172 = vector.shape_cast %171 : vector<1x1x1x16xf32> to vector<1x16xf32>
    %173 = vector.shape_cast %170 : vector<1x16xf32> to vector<1x1x1x16xf32>
    tpu.vector_store %arg4[%c0_71, %c0_72, %c17_73, %c3_74], %173 {strides = array<i32>} : memref<2x7x22x128xf32, #tpu.memory_space<vmem>>, vector<1x1x1x16xf32>,
    %174 = vector.extract_strided_slice %113 {offsets = [0, 240], sizes = [1, 16], strides = [1, 1]} : vector<1x256xf32> to vector<1x16xf32>
    %c0_75 = arith.constant 0 : index
    %c0_76 = arith.constant 0 : index
    %c18_77 = arith.constant 18 : index
    %c3_78 = arith.constant 3 : index
    %175 = vector.load %arg4[%c0_75, %c0_76, %c18_77, %c3_78] : memref<2x7x22x128xf32, #tpu.memory_space<vmem>>, vector<1x1x1x16xf32>
    %176 = vector.shape_cast %175 : vector<1x1x1x16xf32> to vector<1x16xf32>
    %177 = vector.shape_cast %174 : vector<1x16xf32> to vector<1x1x1x16xf32>
    tpu.vector_store %arg4[%c0_75, %c0_76, %c18_77, %c3_78], %177 {strides = array<i32>} : memref<2x7x22x128xf32, #tpu.memory_space<vmem>>, vector<1x1x1x16xf32>,
    %c0_79 = arith.constant 0 : index
    %c0_80 = arith.constant 0 : index
    %c0_81 = arith.constant 0 : index
    %c0_82 = arith.constant 0 : index
    %178 = vector.load %arg4[%c0_79, %c0_80, %c0_81, %c0_82] : memref<2x7x22x128xf32, #tpu.memory_space<vmem>>, vector<1x1x22x128xf32>
    %179 = vector.shape_cast %178 : vector<1x1x22x128xf32> to vector<22x128xf32>
    %c127_i32 = arith.constant 127 : i32
    %180 = tpu.dynamic_rotate %179 by %c127_i32 dim 1 : vector<22x128xf32>, i32 -> vector<22x128xf32>
    %c0_83 = arith.constant 0 : index
    %c1_84 = arith.constant 1 : index
    %c0_85 = arith.constant 0 : index
    %c0_86 = arith.constant 0 : index
    %181 = vector.load %arg4[%c0_83, %c1_84, %c0_85, %c0_86] : memref<2x7x22x128xf32, #tpu.memory_space<vmem>>, vector<1x1x22x128xf32>
    %182 = vector.shape_cast %181 : vector<1x1x22x128xf32> to vector<22x128xf32>
    %183 = vector.shape_cast %180 : vector<22x128xf32> to vector<1x1x22x128xf32>
    tpu.vector_store %arg4[%c0_83, %c1_84, %c0_85, %c0_86], %183 {strides = array<i32>} : memref<2x7x22x128xf32, #tpu.memory_space<vmem>>, vector<1x1x22x128xf32>,
    %c126_i32 = arith.constant 126 : i32
    %184 = tpu.dynamic_rotate %179 by %c126_i32 dim 1 : vector<22x128xf32>, i32 -> vector<22x128xf32>
    %c0_87 = arith.constant 0 : index
    %c2_88 = arith.constant 2 : index
    %c0_89 = arith.constant 0 : index
    %c0_90 = arith.constant 0 : index
    %185 = vector.load %arg4[%c0_87, %c2_88, %c0_89, %c0_90] : memref<2x7x22x128xf32, #tpu.memory_space<vmem>>, vector<1x1x22x128xf32>
    %186 = vector.shape_cast %185 : vector<1x1x22x128xf32> to vector<22x128xf32>
    %187 = vector.shape_cast %184 : vector<22x128xf32> to vector<1x1x22x128xf32>
    tpu.vector_store %arg4[%c0_87, %c2_88, %c0_89, %c0_90], %187 {strides = array<i32>} : memref<2x7x22x128xf32, #tpu.memory_space<vmem>>, vector<1x1x22x128xf32>,
    %c125_i32 = arith.constant 125 : i32
    %188 = tpu.dynamic_rotate %179 by %c125_i32 dim 1 : vector<22x128xf32>, i32 -> vector<22x128xf32>
    %c0_91 = arith.constant 0 : index
    %c3_92 = arith.constant 3 : index
    %c0_93 = arith.constant 0 : index
    %c0_94 = arith.constant 0 : index
    %189 = vector.load %arg4[%c0_91, %c3_92, %c0_93, %c0_94] : memref<2x7x22x128xf32, #tpu.memory_space<vmem>>, vector<1x1x22x128xf32>
    %190 = vector.shape_cast %189 : vector<1x1x22x128xf32> to vector<22x128xf32>
    %191 = vector.shape_cast %188 : vector<22x128xf32> to vector<1x1x22x128xf32>
    tpu.vector_store %arg4[%c0_91, %c3_92, %c0_93, %c0_94], %191 {strides = array<i32>} : memref<2x7x22x128xf32, #tpu.memory_space<vmem>>, vector<1x1x22x128xf32>,
    %c124_i32 = arith.constant 124 : i32
    %192 = tpu.dynamic_rotate %179 by %c124_i32 dim 1 : vector<22x128xf32>, i32 -> vector<22x128xf32>
    %c0_95 = arith.constant 0 : index
    %c4_96 = arith.constant 4 : index
    %c0_97 = arith.constant 0 : index
    %c0_98 = arith.constant 0 : index
    %193 = vector.load %arg4[%c0_95, %c4_96, %c0_97, %c0_98] : memref<2x7x22x128xf32, #tpu.memory_space<vmem>>, vector<1x1x22x128xf32>
    %194 = vector.shape_cast %193 : vector<1x1x22x128xf32> to vector<22x128xf32>
    %195 = vector.shape_cast %192 : vector<22x128xf32> to vector<1x1x22x128xf32>
    tpu.vector_store %arg4[%c0_95, %c4_96, %c0_97, %c0_98], %195 {strides = array<i32>} : memref<2x7x22x128xf32, #tpu.memory_space<vmem>>, vector<1x1x22x128xf32>,
    %c123_i32 = arith.constant 123 : i32
    %196 = tpu.dynamic_rotate %179 by %c123_i32 dim 1 : vector<22x128xf32>, i32 -> vector<22x128xf32>
    %c0_99 = arith.constant 0 : index
    %c5_100 = arith.constant 5 : index
    %c0_101 = arith.constant 0 : index
    %c0_102 = arith.constant 0 : index
    %197 = vector.load %arg4[%c0_99, %c5_100, %c0_101, %c0_102] : memref<2x7x22x128xf32, #tpu.memory_space<vmem>>, vector<1x1x22x128xf32>
    %198 = vector.shape_cast %197 : vector<1x1x22x128xf32> to vector<22x128xf32>
    %199 = vector.shape_cast %196 : vector<22x128xf32> to vector<1x1x22x128xf32>
    tpu.vector_store %arg4[%c0_99, %c5_100, %c0_101, %c0_102], %199 {strides = array<i32>} : memref<2x7x22x128xf32, #tpu.memory_space<vmem>>, vector<1x1x22x128xf32>,
    %c122_i32 = arith.constant 122 : i32
    %200 = tpu.dynamic_rotate %179 by %c122_i32 dim 1 : vector<22x128xf32>, i32 -> vector<22x128xf32>
    %c0_103 = arith.constant 0 : index
    %c6_104 = arith.constant 6 : index
    %c0_105 = arith.constant 0 : index
    %c0_106 = arith.constant 0 : index
    %201 = vector.load %arg4[%c0_103, %c6_104, %c0_105, %c0_106] : memref<2x7x22x128xf32, #tpu.memory_space<vmem>>, vector<1x1x22x128xf32>
    %202 = vector.shape_cast %201 : vector<1x1x22x128xf32> to vector<22x128xf32>
    %203 = vector.shape_cast %200 : vector<22x128xf32> to vector<1x1x22x128xf32>
    tpu.vector_store %arg4[%c0_103, %c6_104, %c0_105, %c0_106], %203 {strides = array<i32>} : memref<2x7x22x128xf32, #tpu.memory_space<vmem>>, vector<1x1x22x128xf32>,
    %204 = vector.extract_strided_slice %111 {offsets = [0, 0], sizes = [1, 16], strides = [1, 1]} : vector<1x256xf32> to vector<1x16xf32>
    %c1_107 = arith.constant 1 : index
    %c0_108 = arith.constant 0 : index
    %c3_109 = arith.constant 3 : index
    %c3_110 = arith.constant 3 : index
    %205 = vector.load %arg4[%c1_107, %c0_108, %c3_109, %c3_110] : memref<2x7x22x128xf32, #tpu.memory_space<vmem>>, vector<1x1x1x16xf32>
    %206 = vector.shape_cast %205 : vector<1x1x1x16xf32> to vector<1x16xf32>
    %207 = vector.shape_cast %204 : vector<1x16xf32> to vector<1x1x1x16xf32>
    tpu.vector_store %arg4[%c1_107, %c0_108, %c3_109, %c3_110], %207 {strides = array<i32>} : memref<2x7x22x128xf32, #tpu.memory_space<vmem>>, vector<1x1x1x16xf32>,
    %208 = vector.extract_strided_slice %111 {offsets = [0, 16], sizes = [1, 16], strides = [1, 1]} : vector<1x256xf32> to vector<1x16xf32>
    %c1_111 = arith.constant 1 : index
    %c0_112 = arith.constant 0 : index
    %c4_113 = arith.constant 4 : index
    %c3_114 = arith.constant 3 : index
    %209 = vector.load %arg4[%c1_111, %c0_112, %c4_113, %c3_114] : memref<2x7x22x128xf32, #tpu.memory_space<vmem>>, vector<1x1x1x16xf32>
    %210 = vector.shape_cast %209 : vector<1x1x1x16xf32> to vector<1x16xf32>
    %211 = vector.shape_cast %208 : vector<1x16xf32> to vector<1x1x1x16xf32>
    tpu.vector_store %arg4[%c1_111, %c0_112, %c4_113, %c3_114], %211 {strides = array<i32>} : memref<2x7x22x128xf32, #tpu.memory_space<vmem>>, vector<1x1x1x16xf32>,
    %212 = vector.extract_strided_slice %111 {offsets = [0, 32], sizes = [1, 16], strides = [1, 1]} : vector<1x256xf32> to vector<1x16xf32>
    %c1_115 = arith.constant 1 : index
    %c0_116 = arith.constant 0 : index
    %c5_117 = arith.constant 5 : index
    %c3_118 = arith.constant 3 : index
    %213 = vector.load %arg4[%c1_115, %c0_116, %c5_117, %c3_118] : memref<2x7x22x128xf32, #tpu.memory_space<vmem>>, vector<1x1x1x16xf32>
    %214 = vector.shape_cast %213 : vector<1x1x1x16xf32> to vector<1x16xf32>
    %215 = vector.shape_cast %212 : vector<1x16xf32> to vector<1x1x1x16xf32>
    tpu.vector_store %arg4[%c1_115, %c0_116, %c5_117, %c3_118], %215 {strides = array<i32>} : memref<2x7x22x128xf32, #tpu.memory_space<vmem>>, vector<1x1x1x16xf32>,
    %216 = vector.extract_strided_slice %111 {offsets = [0, 48], sizes = [1, 16], strides = [1, 1]} : vector<1x256xf32> to vector<1x16xf32>
    %c1_119 = arith.constant 1 : index
    %c0_120 = arith.constant 0 : index
    %c6_121 = arith.constant 6 : index
    %c3_122 = arith.constant 3 : index
    %217 = vector.load %arg4[%c1_119, %c0_120, %c6_121, %c3_122] : memref<2x7x22x128xf32, #tpu.memory_space<vmem>>, vector<1x1x1x16xf32>
    %218 = vector.shape_cast %217 : vector<1x1x1x16xf32> to vector<1x16xf32>
    %219 = vector.shape_cast %216 : vector<1x16xf32> to vector<1x1x1x16xf32>
    tpu.vector_store %arg4[%c1_119, %c0_120, %c6_121, %c3_122], %219 {strides = array<i32>} : memref<2x7x22x128xf32, #tpu.memory_space<vmem>>, vector<1x1x1x16xf32>,
    %220 = vector.extract_strided_slice %111 {offsets = [0, 64], sizes = [1, 16], strides = [1, 1]} : vector<1x256xf32> to vector<1x16xf32>
    %c1_123 = arith.constant 1 : index
    %c0_124 = arith.constant 0 : index
    %c7_125 = arith.constant 7 : index
    %c3_126 = arith.constant 3 : index
    %221 = vector.load %arg4[%c1_123, %c0_124, %c7_125, %c3_126] : memref<2x7x22x128xf32, #tpu.memory_space<vmem>>, vector<1x1x1x16xf32>
    %222 = vector.shape_cast %221 : vector<1x1x1x16xf32> to vector<1x16xf32>
    %223 = vector.shape_cast %220 : vector<1x16xf32> to vector<1x1x1x16xf32>
    tpu.vector_store %arg4[%c1_123, %c0_124, %c7_125, %c3_126], %223 {strides = array<i32>} : memref<2x7x22x128xf32, #tpu.memory_space<vmem>>, vector<1x1x1x16xf32>,
    %224 = vector.extract_strided_slice %111 {offsets = [0, 80], sizes = [1, 16], strides = [1, 1]} : vector<1x256xf32> to vector<1x16xf32>
    %c1_127 = arith.constant 1 : index
    %c0_128 = arith.constant 0 : index
    %c8_129 = arith.constant 8 : index
    %c3_130 = arith.constant 3 : index
    %225 = vector.load %arg4[%c1_127, %c0_128, %c8_129, %c3_130] : memref<2x7x22x128xf32, #tpu.memory_space<vmem>>, vector<1x1x1x16xf32>
    %226 = vector.shape_cast %225 : vector<1x1x1x16xf32> to vector<1x16xf32>
    %227 = vector.shape_cast %224 : vector<1x16xf32> to vector<1x1x1x16xf32>
    tpu.vector_store %arg4[%c1_127, %c0_128, %c8_129, %c3_130], %227 {strides = array<i32>} : memref<2x7x22x128xf32, #tpu.memory_space<vmem>>, vector<1x1x1x16xf32>,
    %228 = vector.extract_strided_slice %111 {offsets = [0, 96], sizes = [1, 16], strides = [1, 1]} : vector<1x256xf32> to vector<1x16xf32>
    %c1_131 = arith.constant 1 : index
    %c0_132 = arith.constant 0 : index
    %c9_133 = arith.constant 9 : index
    %c3_134 = arith.constant 3 : index
    %229 = vector.load %arg4[%c1_131, %c0_132, %c9_133, %c3_134] : memref<2x7x22x128xf32, #tpu.memory_space<vmem>>, vector<1x1x1x16xf32>
    %230 = vector.shape_cast %229 : vector<1x1x1x16xf32> to vector<1x16xf32>
    %231 = vector.shape_cast %228 : vector<1x16xf32> to vector<1x1x1x16xf32>
    tpu.vector_store %arg4[%c1_131, %c0_132, %c9_133, %c3_134], %231 {strides = array<i32>} : memref<2x7x22x128xf32, #tpu.memory_space<vmem>>, vector<1x1x1x16xf32>,
    %232 = vector.extract_strided_slice %111 {offsets = [0, 112], sizes = [1, 16], strides = [1, 1]} : vector<1x256xf32> to vector<1x16xf32>
    %c1_135 = arith.constant 1 : index
    %c0_136 = arith.constant 0 : index
    %c10_137 = arith.constant 10 : index
    %c3_138 = arith.constant 3 : index
    %233 = vector.load %arg4[%c1_135, %c0_136, %c10_137, %c3_138] : memref<2x7x22x128xf32, #tpu.memory_space<vmem>>, vector<1x1x1x16xf32>
    %234 = vector.shape_cast %233 : vector<1x1x1x16xf32> to vector<1x16xf32>
    %235 = vector.shape_cast %232 : vector<1x16xf32> to vector<1x1x1x16xf32>
    tpu.vector_store %arg4[%c1_135, %c0_136, %c10_137, %c3_138], %235 {strides = array<i32>} : memref<2x7x22x128xf32, #tpu.memory_space<vmem>>, vector<1x1x1x16xf32>,
    %236 = vector.extract_strided_slice %111 {offsets = [0, 128], sizes = [1, 16], strides = [1, 1]} : vector<1x256xf32> to vector<1x16xf32>
    %c1_139 = arith.constant 1 : index
    %c0_140 = arith.constant 0 : index
    %c11_141 = arith.constant 11 : index
    %c3_142 = arith.constant 3 : index
    %237 = vector.load %arg4[%c1_139, %c0_140, %c11_141, %c3_142] : memref<2x7x22x128xf32, #tpu.memory_space<vmem>>, vector<1x1x1x16xf32>
    %238 = vector.shape_cast %237 : vector<1x1x1x16xf32> to vector<1x16xf32>
    %239 = vector.shape_cast %236 : vector<1x16xf32> to vector<1x1x1x16xf32>
    tpu.vector_store %arg4[%c1_139, %c0_140, %c11_141, %c3_142], %239 {strides = array<i32>} : memref<2x7x22x128xf32, #tpu.memory_space<vmem>>, vector<1x1x1x16xf32>,
    %240 = vector.extract_strided_slice %111 {offsets = [0, 144], sizes = [1, 16], strides = [1, 1]} : vector<1x256xf32> to vector<1x16xf32>
    %c1_143 = arith.constant 1 : index
    %c0_144 = arith.constant 0 : index
    %c12_145 = arith.constant 12 : index
    %c3_146 = arith.constant 3 : index
    %241 = vector.load %arg4[%c1_143, %c0_144, %c12_145, %c3_146] : memref<2x7x22x128xf32, #tpu.memory_space<vmem>>, vector<1x1x1x16xf32>
    %242 = vector.shape_cast %241 : vector<1x1x1x16xf32> to vector<1x16xf32>
    %243 = vector.shape_cast %240 : vector<1x16xf32> to vector<1x1x1x16xf32>
    tpu.vector_store %arg4[%c1_143, %c0_144, %c12_145, %c3_146], %243 {strides = array<i32>} : memref<2x7x22x128xf32, #tpu.memory_space<vmem>>, vector<1x1x1x16xf32>,
    %244 = vector.extract_strided_slice %111 {offsets = [0, 160], sizes = [1, 16], strides = [1, 1]} : vector<1x256xf32> to vector<1x16xf32>
    %c1_147 = arith.constant 1 : index
    %c0_148 = arith.constant 0 : index
    %c13_149 = arith.constant 13 : index
    %c3_150 = arith.constant 3 : index
    %245 = vector.load %arg4[%c1_147, %c0_148, %c13_149, %c3_150] : memref<2x7x22x128xf32, #tpu.memory_space<vmem>>, vector<1x1x1x16xf32>
    %246 = vector.shape_cast %245 : vector<1x1x1x16xf32> to vector<1x16xf32>
    %247 = vector.shape_cast %244 : vector<1x16xf32> to vector<1x1x1x16xf32>
    tpu.vector_store %arg4[%c1_147, %c0_148, %c13_149, %c3_150], %247 {strides = array<i32>} : memref<2x7x22x128xf32, #tpu.memory_space<vmem>>, vector<1x1x1x16xf32>,
    %248 = vector.extract_strided_slice %111 {offsets = [0, 176], sizes = [1, 16], strides = [1, 1]} : vector<1x256xf32> to vector<1x16xf32>
    %c1_151 = arith.constant 1 : index
    %c0_152 = arith.constant 0 : index
    %c14_153 = arith.constant 14 : index
    %c3_154 = arith.constant 3 : index
    %249 = vector.load %arg4[%c1_151, %c0_152, %c14_153, %c3_154] : memref<2x7x22x128xf32, #tpu.memory_space<vmem>>, vector<1x1x1x16xf32>
    %250 = vector.shape_cast %249 : vector<1x1x1x16xf32> to vector<1x16xf32>
    %251 = vector.shape_cast %248 : vector<1x16xf32> to vector<1x1x1x16xf32>
    tpu.vector_store %arg4[%c1_151, %c0_152, %c14_153, %c3_154], %251 {strides = array<i32>} : memref<2x7x22x128xf32, #tpu.memory_space<vmem>>, vector<1x1x1x16xf32>,
    %252 = vector.extract_strided_slice %111 {offsets = [0, 192], sizes = [1, 16], strides = [1, 1]} : vector<1x256xf32> to vector<1x16xf32>
    %c1_155 = arith.constant 1 : index
    %c0_156 = arith.constant 0 : index
    %c15_157 = arith.constant 15 : index
    %c3_158 = arith.constant 3 : index
    %253 = vector.load %arg4[%c1_155, %c0_156, %c15_157, %c3_158] : memref<2x7x22x128xf32, #tpu.memory_space<vmem>>, vector<1x1x1x16xf32>
    %254 = vector.shape_cast %253 : vector<1x1x1x16xf32> to vector<1x16xf32>
    %255 = vector.shape_cast %252 : vector<1x16xf32> to vector<1x1x1x16xf32>
    tpu.vector_store %arg4[%c1_155, %c0_156, %c15_157, %c3_158], %255 {strides = array<i32>} : memref<2x7x22x128xf32, #tpu.memory_space<vmem>>, vector<1x1x1x16xf32>,
    %256 = vector.extract_strided_slice %111 {offsets = [0, 208], sizes = [1, 16], strides = [1, 1]} : vector<1x256xf32> to vector<1x16xf32>
    %c1_159 = arith.constant 1 : index
    %c0_160 = arith.constant 0 : index
    %c16_161 = arith.constant 16 : index
    %c3_162 = arith.constant 3 : index
    %257 = vector.load %arg4[%c1_159, %c0_160, %c16_161, %c3_162] : memref<2x7x22x128xf32, #tpu.memory_space<vmem>>, vector<1x1x1x16xf32>
    %258 = vector.shape_cast %257 : vector<1x1x1x16xf32> to vector<1x16xf32>
    %259 = vector.shape_cast %256 : vector<1x16xf32> to vector<1x1x1x16xf32>
    tpu.vector_store %arg4[%c1_159, %c0_160, %c16_161, %c3_162], %259 {strides = array<i32>} : memref<2x7x22x128xf32, #tpu.memory_space<vmem>>, vector<1x1x1x16xf32>,
    %260 = vector.extract_strided_slice %111 {offsets = [0, 224], sizes = [1, 16], strides = [1, 1]} : vector<1x256xf32> to vector<1x16xf32>
    %c1_163 = arith.constant 1 : index
    %c0_164 = arith.constant 0 : index
    %c17_165 = arith.constant 17 : index
    %c3_166 = arith.constant 3 : index
    %261 = vector.load %arg4[%c1_163, %c0_164, %c17_165, %c3_166] : memref<2x7x22x128xf32, #tpu.memory_space<vmem>>, vector<1x1x1x16xf32>
    %262 = vector.shape_cast %261 : vector<1x1x1x16xf32> to vector<1x16xf32>
    %263 = vector.shape_cast %260 : vector<1x16xf32> to vector<1x1x1x16xf32>
    tpu.vector_store %arg4[%c1_163, %c0_164, %c17_165, %c3_166], %263 {strides = array<i32>} : memref<2x7x22x128xf32, #tpu.memory_space<vmem>>, vector<1x1x1x16xf32>,
    %264 = vector.extract_strided_slice %111 {offsets = [0, 240], sizes = [1, 16], strides = [1, 1]} : vector<1x256xf32> to vector<1x16xf32>
    %c1_167 = arith.constant 1 : index
    %c0_168 = arith.constant 0 : index
    %c18_169 = arith.constant 18 : index
    %c3_170 = arith.constant 3 : index
    %265 = vector.load %arg4[%c1_167, %c0_168, %c18_169, %c3_170] : memref<2x7x22x128xf32, #tpu.memory_space<vmem>>, vector<1x1x1x16xf32>
    %266 = vector.shape_cast %265 : vector<1x1x1x16xf32> to vector<1x16xf32>
    %267 = vector.shape_cast %264 : vector<1x16xf32> to vector<1x1x1x16xf32>
    tpu.vector_store %arg4[%c1_167, %c0_168, %c18_169, %c3_170], %267 {strides = array<i32>} : memref<2x7x22x128xf32, #tpu.memory_space<vmem>>, vector<1x1x1x16xf32>,
    %c1_171 = arith.constant 1 : index
    %c0_172 = arith.constant 0 : index
    %c0_173 = arith.constant 0 : index
    %c0_174 = arith.constant 0 : index
    %268 = vector.load %arg4[%c1_171, %c0_172, %c0_173, %c0_174] : memref<2x7x22x128xf32, #tpu.memory_space<vmem>>, vector<1x1x22x128xf32>
    %269 = vector.shape_cast %268 : vector<1x1x22x128xf32> to vector<22x128xf32>
    %c127_i32_175 = arith.constant 127 : i32
    %270 = tpu.dynamic_rotate %269 by %c127_i32_175 dim 1 : vector<22x128xf32>, i32 -> vector<22x128xf32>
    %c1_176 = arith.constant 1 : index
    %c1_177 = arith.constant 1 : index
    %c0_178 = arith.constant 0 : index
    %c0_179 = arith.constant 0 : index
    %271 = vector.load %arg4[%c1_176, %c1_177, %c0_178, %c0_179] : memref<2x7x22x128xf32, #tpu.memory_space<vmem>>, vector<1x1x22x128xf32>
    %272 = vector.shape_cast %271 : vector<1x1x22x128xf32> to vector<22x128xf32>
    %273 = vector.shape_cast %270 : vector<22x128xf32> to vector<1x1x22x128xf32>
    tpu.vector_store %arg4[%c1_176, %c1_177, %c0_178, %c0_179], %273 {strides = array<i32>} : memref<2x7x22x128xf32, #tpu.memory_space<vmem>>, vector<1x1x22x128xf32>,
    %c126_i32_180 = arith.constant 126 : i32
    %274 = tpu.dynamic_rotate %269 by %c126_i32_180 dim 1 : vector<22x128xf32>, i32 -> vector<22x128xf32>
    %c1_181 = arith.constant 1 : index
    %c2_182 = arith.constant 2 : index
    %c0_183 = arith.constant 0 : index
    %c0_184 = arith.constant 0 : index
    %275 = vector.load %arg4[%c1_181, %c2_182, %c0_183, %c0_184] : memref<2x7x22x128xf32, #tpu.memory_space<vmem>>, vector<1x1x22x128xf32>
    %276 = vector.shape_cast %275 : vector<1x1x22x128xf32> to vector<22x128xf32>
    %277 = vector.shape_cast %274 : vector<22x128xf32> to vector<1x1x22x128xf32>
    tpu.vector_store %arg4[%c1_181, %c2_182, %c0_183, %c0_184], %277 {strides = array<i32>} : memref<2x7x22x128xf32, #tpu.memory_space<vmem>>, vector<1x1x22x128xf32>,
    %c125_i32_185 = arith.constant 125 : i32
    %278 = tpu.dynamic_rotate %269 by %c125_i32_185 dim 1 : vector<22x128xf32>, i32 -> vector<22x128xf32>
    %c1_186 = arith.constant 1 : index
    %c3_187 = arith.constant 3 : index
    %c0_188 = arith.constant 0 : index
    %c0_189 = arith.constant 0 : index
    %279 = vector.load %arg4[%c1_186, %c3_187, %c0_188, %c0_189] : memref<2x7x22x128xf32, #tpu.memory_space<vmem>>, vector<1x1x22x128xf32>
    %280 = vector.shape_cast %279 : vector<1x1x22x128xf32> to vector<22x128xf32>
    %281 = vector.shape_cast %278 : vector<22x128xf32> to vector<1x1x22x128xf32>
    tpu.vector_store %arg4[%c1_186, %c3_187, %c0_188, %c0_189], %281 {strides = array<i32>} : memref<2x7x22x128xf32, #tpu.memory_space<vmem>>, vector<1x1x22x128xf32>,
    %c124_i32_190 = arith.constant 124 : i32
    %282 = tpu.dynamic_rotate %269 by %c124_i32_190 dim 1 : vector<22x128xf32>, i32 -> vector<22x128xf32>
    %c1_191 = arith.constant 1 : index
    %c4_192 = arith.constant 4 : index
    %c0_193 = arith.constant 0 : index
    %c0_194 = arith.constant 0 : index
    %283 = vector.load %arg4[%c1_191, %c4_192, %c0_193, %c0_194] : memref<2x7x22x128xf32, #tpu.memory_space<vmem>>, vector<1x1x22x128xf32>
    %284 = vector.shape_cast %283 : vector<1x1x22x128xf32> to vector<22x128xf32>
    %285 = vector.shape_cast %282 : vector<22x128xf32> to vector<1x1x22x128xf32>
    tpu.vector_store %arg4[%c1_191, %c4_192, %c0_193, %c0_194], %285 {strides = array<i32>} : memref<2x7x22x128xf32, #tpu.memory_space<vmem>>, vector<1x1x22x128xf32>,
    %c123_i32_195 = arith.constant 123 : i32
    %286 = tpu.dynamic_rotate %269 by %c123_i32_195 dim 1 : vector<22x128xf32>, i32 -> vector<22x128xf32>
    %c1_196 = arith.constant 1 : index
    %c5_197 = arith.constant 5 : index
    %c0_198 = arith.constant 0 : index
    %c0_199 = arith.constant 0 : index
    %287 = vector.load %arg4[%c1_196, %c5_197, %c0_198, %c0_199] : memref<2x7x22x128xf32, #tpu.memory_space<vmem>>, vector<1x1x22x128xf32>
    %288 = vector.shape_cast %287 : vector<1x1x22x128xf32> to vector<22x128xf32>
    %289 = vector.shape_cast %286 : vector<22x128xf32> to vector<1x1x22x128xf32>
    tpu.vector_store %arg4[%c1_196, %c5_197, %c0_198, %c0_199], %289 {strides = array<i32>} : memref<2x7x22x128xf32, #tpu.memory_space<vmem>>, vector<1x1x22x128xf32>,
    %c122_i32_200 = arith.constant 122 : i32
    %290 = tpu.dynamic_rotate %269 by %c122_i32_200 dim 1 : vector<22x128xf32>, i32 -> vector<22x128xf32>
    %c1_201 = arith.constant 1 : index
    %c6_202 = arith.constant 6 : index
    %c0_203 = arith.constant 0 : index
    %c0_204 = arith.constant 0 : index
    %291 = vector.load %arg4[%c1_201, %c6_202, %c0_203, %c0_204] : memref<2x7x22x128xf32, #tpu.memory_space<vmem>>, vector<1x1x22x128xf32>
    %292 = vector.shape_cast %291 : vector<1x1x22x128xf32> to vector<22x128xf32>
    %293 = vector.shape_cast %290 : vector<22x128xf32> to vector<1x1x22x128xf32>
    tpu.vector_store %arg4[%c1_201, %c6_202, %c0_203, %c0_204], %293 {strides = array<i32>} : memref<2x7x22x128xf32, #tpu.memory_space<vmem>>, vector<1x1x22x128xf32>,
    %cst_205 = arith.constant 0.000000e+00 : f32
    %294 = vector.broadcast %cst_205 : f32 to vector<16x128xf32>
    %cst_206 = arith.constant 0.000000e+00 : f32
    %295 = vector.broadcast %cst_206 : f32 to vector<16x128xf32>
    %cst_207 = arith.constant 0.000000e+00 : f32
    %296 = vector.broadcast %cst_207 : f32 to vector<16x128xf32>
    %cst_208 = arith.constant 0.000000e+00 : f32
    %297 = vector.broadcast %cst_208 : f32 to vector<16x128xf32>
    %c0_209 = arith.constant 0 : index
    %c0_210 = arith.constant 0 : index
    %c0_211 = arith.constant 0 : index
    %c0_212 = arith.constant 0 : index
    %298 = vector.load %arg4[%c0_209, %c0_210, %c0_211, %c0_212] : memref<2x7x22x128xf32, #tpu.memory_space<vmem>>, vector<1x1x16x128xf32>
    %299 = vector.shape_cast %298 : vector<1x1x16x128xf32> to vector<16x128xf32>
    %300 = vector.broadcast %8 : f32 to vector<16x128xf32>
    %301 = arith.mulf %300, %299 : vector<16x128xf32>
    %302 = arith.addf %294, %301 : vector<16x128xf32>
    %c0_213 = arith.constant 0 : index
    %c1_214 = arith.constant 1 : index
    %c0_215 = arith.constant 0 : index
    %c0_216 = arith.constant 0 : index
    %303 = vector.load %arg4[%c0_213, %c1_214, %c0_215, %c0_216] : memref<2x7x22x128xf32, #tpu.memory_space<vmem>>, vector<1x1x16x128xf32>
    %304 = vector.shape_cast %303 : vector<1x1x16x128xf32> to vector<16x128xf32>
    %305 = vector.broadcast %9 : f32 to vector<16x128xf32>
    %306 = arith.mulf %305, %304 : vector<16x128xf32>
    %307 = arith.addf %295, %306 : vector<16x128xf32>
    %c0_217 = arith.constant 0 : index
    %c2_218 = arith.constant 2 : index
    %c0_219 = arith.constant 0 : index
    %c0_220 = arith.constant 0 : index
    %308 = vector.load %arg4[%c0_217, %c2_218, %c0_219, %c0_220] : memref<2x7x22x128xf32, #tpu.memory_space<vmem>>, vector<1x1x16x128xf32>
    %309 = vector.shape_cast %308 : vector<1x1x16x128xf32> to vector<16x128xf32>
    %310 = vector.broadcast %10 : f32 to vector<16x128xf32>
    %311 = arith.mulf %310, %309 : vector<16x128xf32>
    %312 = arith.addf %296, %311 : vector<16x128xf32>
    %c0_221 = arith.constant 0 : index
    %c3_222 = arith.constant 3 : index
    %c0_223 = arith.constant 0 : index
    %c0_224 = arith.constant 0 : index
    %313 = vector.load %arg4[%c0_221, %c3_222, %c0_223, %c0_224] : memref<2x7x22x128xf32, #tpu.memory_space<vmem>>, vector<1x1x16x128xf32>
    %314 = vector.shape_cast %313 : vector<1x1x16x128xf32> to vector<16x128xf32>
    %315 = vector.broadcast %11 : f32 to vector<16x128xf32>
    %316 = arith.mulf %315, %314 : vector<16x128xf32>
    %317 = arith.addf %297, %316 : vector<16x128xf32>
    %c0_225 = arith.constant 0 : index
    %c4_226 = arith.constant 4 : index
    %c0_227 = arith.constant 0 : index
    %c0_228 = arith.constant 0 : index
    %318 = vector.load %arg4[%c0_225, %c4_226, %c0_227, %c0_228] : memref<2x7x22x128xf32, #tpu.memory_space<vmem>>, vector<1x1x16x128xf32>
    %319 = vector.shape_cast %318 : vector<1x1x16x128xf32> to vector<16x128xf32>
    %320 = vector.broadcast %12 : f32 to vector<16x128xf32>
    %321 = arith.mulf %320, %319 : vector<16x128xf32>
    %322 = arith.addf %302, %321 : vector<16x128xf32>
    %c0_229 = arith.constant 0 : index
    %c5_230 = arith.constant 5 : index
    %c0_231 = arith.constant 0 : index
    %c0_232 = arith.constant 0 : index
    %323 = vector.load %arg4[%c0_229, %c5_230, %c0_231, %c0_232] : memref<2x7x22x128xf32, #tpu.memory_space<vmem>>, vector<1x1x16x128xf32>
    %324 = vector.shape_cast %323 : vector<1x1x16x128xf32> to vector<16x128xf32>
    %325 = vector.broadcast %13 : f32 to vector<16x128xf32>
    %326 = arith.mulf %325, %324 : vector<16x128xf32>
    %327 = arith.addf %307, %326 : vector<16x128xf32>
    %c0_233 = arith.constant 0 : index
    %c6_234 = arith.constant 6 : index
    %c0_235 = arith.constant 0 : index
    %c0_236 = arith.constant 0 : index
    %328 = vector.load %arg4[%c0_233, %c6_234, %c0_235, %c0_236] : memref<2x7x22x128xf32, #tpu.memory_space<vmem>>, vector<1x1x16x128xf32>
    %329 = vector.shape_cast %328 : vector<1x1x16x128xf32> to vector<16x128xf32>
    %330 = vector.broadcast %14 : f32 to vector<16x128xf32>
    %331 = arith.mulf %330, %329 : vector<16x128xf32>
    %332 = arith.addf %312, %331 : vector<16x128xf32>
    %c0_237 = arith.constant 0 : index
    %c0_238 = arith.constant 0 : index
    %c1_239 = arith.constant 1 : index
    %c0_240 = arith.constant 0 : index
    %333 = vector.load %arg4[%c0_237, %c0_238, %c1_239, %c0_240] : memref<2x7x22x128xf32, #tpu.memory_space<vmem>>, vector<1x1x16x128xf32>
    %334 = vector.shape_cast %333 : vector<1x1x16x128xf32> to vector<16x128xf32>
    %335 = vector.broadcast %15 : f32 to vector<16x128xf32>
    %336 = arith.mulf %335, %334 : vector<16x128xf32>
    %337 = arith.addf %317, %336 : vector<16x128xf32>
    %c0_241 = arith.constant 0 : index
    %c1_242 = arith.constant 1 : index
    %c1_243 = arith.constant 1 : index
    %c0_244 = arith.constant 0 : index
    %338 = vector.load %arg4[%c0_241, %c1_242, %c1_243, %c0_244] : memref<2x7x22x128xf32, #tpu.memory_space<vmem>>, vector<1x1x16x128xf32>
    %339 = vector.shape_cast %338 : vector<1x1x16x128xf32> to vector<16x128xf32>
    %340 = vector.broadcast %16 : f32 to vector<16x128xf32>
    %341 = arith.mulf %340, %339 : vector<16x128xf32>
    %342 = arith.addf %322, %341 : vector<16x128xf32>
    %c0_245 = arith.constant 0 : index
    %c2_246 = arith.constant 2 : index
    %c1_247 = arith.constant 1 : index
    %c0_248 = arith.constant 0 : index
    %343 = vector.load %arg4[%c0_245, %c2_246, %c1_247, %c0_248] : memref<2x7x22x128xf32, #tpu.memory_space<vmem>>, vector<1x1x16x128xf32>
    %344 = vector.shape_cast %343 : vector<1x1x16x128xf32> to vector<16x128xf32>
    %345 = vector.broadcast %17 : f32 to vector<16x128xf32>
    %346 = arith.mulf %345, %344 : vector<16x128xf32>
    %347 = arith.addf %327, %346 : vector<16x128xf32>
    %c0_249 = arith.constant 0 : index
    %c3_250 = arith.constant 3 : index
    %c1_251 = arith.constant 1 : index
    %c0_252 = arith.constant 0 : index
    %348 = vector.load %arg4[%c0_249, %c3_250, %c1_251, %c0_252] : memref<2x7x22x128xf32, #tpu.memory_space<vmem>>, vector<1x1x16x128xf32>
    %349 = vector.shape_cast %348 : vector<1x1x16x128xf32> to vector<16x128xf32>
    %350 = vector.broadcast %18 : f32 to vector<16x128xf32>
    %351 = arith.mulf %350, %349 : vector<16x128xf32>
    %352 = arith.addf %332, %351 : vector<16x128xf32>
    %c0_253 = arith.constant 0 : index
    %c4_254 = arith.constant 4 : index
    %c1_255 = arith.constant 1 : index
    %c0_256 = arith.constant 0 : index
    %353 = vector.load %arg4[%c0_253, %c4_254, %c1_255, %c0_256] : memref<2x7x22x128xf32, #tpu.memory_space<vmem>>, vector<1x1x16x128xf32>
    %354 = vector.shape_cast %353 : vector<1x1x16x128xf32> to vector<16x128xf32>
    %355 = vector.broadcast %19 : f32 to vector<16x128xf32>
    %356 = arith.mulf %355, %354 : vector<16x128xf32>
    %357 = arith.addf %337, %356 : vector<16x128xf32>
    %c0_257 = arith.constant 0 : index
    %c5_258 = arith.constant 5 : index
    %c1_259 = arith.constant 1 : index
    %c0_260 = arith.constant 0 : index
    %358 = vector.load %arg4[%c0_257, %c5_258, %c1_259, %c0_260] : memref<2x7x22x128xf32, #tpu.memory_space<vmem>>, vector<1x1x16x128xf32>
    %359 = vector.shape_cast %358 : vector<1x1x16x128xf32> to vector<16x128xf32>
    %360 = vector.broadcast %20 : f32 to vector<16x128xf32>
    %361 = arith.mulf %360, %359 : vector<16x128xf32>
    %362 = arith.addf %342, %361 : vector<16x128xf32>
    %c0_261 = arith.constant 0 : index
    %c6_262 = arith.constant 6 : index
    %c1_263 = arith.constant 1 : index
    %c0_264 = arith.constant 0 : index
    %363 = vector.load %arg4[%c0_261, %c6_262, %c1_263, %c0_264] : memref<2x7x22x128xf32, #tpu.memory_space<vmem>>, vector<1x1x16x128xf32>
    %364 = vector.shape_cast %363 : vector<1x1x16x128xf32> to vector<16x128xf32>
    %365 = vector.broadcast %21 : f32 to vector<16x128xf32>
    %366 = arith.mulf %365, %364 : vector<16x128xf32>
    %367 = arith.addf %347, %366 : vector<16x128xf32>
    %c0_265 = arith.constant 0 : index
    %c0_266 = arith.constant 0 : index
    %c2_267 = arith.constant 2 : index
    %c0_268 = arith.constant 0 : index
    %368 = vector.load %arg4[%c0_265, %c0_266, %c2_267, %c0_268] : memref<2x7x22x128xf32, #tpu.memory_space<vmem>>, vector<1x1x16x128xf32>
    %369 = vector.shape_cast %368 : vector<1x1x16x128xf32> to vector<16x128xf32>
    %370 = vector.broadcast %22 : f32 to vector<16x128xf32>
    %371 = arith.mulf %370, %369 : vector<16x128xf32>
    %372 = arith.addf %352, %371 : vector<16x128xf32>
    %c0_269 = arith.constant 0 : index
    %c1_270 = arith.constant 1 : index
    %c2_271 = arith.constant 2 : index
    %c0_272 = arith.constant 0 : index
    %373 = vector.load %arg4[%c0_269, %c1_270, %c2_271, %c0_272] : memref<2x7x22x128xf32, #tpu.memory_space<vmem>>, vector<1x1x16x128xf32>
    %374 = vector.shape_cast %373 : vector<1x1x16x128xf32> to vector<16x128xf32>
    %375 = vector.broadcast %23 : f32 to vector<16x128xf32>
    %376 = arith.mulf %375, %374 : vector<16x128xf32>
    %377 = arith.addf %357, %376 : vector<16x128xf32>
    %c0_273 = arith.constant 0 : index
    %c2_274 = arith.constant 2 : index
    %c2_275 = arith.constant 2 : index
    %c0_276 = arith.constant 0 : index
    %378 = vector.load %arg4[%c0_273, %c2_274, %c2_275, %c0_276] : memref<2x7x22x128xf32, #tpu.memory_space<vmem>>, vector<1x1x16x128xf32>
    %379 = vector.shape_cast %378 : vector<1x1x16x128xf32> to vector<16x128xf32>
    %380 = vector.broadcast %24 : f32 to vector<16x128xf32>
    %381 = arith.mulf %380, %379 : vector<16x128xf32>
    %382 = arith.addf %362, %381 : vector<16x128xf32>
    %c0_277 = arith.constant 0 : index
    %c3_278 = arith.constant 3 : index
    %c2_279 = arith.constant 2 : index
    %c0_280 = arith.constant 0 : index
    %383 = vector.load %arg4[%c0_277, %c3_278, %c2_279, %c0_280] : memref<2x7x22x128xf32, #tpu.memory_space<vmem>>, vector<1x1x16x128xf32>
    %384 = vector.shape_cast %383 : vector<1x1x16x128xf32> to vector<16x128xf32>
    %385 = vector.broadcast %25 : f32 to vector<16x128xf32>
    %386 = arith.mulf %385, %384 : vector<16x128xf32>
    %387 = arith.addf %367, %386 : vector<16x128xf32>
    %c0_281 = arith.constant 0 : index
    %c4_282 = arith.constant 4 : index
    %c2_283 = arith.constant 2 : index
    %c0_284 = arith.constant 0 : index
    %388 = vector.load %arg4[%c0_281, %c4_282, %c2_283, %c0_284] : memref<2x7x22x128xf32, #tpu.memory_space<vmem>>, vector<1x1x16x128xf32>
    %389 = vector.shape_cast %388 : vector<1x1x16x128xf32> to vector<16x128xf32>
    %390 = vector.broadcast %26 : f32 to vector<16x128xf32>
    %391 = arith.mulf %390, %389 : vector<16x128xf32>
    %392 = arith.addf %372, %391 : vector<16x128xf32>
    %c0_285 = arith.constant 0 : index
    %c5_286 = arith.constant 5 : index
    %c2_287 = arith.constant 2 : index
    %c0_288 = arith.constant 0 : index
    %393 = vector.load %arg4[%c0_285, %c5_286, %c2_287, %c0_288] : memref<2x7x22x128xf32, #tpu.memory_space<vmem>>, vector<1x1x16x128xf32>
    %394 = vector.shape_cast %393 : vector<1x1x16x128xf32> to vector<16x128xf32>
    %395 = vector.broadcast %27 : f32 to vector<16x128xf32>
    %396 = arith.mulf %395, %394 : vector<16x128xf32>
    %397 = arith.addf %377, %396 : vector<16x128xf32>
    %c0_289 = arith.constant 0 : index
    %c6_290 = arith.constant 6 : index
    %c2_291 = arith.constant 2 : index
    %c0_292 = arith.constant 0 : index
    %398 = vector.load %arg4[%c0_289, %c6_290, %c2_291, %c0_292] : memref<2x7x22x128xf32, #tpu.memory_space<vmem>>, vector<1x1x16x128xf32>
    %399 = vector.shape_cast %398 : vector<1x1x16x128xf32> to vector<16x128xf32>
    %400 = vector.broadcast %28 : f32 to vector<16x128xf32>
    %401 = arith.mulf %400, %399 : vector<16x128xf32>
    %402 = arith.addf %382, %401 : vector<16x128xf32>
    %c0_293 = arith.constant 0 : index
    %c0_294 = arith.constant 0 : index
    %c3_295 = arith.constant 3 : index
    %c0_296 = arith.constant 0 : index
    %403 = vector.load %arg4[%c0_293, %c0_294, %c3_295, %c0_296] : memref<2x7x22x128xf32, #tpu.memory_space<vmem>>, vector<1x1x16x128xf32>
    %404 = vector.shape_cast %403 : vector<1x1x16x128xf32> to vector<16x128xf32>
    %405 = vector.broadcast %29 : f32 to vector<16x128xf32>
    %406 = arith.mulf %405, %404 : vector<16x128xf32>
    %407 = arith.addf %387, %406 : vector<16x128xf32>
    %c0_297 = arith.constant 0 : index
    %c1_298 = arith.constant 1 : index
    %c3_299 = arith.constant 3 : index
    %c0_300 = arith.constant 0 : index
    %408 = vector.load %arg4[%c0_297, %c1_298, %c3_299, %c0_300] : memref<2x7x22x128xf32, #tpu.memory_space<vmem>>, vector<1x1x16x128xf32>
    %409 = vector.shape_cast %408 : vector<1x1x16x128xf32> to vector<16x128xf32>
    %410 = vector.broadcast %30 : f32 to vector<16x128xf32>
    %411 = arith.mulf %410, %409 : vector<16x128xf32>
    %412 = arith.addf %392, %411 : vector<16x128xf32>
    %c0_301 = arith.constant 0 : index
    %c2_302 = arith.constant 2 : index
    %c3_303 = arith.constant 3 : index
    %c0_304 = arith.constant 0 : index
    %413 = vector.load %arg4[%c0_301, %c2_302, %c3_303, %c0_304] : memref<2x7x22x128xf32, #tpu.memory_space<vmem>>, vector<1x1x16x128xf32>
    %414 = vector.shape_cast %413 : vector<1x1x16x128xf32> to vector<16x128xf32>
    %415 = vector.broadcast %31 : f32 to vector<16x128xf32>
    %416 = arith.mulf %415, %414 : vector<16x128xf32>
    %417 = arith.addf %397, %416 : vector<16x128xf32>
    %c0_305 = arith.constant 0 : index
    %c3_306 = arith.constant 3 : index
    %c3_307 = arith.constant 3 : index
    %c0_308 = arith.constant 0 : index
    %418 = vector.load %arg4[%c0_305, %c3_306, %c3_307, %c0_308] : memref<2x7x22x128xf32, #tpu.memory_space<vmem>>, vector<1x1x16x128xf32>
    %419 = vector.shape_cast %418 : vector<1x1x16x128xf32> to vector<16x128xf32>
    %420 = vector.broadcast %32 : f32 to vector<16x128xf32>
    %421 = arith.mulf %420, %419 : vector<16x128xf32>
    %422 = arith.addf %402, %421 : vector<16x128xf32>
    %c0_309 = arith.constant 0 : index
    %c4_310 = arith.constant 4 : index
    %c3_311 = arith.constant 3 : index
    %c0_312 = arith.constant 0 : index
    %423 = vector.load %arg4[%c0_309, %c4_310, %c3_311, %c0_312] : memref<2x7x22x128xf32, #tpu.memory_space<vmem>>, vector<1x1x16x128xf32>
    %424 = vector.shape_cast %423 : vector<1x1x16x128xf32> to vector<16x128xf32>
    %425 = vector.broadcast %33 : f32 to vector<16x128xf32>
    %426 = arith.mulf %425, %424 : vector<16x128xf32>
    %427 = arith.addf %407, %426 : vector<16x128xf32>
    %c0_313 = arith.constant 0 : index
    %c5_314 = arith.constant 5 : index
    %c3_315 = arith.constant 3 : index
    %c0_316 = arith.constant 0 : index
    %428 = vector.load %arg4[%c0_313, %c5_314, %c3_315, %c0_316] : memref<2x7x22x128xf32, #tpu.memory_space<vmem>>, vector<1x1x16x128xf32>
    %429 = vector.shape_cast %428 : vector<1x1x16x128xf32> to vector<16x128xf32>
    %430 = vector.broadcast %34 : f32 to vector<16x128xf32>
    %431 = arith.mulf %430, %429 : vector<16x128xf32>
    %432 = arith.addf %412, %431 : vector<16x128xf32>
    %c0_317 = arith.constant 0 : index
    %c6_318 = arith.constant 6 : index
    %c3_319 = arith.constant 3 : index
    %c0_320 = arith.constant 0 : index
    %433 = vector.load %arg4[%c0_317, %c6_318, %c3_319, %c0_320] : memref<2x7x22x128xf32, #tpu.memory_space<vmem>>, vector<1x1x16x128xf32>
    %434 = vector.shape_cast %433 : vector<1x1x16x128xf32> to vector<16x128xf32>
    %435 = vector.broadcast %35 : f32 to vector<16x128xf32>
    %436 = arith.mulf %435, %434 : vector<16x128xf32>
    %437 = arith.addf %417, %436 : vector<16x128xf32>
    %c0_321 = arith.constant 0 : index
    %c0_322 = arith.constant 0 : index
    %c4_323 = arith.constant 4 : index
    %c0_324 = arith.constant 0 : index
    %438 = vector.load %arg4[%c0_321, %c0_322, %c4_323, %c0_324] : memref<2x7x22x128xf32, #tpu.memory_space<vmem>>, vector<1x1x16x128xf32>
    %439 = vector.shape_cast %438 : vector<1x1x16x128xf32> to vector<16x128xf32>
    %440 = vector.broadcast %36 : f32 to vector<16x128xf32>
    %441 = arith.mulf %440, %439 : vector<16x128xf32>
    %442 = arith.addf %422, %441 : vector<16x128xf32>
    %c0_325 = arith.constant 0 : index
    %c1_326 = arith.constant 1 : index
    %c4_327 = arith.constant 4 : index
    %c0_328 = arith.constant 0 : index
    %443 = vector.load %arg4[%c0_325, %c1_326, %c4_327, %c0_328] : memref<2x7x22x128xf32, #tpu.memory_space<vmem>>, vector<1x1x16x128xf32>
    %444 = vector.shape_cast %443 : vector<1x1x16x128xf32> to vector<16x128xf32>
    %445 = vector.broadcast %37 : f32 to vector<16x128xf32>
    %446 = arith.mulf %445, %444 : vector<16x128xf32>
    %447 = arith.addf %427, %446 : vector<16x128xf32>
    %c0_329 = arith.constant 0 : index
    %c2_330 = arith.constant 2 : index
    %c4_331 = arith.constant 4 : index
    %c0_332 = arith.constant 0 : index
    %448 = vector.load %arg4[%c0_329, %c2_330, %c4_331, %c0_332] : memref<2x7x22x128xf32, #tpu.memory_space<vmem>>, vector<1x1x16x128xf32>
    %449 = vector.shape_cast %448 : vector<1x1x16x128xf32> to vector<16x128xf32>
    %450 = vector.broadcast %38 : f32 to vector<16x128xf32>
    %451 = arith.mulf %450, %449 : vector<16x128xf32>
    %452 = arith.addf %432, %451 : vector<16x128xf32>
    %c0_333 = arith.constant 0 : index
    %c3_334 = arith.constant 3 : index
    %c4_335 = arith.constant 4 : index
    %c0_336 = arith.constant 0 : index
    %453 = vector.load %arg4[%c0_333, %c3_334, %c4_335, %c0_336] : memref<2x7x22x128xf32, #tpu.memory_space<vmem>>, vector<1x1x16x128xf32>
    %454 = vector.shape_cast %453 : vector<1x1x16x128xf32> to vector<16x128xf32>
    %455 = vector.broadcast %39 : f32 to vector<16x128xf32>
    %456 = arith.mulf %455, %454 : vector<16x128xf32>
    %457 = arith.addf %437, %456 : vector<16x128xf32>
    %c0_337 = arith.constant 0 : index
    %c4_338 = arith.constant 4 : index
    %c4_339 = arith.constant 4 : index
    %c0_340 = arith.constant 0 : index
    %458 = vector.load %arg4[%c0_337, %c4_338, %c4_339, %c0_340] : memref<2x7x22x128xf32, #tpu.memory_space<vmem>>, vector<1x1x16x128xf32>
    %459 = vector.shape_cast %458 : vector<1x1x16x128xf32> to vector<16x128xf32>
    %460 = vector.broadcast %40 : f32 to vector<16x128xf32>
    %461 = arith.mulf %460, %459 : vector<16x128xf32>
    %462 = arith.addf %442, %461 : vector<16x128xf32>
    %c0_341 = arith.constant 0 : index
    %c5_342 = arith.constant 5 : index
    %c4_343 = arith.constant 4 : index
    %c0_344 = arith.constant 0 : index
    %463 = vector.load %arg4[%c0_341, %c5_342, %c4_343, %c0_344] : memref<2x7x22x128xf32, #tpu.memory_space<vmem>>, vector<1x1x16x128xf32>
    %464 = vector.shape_cast %463 : vector<1x1x16x128xf32> to vector<16x128xf32>
    %465 = vector.broadcast %41 : f32 to vector<16x128xf32>
    %466 = arith.mulf %465, %464 : vector<16x128xf32>
    %467 = arith.addf %447, %466 : vector<16x128xf32>
    %c0_345 = arith.constant 0 : index
    %c6_346 = arith.constant 6 : index
    %c4_347 = arith.constant 4 : index
    %c0_348 = arith.constant 0 : index
    %468 = vector.load %arg4[%c0_345, %c6_346, %c4_347, %c0_348] : memref<2x7x22x128xf32, #tpu.memory_space<vmem>>, vector<1x1x16x128xf32>
    %469 = vector.shape_cast %468 : vector<1x1x16x128xf32> to vector<16x128xf32>
    %470 = vector.broadcast %42 : f32 to vector<16x128xf32>
    %471 = arith.mulf %470, %469 : vector<16x128xf32>
    %472 = arith.addf %452, %471 : vector<16x128xf32>
    %c0_349 = arith.constant 0 : index
    %c0_350 = arith.constant 0 : index
    %c5_351 = arith.constant 5 : index
    %c0_352 = arith.constant 0 : index
    %473 = vector.load %arg4[%c0_349, %c0_350, %c5_351, %c0_352] : memref<2x7x22x128xf32, #tpu.memory_space<vmem>>, vector<1x1x16x128xf32>
    %474 = vector.shape_cast %473 : vector<1x1x16x128xf32> to vector<16x128xf32>
    %475 = vector.broadcast %43 : f32 to vector<16x128xf32>
    %476 = arith.mulf %475, %474 : vector<16x128xf32>
    %477 = arith.addf %457, %476 : vector<16x128xf32>
    %c0_353 = arith.constant 0 : index
    %c1_354 = arith.constant 1 : index
    %c5_355 = arith.constant 5 : index
    %c0_356 = arith.constant 0 : index
    %478 = vector.load %arg4[%c0_353, %c1_354, %c5_355, %c0_356] : memref<2x7x22x128xf32, #tpu.memory_space<vmem>>, vector<1x1x16x128xf32>
    %479 = vector.shape_cast %478 : vector<1x1x16x128xf32> to vector<16x128xf32>
    %480 = vector.broadcast %44 : f32 to vector<16x128xf32>
    %481 = arith.mulf %480, %479 : vector<16x128xf32>
    %482 = arith.addf %462, %481 : vector<16x128xf32>
    %c0_357 = arith.constant 0 : index
    %c2_358 = arith.constant 2 : index
    %c5_359 = arith.constant 5 : index
    %c0_360 = arith.constant 0 : index
    %483 = vector.load %arg4[%c0_357, %c2_358, %c5_359, %c0_360] : memref<2x7x22x128xf32, #tpu.memory_space<vmem>>, vector<1x1x16x128xf32>
    %484 = vector.shape_cast %483 : vector<1x1x16x128xf32> to vector<16x128xf32>
    %485 = vector.broadcast %45 : f32 to vector<16x128xf32>
    %486 = arith.mulf %485, %484 : vector<16x128xf32>
    %487 = arith.addf %467, %486 : vector<16x128xf32>
    %c0_361 = arith.constant 0 : index
    %c3_362 = arith.constant 3 : index
    %c5_363 = arith.constant 5 : index
    %c0_364 = arith.constant 0 : index
    %488 = vector.load %arg4[%c0_361, %c3_362, %c5_363, %c0_364] : memref<2x7x22x128xf32, #tpu.memory_space<vmem>>, vector<1x1x16x128xf32>
    %489 = vector.shape_cast %488 : vector<1x1x16x128xf32> to vector<16x128xf32>
    %490 = vector.broadcast %46 : f32 to vector<16x128xf32>
    %491 = arith.mulf %490, %489 : vector<16x128xf32>
    %492 = arith.addf %472, %491 : vector<16x128xf32>
    %c0_365 = arith.constant 0 : index
    %c4_366 = arith.constant 4 : index
    %c5_367 = arith.constant 5 : index
    %c0_368 = arith.constant 0 : index
    %493 = vector.load %arg4[%c0_365, %c4_366, %c5_367, %c0_368] : memref<2x7x22x128xf32, #tpu.memory_space<vmem>>, vector<1x1x16x128xf32>
    %494 = vector.shape_cast %493 : vector<1x1x16x128xf32> to vector<16x128xf32>
    %495 = vector.broadcast %47 : f32 to vector<16x128xf32>
    %496 = arith.mulf %495, %494 : vector<16x128xf32>
    %497 = arith.addf %477, %496 : vector<16x128xf32>
    %c0_369 = arith.constant 0 : index
    %c5_370 = arith.constant 5 : index
    %c5_371 = arith.constant 5 : index
    %c0_372 = arith.constant 0 : index
    %498 = vector.load %arg4[%c0_369, %c5_370, %c5_371, %c0_372] : memref<2x7x22x128xf32, #tpu.memory_space<vmem>>, vector<1x1x16x128xf32>
    %499 = vector.shape_cast %498 : vector<1x1x16x128xf32> to vector<16x128xf32>
    %500 = vector.broadcast %48 : f32 to vector<16x128xf32>
    %501 = arith.mulf %500, %499 : vector<16x128xf32>
    %502 = arith.addf %482, %501 : vector<16x128xf32>
    %c0_373 = arith.constant 0 : index
    %c6_374 = arith.constant 6 : index
    %c5_375 = arith.constant 5 : index
    %c0_376 = arith.constant 0 : index
    %503 = vector.load %arg4[%c0_373, %c6_374, %c5_375, %c0_376] : memref<2x7x22x128xf32, #tpu.memory_space<vmem>>, vector<1x1x16x128xf32>
    %504 = vector.shape_cast %503 : vector<1x1x16x128xf32> to vector<16x128xf32>
    %505 = vector.broadcast %49 : f32 to vector<16x128xf32>
    %506 = arith.mulf %505, %504 : vector<16x128xf32>
    %507 = arith.addf %487, %506 : vector<16x128xf32>
    %c0_377 = arith.constant 0 : index
    %c0_378 = arith.constant 0 : index
    %c6_379 = arith.constant 6 : index
    %c0_380 = arith.constant 0 : index
    %508 = vector.load %arg4[%c0_377, %c0_378, %c6_379, %c0_380] : memref<2x7x22x128xf32, #tpu.memory_space<vmem>>, vector<1x1x16x128xf32>
    %509 = vector.shape_cast %508 : vector<1x1x16x128xf32> to vector<16x128xf32>
    %510 = vector.broadcast %50 : f32 to vector<16x128xf32>
    %511 = arith.mulf %510, %509 : vector<16x128xf32>
    %512 = arith.addf %492, %511 : vector<16x128xf32>
    %c0_381 = arith.constant 0 : index
    %c1_382 = arith.constant 1 : index
    %c6_383 = arith.constant 6 : index
    %c0_384 = arith.constant 0 : index
    %513 = vector.load %arg4[%c0_381, %c1_382, %c6_383, %c0_384] : memref<2x7x22x128xf32, #tpu.memory_space<vmem>>, vector<1x1x16x128xf32>
    %514 = vector.shape_cast %513 : vector<1x1x16x128xf32> to vector<16x128xf32>
    %515 = vector.broadcast %51 : f32 to vector<16x128xf32>
    %516 = arith.mulf %515, %514 : vector<16x128xf32>
    %517 = arith.addf %497, %516 : vector<16x128xf32>
    %c0_385 = arith.constant 0 : index
    %c2_386 = arith.constant 2 : index
    %c6_387 = arith.constant 6 : index
    %c0_388 = arith.constant 0 : index
    %518 = vector.load %arg4[%c0_385, %c2_386, %c6_387, %c0_388] : memref<2x7x22x128xf32, #tpu.memory_space<vmem>>, vector<1x1x16x128xf32>
    %519 = vector.shape_cast %518 : vector<1x1x16x128xf32> to vector<16x128xf32>
    %520 = vector.broadcast %52 : f32 to vector<16x128xf32>
    %521 = arith.mulf %520, %519 : vector<16x128xf32>
    %522 = arith.addf %502, %521 : vector<16x128xf32>
    %c0_389 = arith.constant 0 : index
    %c3_390 = arith.constant 3 : index
    %c6_391 = arith.constant 6 : index
    %c0_392 = arith.constant 0 : index
    %523 = vector.load %arg4[%c0_389, %c3_390, %c6_391, %c0_392] : memref<2x7x22x128xf32, #tpu.memory_space<vmem>>, vector<1x1x16x128xf32>
    %524 = vector.shape_cast %523 : vector<1x1x16x128xf32> to vector<16x128xf32>
    %525 = vector.broadcast %53 : f32 to vector<16x128xf32>
    %526 = arith.mulf %525, %524 : vector<16x128xf32>
    %527 = arith.addf %507, %526 : vector<16x128xf32>
    %c0_393 = arith.constant 0 : index
    %c4_394 = arith.constant 4 : index
    %c6_395 = arith.constant 6 : index
    %c0_396 = arith.constant 0 : index
    %528 = vector.load %arg4[%c0_393, %c4_394, %c6_395, %c0_396] : memref<2x7x22x128xf32, #tpu.memory_space<vmem>>, vector<1x1x16x128xf32>
    %529 = vector.shape_cast %528 : vector<1x1x16x128xf32> to vector<16x128xf32>
    %530 = vector.broadcast %54 : f32 to vector<16x128xf32>
    %531 = arith.mulf %530, %529 : vector<16x128xf32>
    %532 = arith.addf %512, %531 : vector<16x128xf32>
    %c0_397 = arith.constant 0 : index
    %c5_398 = arith.constant 5 : index
    %c6_399 = arith.constant 6 : index
    %c0_400 = arith.constant 0 : index
    %533 = vector.load %arg4[%c0_397, %c5_398, %c6_399, %c0_400] : memref<2x7x22x128xf32, #tpu.memory_space<vmem>>, vector<1x1x16x128xf32>
    %534 = vector.shape_cast %533 : vector<1x1x16x128xf32> to vector<16x128xf32>
    %535 = vector.broadcast %55 : f32 to vector<16x128xf32>
    %536 = arith.mulf %535, %534 : vector<16x128xf32>
    %537 = arith.addf %517, %536 : vector<16x128xf32>
    %c0_401 = arith.constant 0 : index
    %c6_402 = arith.constant 6 : index
    %c6_403 = arith.constant 6 : index
    %c0_404 = arith.constant 0 : index
    %538 = vector.load %arg4[%c0_401, %c6_402, %c6_403, %c0_404] : memref<2x7x22x128xf32, #tpu.memory_space<vmem>>, vector<1x1x16x128xf32>
    %539 = vector.shape_cast %538 : vector<1x1x16x128xf32> to vector<16x128xf32>
    %540 = vector.broadcast %56 : f32 to vector<16x128xf32>
    %541 = arith.mulf %540, %539 : vector<16x128xf32>
    %542 = arith.addf %522, %541 : vector<16x128xf32>
    %c1_405 = arith.constant 1 : index
    %c0_406 = arith.constant 0 : index
    %c0_407 = arith.constant 0 : index
    %c0_408 = arith.constant 0 : index
    %543 = vector.load %arg4[%c1_405, %c0_406, %c0_407, %c0_408] : memref<2x7x22x128xf32, #tpu.memory_space<vmem>>, vector<1x1x16x128xf32>
    %544 = vector.shape_cast %543 : vector<1x1x16x128xf32> to vector<16x128xf32>
    %545 = vector.broadcast %57 : f32 to vector<16x128xf32>
    %546 = arith.mulf %545, %544 : vector<16x128xf32>
    %547 = arith.addf %527, %546 : vector<16x128xf32>
    %c1_409 = arith.constant 1 : index
    %c1_410 = arith.constant 1 : index
    %c0_411 = arith.constant 0 : index
    %c0_412 = arith.constant 0 : index
    %548 = vector.load %arg4[%c1_409, %c1_410, %c0_411, %c0_412] : memref<2x7x22x128xf32, #tpu.memory_space<vmem>>, vector<1x1x16x128xf32>
    %549 = vector.shape_cast %548 : vector<1x1x16x128xf32> to vector<16x128xf32>
    %550 = vector.broadcast %58 : f32 to vector<16x128xf32>
    %551 = arith.mulf %550, %549 : vector<16x128xf32>
    %552 = arith.addf %532, %551 : vector<16x128xf32>
    %c1_413 = arith.constant 1 : index
    %c2_414 = arith.constant 2 : index
    %c0_415 = arith.constant 0 : index
    %c0_416 = arith.constant 0 : index
    %553 = vector.load %arg4[%c1_413, %c2_414, %c0_415, %c0_416] : memref<2x7x22x128xf32, #tpu.memory_space<vmem>>, vector<1x1x16x128xf32>
    %554 = vector.shape_cast %553 : vector<1x1x16x128xf32> to vector<16x128xf32>
    %555 = vector.broadcast %59 : f32 to vector<16x128xf32>
    %556 = arith.mulf %555, %554 : vector<16x128xf32>
    %557 = arith.addf %537, %556 : vector<16x128xf32>
    %c1_417 = arith.constant 1 : index
    %c3_418 = arith.constant 3 : index
    %c0_419 = arith.constant 0 : index
    %c0_420 = arith.constant 0 : index
    %558 = vector.load %arg4[%c1_417, %c3_418, %c0_419, %c0_420] : memref<2x7x22x128xf32, #tpu.memory_space<vmem>>, vector<1x1x16x128xf32>
    %559 = vector.shape_cast %558 : vector<1x1x16x128xf32> to vector<16x128xf32>
    %560 = vector.broadcast %60 : f32 to vector<16x128xf32>
    %561 = arith.mulf %560, %559 : vector<16x128xf32>
    %562 = arith.addf %542, %561 : vector<16x128xf32>
    %c1_421 = arith.constant 1 : index
    %c4_422 = arith.constant 4 : index
    %c0_423 = arith.constant 0 : index
    %c0_424 = arith.constant 0 : index
    %563 = vector.load %arg4[%c1_421, %c4_422, %c0_423, %c0_424] : memref<2x7x22x128xf32, #tpu.memory_space<vmem>>, vector<1x1x16x128xf32>
    %564 = vector.shape_cast %563 : vector<1x1x16x128xf32> to vector<16x128xf32>
    %565 = vector.broadcast %61 : f32 to vector<16x128xf32>
    %566 = arith.mulf %565, %564 : vector<16x128xf32>
    %567 = arith.addf %547, %566 : vector<16x128xf32>
    %c1_425 = arith.constant 1 : index
    %c5_426 = arith.constant 5 : index
    %c0_427 = arith.constant 0 : index
    %c0_428 = arith.constant 0 : index
    %568 = vector.load %arg4[%c1_425, %c5_426, %c0_427, %c0_428] : memref<2x7x22x128xf32, #tpu.memory_space<vmem>>, vector<1x1x16x128xf32>
    %569 = vector.shape_cast %568 : vector<1x1x16x128xf32> to vector<16x128xf32>
    %570 = vector.broadcast %62 : f32 to vector<16x128xf32>
    %571 = arith.mulf %570, %569 : vector<16x128xf32>
    %572 = arith.addf %552, %571 : vector<16x128xf32>
    %c1_429 = arith.constant 1 : index
    %c6_430 = arith.constant 6 : index
    %c0_431 = arith.constant 0 : index
    %c0_432 = arith.constant 0 : index
    %573 = vector.load %arg4[%c1_429, %c6_430, %c0_431, %c0_432] : memref<2x7x22x128xf32, #tpu.memory_space<vmem>>, vector<1x1x16x128xf32>
    %574 = vector.shape_cast %573 : vector<1x1x16x128xf32> to vector<16x128xf32>
    %575 = vector.broadcast %63 : f32 to vector<16x128xf32>
    %576 = arith.mulf %575, %574 : vector<16x128xf32>
    %577 = arith.addf %557, %576 : vector<16x128xf32>
    %c1_433 = arith.constant 1 : index
    %c0_434 = arith.constant 0 : index
    %c1_435 = arith.constant 1 : index
    %c0_436 = arith.constant 0 : index
    %578 = vector.load %arg4[%c1_433, %c0_434, %c1_435, %c0_436] : memref<2x7x22x128xf32, #tpu.memory_space<vmem>>, vector<1x1x16x128xf32>
    %579 = vector.shape_cast %578 : vector<1x1x16x128xf32> to vector<16x128xf32>
    %580 = vector.broadcast %64 : f32 to vector<16x128xf32>
    %581 = arith.mulf %580, %579 : vector<16x128xf32>
    %582 = arith.addf %562, %581 : vector<16x128xf32>
    %c1_437 = arith.constant 1 : index
    %c1_438 = arith.constant 1 : index
    %c1_439 = arith.constant 1 : index
    %c0_440 = arith.constant 0 : index
    %583 = vector.load %arg4[%c1_437, %c1_438, %c1_439, %c0_440] : memref<2x7x22x128xf32, #tpu.memory_space<vmem>>, vector<1x1x16x128xf32>
    %584 = vector.shape_cast %583 : vector<1x1x16x128xf32> to vector<16x128xf32>
    %585 = vector.broadcast %65 : f32 to vector<16x128xf32>
    %586 = arith.mulf %585, %584 : vector<16x128xf32>
    %587 = arith.addf %567, %586 : vector<16x128xf32>
    %c1_441 = arith.constant 1 : index
    %c2_442 = arith.constant 2 : index
    %c1_443 = arith.constant 1 : index
    %c0_444 = arith.constant 0 : index
    %588 = vector.load %arg4[%c1_441, %c2_442, %c1_443, %c0_444] : memref<2x7x22x128xf32, #tpu.memory_space<vmem>>, vector<1x1x16x128xf32>
    %589 = vector.shape_cast %588 : vector<1x1x16x128xf32> to vector<16x128xf32>
    %590 = vector.broadcast %66 : f32 to vector<16x128xf32>
    %591 = arith.mulf %590, %589 : vector<16x128xf32>
    %592 = arith.addf %572, %591 : vector<16x128xf32>
    %c1_445 = arith.constant 1 : index
    %c3_446 = arith.constant 3 : index
    %c1_447 = arith.constant 1 : index
    %c0_448 = arith.constant 0 : index
    %593 = vector.load %arg4[%c1_445, %c3_446, %c1_447, %c0_448] : memref<2x7x22x128xf32, #tpu.memory_space<vmem>>, vector<1x1x16x128xf32>
    %594 = vector.shape_cast %593 : vector<1x1x16x128xf32> to vector<16x128xf32>
    %595 = vector.broadcast %67 : f32 to vector<16x128xf32>
    %596 = arith.mulf %595, %594 : vector<16x128xf32>
    %597 = arith.addf %577, %596 : vector<16x128xf32>
    %c1_449 = arith.constant 1 : index
    %c4_450 = arith.constant 4 : index
    %c1_451 = arith.constant 1 : index
    %c0_452 = arith.constant 0 : index
    %598 = vector.load %arg4[%c1_449, %c4_450, %c1_451, %c0_452] : memref<2x7x22x128xf32, #tpu.memory_space<vmem>>, vector<1x1x16x128xf32>
    %599 = vector.shape_cast %598 : vector<1x1x16x128xf32> to vector<16x128xf32>
    %600 = vector.broadcast %68 : f32 to vector<16x128xf32>
    %601 = arith.mulf %600, %599 : vector<16x128xf32>
    %602 = arith.addf %582, %601 : vector<16x128xf32>
    %c1_453 = arith.constant 1 : index
    %c5_454 = arith.constant 5 : index
    %c1_455 = arith.constant 1 : index
    %c0_456 = arith.constant 0 : index
    %603 = vector.load %arg4[%c1_453, %c5_454, %c1_455, %c0_456] : memref<2x7x22x128xf32, #tpu.memory_space<vmem>>, vector<1x1x16x128xf32>
    %604 = vector.shape_cast %603 : vector<1x1x16x128xf32> to vector<16x128xf32>
    %605 = vector.broadcast %69 : f32 to vector<16x128xf32>
    %606 = arith.mulf %605, %604 : vector<16x128xf32>
    %607 = arith.addf %587, %606 : vector<16x128xf32>
    %c1_457 = arith.constant 1 : index
    %c6_458 = arith.constant 6 : index
    %c1_459 = arith.constant 1 : index
    %c0_460 = arith.constant 0 : index
    %608 = vector.load %arg4[%c1_457, %c6_458, %c1_459, %c0_460] : memref<2x7x22x128xf32, #tpu.memory_space<vmem>>, vector<1x1x16x128xf32>
    %609 = vector.shape_cast %608 : vector<1x1x16x128xf32> to vector<16x128xf32>
    %610 = vector.broadcast %70 : f32 to vector<16x128xf32>
    %611 = arith.mulf %610, %609 : vector<16x128xf32>
    %612 = arith.addf %592, %611 : vector<16x128xf32>
    %c1_461 = arith.constant 1 : index
    %c0_462 = arith.constant 0 : index
    %c2_463 = arith.constant 2 : index
    %c0_464 = arith.constant 0 : index
    %613 = vector.load %arg4[%c1_461, %c0_462, %c2_463, %c0_464] : memref<2x7x22x128xf32, #tpu.memory_space<vmem>>, vector<1x1x16x128xf32>
    %614 = vector.shape_cast %613 : vector<1x1x16x128xf32> to vector<16x128xf32>
    %615 = vector.broadcast %71 : f32 to vector<16x128xf32>
    %616 = arith.mulf %615, %614 : vector<16x128xf32>
    %617 = arith.addf %597, %616 : vector<16x128xf32>
    %c1_465 = arith.constant 1 : index
    %c1_466 = arith.constant 1 : index
    %c2_467 = arith.constant 2 : index
    %c0_468 = arith.constant 0 : index
    %618 = vector.load %arg4[%c1_465, %c1_466, %c2_467, %c0_468] : memref<2x7x22x128xf32, #tpu.memory_space<vmem>>, vector<1x1x16x128xf32>
    %619 = vector.shape_cast %618 : vector<1x1x16x128xf32> to vector<16x128xf32>
    %620 = vector.broadcast %72 : f32 to vector<16x128xf32>
    %621 = arith.mulf %620, %619 : vector<16x128xf32>
    %622 = arith.addf %602, %621 : vector<16x128xf32>
    %c1_469 = arith.constant 1 : index
    %c2_470 = arith.constant 2 : index
    %c2_471 = arith.constant 2 : index
    %c0_472 = arith.constant 0 : index
    %623 = vector.load %arg4[%c1_469, %c2_470, %c2_471, %c0_472] : memref<2x7x22x128xf32, #tpu.memory_space<vmem>>, vector<1x1x16x128xf32>
    %624 = vector.shape_cast %623 : vector<1x1x16x128xf32> to vector<16x128xf32>
    %625 = vector.broadcast %73 : f32 to vector<16x128xf32>
    %626 = arith.mulf %625, %624 : vector<16x128xf32>
    %627 = arith.addf %607, %626 : vector<16x128xf32>
    %c1_473 = arith.constant 1 : index
    %c3_474 = arith.constant 3 : index
    %c2_475 = arith.constant 2 : index
    %c0_476 = arith.constant 0 : index
    %628 = vector.load %arg4[%c1_473, %c3_474, %c2_475, %c0_476] : memref<2x7x22x128xf32, #tpu.memory_space<vmem>>, vector<1x1x16x128xf32>
    %629 = vector.shape_cast %628 : vector<1x1x16x128xf32> to vector<16x128xf32>
    %630 = vector.broadcast %74 : f32 to vector<16x128xf32>
    %631 = arith.mulf %630, %629 : vector<16x128xf32>
    %632 = arith.addf %612, %631 : vector<16x128xf32>
    %c1_477 = arith.constant 1 : index
    %c4_478 = arith.constant 4 : index
    %c2_479 = arith.constant 2 : index
    %c0_480 = arith.constant 0 : index
    %633 = vector.load %arg4[%c1_477, %c4_478, %c2_479, %c0_480] : memref<2x7x22x128xf32, #tpu.memory_space<vmem>>, vector<1x1x16x128xf32>
    %634 = vector.shape_cast %633 : vector<1x1x16x128xf32> to vector<16x128xf32>
    %635 = vector.broadcast %75 : f32 to vector<16x128xf32>
    %636 = arith.mulf %635, %634 : vector<16x128xf32>
    %637 = arith.addf %617, %636 : vector<16x128xf32>
    %c1_481 = arith.constant 1 : index
    %c5_482 = arith.constant 5 : index
    %c2_483 = arith.constant 2 : index
    %c0_484 = arith.constant 0 : index
    %638 = vector.load %arg4[%c1_481, %c5_482, %c2_483, %c0_484] : memref<2x7x22x128xf32, #tpu.memory_space<vmem>>, vector<1x1x16x128xf32>
    %639 = vector.shape_cast %638 : vector<1x1x16x128xf32> to vector<16x128xf32>
    %640 = vector.broadcast %76 : f32 to vector<16x128xf32>
    %641 = arith.mulf %640, %639 : vector<16x128xf32>
    %642 = arith.addf %622, %641 : vector<16x128xf32>
    %c1_485 = arith.constant 1 : index
    %c6_486 = arith.constant 6 : index
    %c2_487 = arith.constant 2 : index
    %c0_488 = arith.constant 0 : index
    %643 = vector.load %arg4[%c1_485, %c6_486, %c2_487, %c0_488] : memref<2x7x22x128xf32, #tpu.memory_space<vmem>>, vector<1x1x16x128xf32>
    %644 = vector.shape_cast %643 : vector<1x1x16x128xf32> to vector<16x128xf32>
    %645 = vector.broadcast %77 : f32 to vector<16x128xf32>
    %646 = arith.mulf %645, %644 : vector<16x128xf32>
    %647 = arith.addf %627, %646 : vector<16x128xf32>
    %c1_489 = arith.constant 1 : index
    %c0_490 = arith.constant 0 : index
    %c3_491 = arith.constant 3 : index
    %c0_492 = arith.constant 0 : index
    %648 = vector.load %arg4[%c1_489, %c0_490, %c3_491, %c0_492] : memref<2x7x22x128xf32, #tpu.memory_space<vmem>>, vector<1x1x16x128xf32>
    %649 = vector.shape_cast %648 : vector<1x1x16x128xf32> to vector<16x128xf32>
    %650 = vector.broadcast %78 : f32 to vector<16x128xf32>
    %651 = arith.mulf %650, %649 : vector<16x128xf32>
    %652 = arith.addf %632, %651 : vector<16x128xf32>
    %c1_493 = arith.constant 1 : index
    %c1_494 = arith.constant 1 : index
    %c3_495 = arith.constant 3 : index
    %c0_496 = arith.constant 0 : index
    %653 = vector.load %arg4[%c1_493, %c1_494, %c3_495, %c0_496] : memref<2x7x22x128xf32, #tpu.memory_space<vmem>>, vector<1x1x16x128xf32>
    %654 = vector.shape_cast %653 : vector<1x1x16x128xf32> to vector<16x128xf32>
    %655 = vector.broadcast %79 : f32 to vector<16x128xf32>
    %656 = arith.mulf %655, %654 : vector<16x128xf32>
    %657 = arith.addf %637, %656 : vector<16x128xf32>
    %c1_497 = arith.constant 1 : index
    %c2_498 = arith.constant 2 : index
    %c3_499 = arith.constant 3 : index
    %c0_500 = arith.constant 0 : index
    %658 = vector.load %arg4[%c1_497, %c2_498, %c3_499, %c0_500] : memref<2x7x22x128xf32, #tpu.memory_space<vmem>>, vector<1x1x16x128xf32>
    %659 = vector.shape_cast %658 : vector<1x1x16x128xf32> to vector<16x128xf32>
    %660 = vector.broadcast %80 : f32 to vector<16x128xf32>
    %661 = arith.mulf %660, %659 : vector<16x128xf32>
    %662 = arith.addf %642, %661 : vector<16x128xf32>
    %c1_501 = arith.constant 1 : index
    %c3_502 = arith.constant 3 : index
    %c3_503 = arith.constant 3 : index
    %c0_504 = arith.constant 0 : index
    %663 = vector.load %arg4[%c1_501, %c3_502, %c3_503, %c0_504] : memref<2x7x22x128xf32, #tpu.memory_space<vmem>>, vector<1x1x16x128xf32>
    %664 = vector.shape_cast %663 : vector<1x1x16x128xf32> to vector<16x128xf32>
    %665 = vector.broadcast %81 : f32 to vector<16x128xf32>
    %666 = arith.mulf %665, %664 : vector<16x128xf32>
    %667 = arith.addf %647, %666 : vector<16x128xf32>
    %c1_505 = arith.constant 1 : index
    %c4_506 = arith.constant 4 : index
    %c3_507 = arith.constant 3 : index
    %c0_508 = arith.constant 0 : index
    %668 = vector.load %arg4[%c1_505, %c4_506, %c3_507, %c0_508] : memref<2x7x22x128xf32, #tpu.memory_space<vmem>>, vector<1x1x16x128xf32>
    %669 = vector.shape_cast %668 : vector<1x1x16x128xf32> to vector<16x128xf32>
    %670 = vector.broadcast %82 : f32 to vector<16x128xf32>
    %671 = arith.mulf %670, %669 : vector<16x128xf32>
    %672 = arith.addf %652, %671 : vector<16x128xf32>
    %c1_509 = arith.constant 1 : index
    %c5_510 = arith.constant 5 : index
    %c3_511 = arith.constant 3 : index
    %c0_512 = arith.constant 0 : index
    %673 = vector.load %arg4[%c1_509, %c5_510, %c3_511, %c0_512] : memref<2x7x22x128xf32, #tpu.memory_space<vmem>>, vector<1x1x16x128xf32>
    %674 = vector.shape_cast %673 : vector<1x1x16x128xf32> to vector<16x128xf32>
    %675 = vector.broadcast %83 : f32 to vector<16x128xf32>
    %676 = arith.mulf %675, %674 : vector<16x128xf32>
    %677 = arith.addf %657, %676 : vector<16x128xf32>
    %c1_513 = arith.constant 1 : index
    %c6_514 = arith.constant 6 : index
    %c3_515 = arith.constant 3 : index
    %c0_516 = arith.constant 0 : index
    %678 = vector.load %arg4[%c1_513, %c6_514, %c3_515, %c0_516] : memref<2x7x22x128xf32, #tpu.memory_space<vmem>>, vector<1x1x16x128xf32>
    %679 = vector.shape_cast %678 : vector<1x1x16x128xf32> to vector<16x128xf32>
    %680 = vector.broadcast %84 : f32 to vector<16x128xf32>
    %681 = arith.mulf %680, %679 : vector<16x128xf32>
    %682 = arith.addf %662, %681 : vector<16x128xf32>
    %c1_517 = arith.constant 1 : index
    %c0_518 = arith.constant 0 : index
    %c4_519 = arith.constant 4 : index
    %c0_520 = arith.constant 0 : index
    %683 = vector.load %arg4[%c1_517, %c0_518, %c4_519, %c0_520] : memref<2x7x22x128xf32, #tpu.memory_space<vmem>>, vector<1x1x16x128xf32>
    %684 = vector.shape_cast %683 : vector<1x1x16x128xf32> to vector<16x128xf32>
    %685 = vector.broadcast %85 : f32 to vector<16x128xf32>
    %686 = arith.mulf %685, %684 : vector<16x128xf32>
    %687 = arith.addf %667, %686 : vector<16x128xf32>
    %c1_521 = arith.constant 1 : index
    %c1_522 = arith.constant 1 : index
    %c4_523 = arith.constant 4 : index
    %c0_524 = arith.constant 0 : index
    %688 = vector.load %arg4[%c1_521, %c1_522, %c4_523, %c0_524] : memref<2x7x22x128xf32, #tpu.memory_space<vmem>>, vector<1x1x16x128xf32>
    %689 = vector.shape_cast %688 : vector<1x1x16x128xf32> to vector<16x128xf32>
    %690 = vector.broadcast %86 : f32 to vector<16x128xf32>
    %691 = arith.mulf %690, %689 : vector<16x128xf32>
    %692 = arith.addf %672, %691 : vector<16x128xf32>
    %c1_525 = arith.constant 1 : index
    %c2_526 = arith.constant 2 : index
    %c4_527 = arith.constant 4 : index
    %c0_528 = arith.constant 0 : index
    %693 = vector.load %arg4[%c1_525, %c2_526, %c4_527, %c0_528] : memref<2x7x22x128xf32, #tpu.memory_space<vmem>>, vector<1x1x16x128xf32>
    %694 = vector.shape_cast %693 : vector<1x1x16x128xf32> to vector<16x128xf32>
    %695 = vector.broadcast %87 : f32 to vector<16x128xf32>
    %696 = arith.mulf %695, %694 : vector<16x128xf32>
    %697 = arith.addf %677, %696 : vector<16x128xf32>
    %c1_529 = arith.constant 1 : index
    %c3_530 = arith.constant 3 : index
    %c4_531 = arith.constant 4 : index
    %c0_532 = arith.constant 0 : index
    %698 = vector.load %arg4[%c1_529, %c3_530, %c4_531, %c0_532] : memref<2x7x22x128xf32, #tpu.memory_space<vmem>>, vector<1x1x16x128xf32>
    %699 = vector.shape_cast %698 : vector<1x1x16x128xf32> to vector<16x128xf32>
    %700 = vector.broadcast %88 : f32 to vector<16x128xf32>
    %701 = arith.mulf %700, %699 : vector<16x128xf32>
    %702 = arith.addf %682, %701 : vector<16x128xf32>
    %c1_533 = arith.constant 1 : index
    %c4_534 = arith.constant 4 : index
    %c4_535 = arith.constant 4 : index
    %c0_536 = arith.constant 0 : index
    %703 = vector.load %arg4[%c1_533, %c4_534, %c4_535, %c0_536] : memref<2x7x22x128xf32, #tpu.memory_space<vmem>>, vector<1x1x16x128xf32>
    %704 = vector.shape_cast %703 : vector<1x1x16x128xf32> to vector<16x128xf32>
    %705 = vector.broadcast %89 : f32 to vector<16x128xf32>
    %706 = arith.mulf %705, %704 : vector<16x128xf32>
    %707 = arith.addf %687, %706 : vector<16x128xf32>
    %c1_537 = arith.constant 1 : index
    %c5_538 = arith.constant 5 : index
    %c4_539 = arith.constant 4 : index
    %c0_540 = arith.constant 0 : index
    %708 = vector.load %arg4[%c1_537, %c5_538, %c4_539, %c0_540] : memref<2x7x22x128xf32, #tpu.memory_space<vmem>>, vector<1x1x16x128xf32>
    %709 = vector.shape_cast %708 : vector<1x1x16x128xf32> to vector<16x128xf32>
    %710 = vector.broadcast %90 : f32 to vector<16x128xf32>
    %711 = arith.mulf %710, %709 : vector<16x128xf32>
    %712 = arith.addf %692, %711 : vector<16x128xf32>
    %c1_541 = arith.constant 1 : index
    %c6_542 = arith.constant 6 : index
    %c4_543 = arith.constant 4 : index
    %c0_544 = arith.constant 0 : index
    %713 = vector.load %arg4[%c1_541, %c6_542, %c4_543, %c0_544] : memref<2x7x22x128xf32, #tpu.memory_space<vmem>>, vector<1x1x16x128xf32>
    %714 = vector.shape_cast %713 : vector<1x1x16x128xf32> to vector<16x128xf32>
    %715 = vector.broadcast %91 : f32 to vector<16x128xf32>
    %716 = arith.mulf %715, %714 : vector<16x128xf32>
    %717 = arith.addf %697, %716 : vector<16x128xf32>
    %c1_545 = arith.constant 1 : index
    %c0_546 = arith.constant 0 : index
    %c5_547 = arith.constant 5 : index
    %c0_548 = arith.constant 0 : index
    %718 = vector.load %arg4[%c1_545, %c0_546, %c5_547, %c0_548] : memref<2x7x22x128xf32, #tpu.memory_space<vmem>>, vector<1x1x16x128xf32>
    %719 = vector.shape_cast %718 : vector<1x1x16x128xf32> to vector<16x128xf32>
    %720 = vector.broadcast %92 : f32 to vector<16x128xf32>
    %721 = arith.mulf %720, %719 : vector<16x128xf32>
    %722 = arith.addf %702, %721 : vector<16x128xf32>
    %c1_549 = arith.constant 1 : index
    %c1_550 = arith.constant 1 : index
    %c5_551 = arith.constant 5 : index
    %c0_552 = arith.constant 0 : index
    %723 = vector.load %arg4[%c1_549, %c1_550, %c5_551, %c0_552] : memref<2x7x22x128xf32, #tpu.memory_space<vmem>>, vector<1x1x16x128xf32>
    %724 = vector.shape_cast %723 : vector<1x1x16x128xf32> to vector<16x128xf32>
    %725 = vector.broadcast %93 : f32 to vector<16x128xf32>
    %726 = arith.mulf %725, %724 : vector<16x128xf32>
    %727 = arith.addf %707, %726 : vector<16x128xf32>
    %c1_553 = arith.constant 1 : index
    %c2_554 = arith.constant 2 : index
    %c5_555 = arith.constant 5 : index
    %c0_556 = arith.constant 0 : index
    %728 = vector.load %arg4[%c1_553, %c2_554, %c5_555, %c0_556] : memref<2x7x22x128xf32, #tpu.memory_space<vmem>>, vector<1x1x16x128xf32>
    %729 = vector.shape_cast %728 : vector<1x1x16x128xf32> to vector<16x128xf32>
    %730 = vector.broadcast %94 : f32 to vector<16x128xf32>
    %731 = arith.mulf %730, %729 : vector<16x128xf32>
    %732 = arith.addf %712, %731 : vector<16x128xf32>
    %c1_557 = arith.constant 1 : index
    %c3_558 = arith.constant 3 : index
    %c5_559 = arith.constant 5 : index
    %c0_560 = arith.constant 0 : index
    %733 = vector.load %arg4[%c1_557, %c3_558, %c5_559, %c0_560] : memref<2x7x22x128xf32, #tpu.memory_space<vmem>>, vector<1x1x16x128xf32>
    %734 = vector.shape_cast %733 : vector<1x1x16x128xf32> to vector<16x128xf32>
    %735 = vector.broadcast %95 : f32 to vector<16x128xf32>
    %736 = arith.mulf %735, %734 : vector<16x128xf32>
    %737 = arith.addf %717, %736 : vector<16x128xf32>
    %c1_561 = arith.constant 1 : index
    %c4_562 = arith.constant 4 : index
    %c5_563 = arith.constant 5 : index
    %c0_564 = arith.constant 0 : index
    %738 = vector.load %arg4[%c1_561, %c4_562, %c5_563, %c0_564] : memref<2x7x22x128xf32, #tpu.memory_space<vmem>>, vector<1x1x16x128xf32>
    %739 = vector.shape_cast %738 : vector<1x1x16x128xf32> to vector<16x128xf32>
    %740 = vector.broadcast %96 : f32 to vector<16x128xf32>
    %741 = arith.mulf %740, %739 : vector<16x128xf32>
    %742 = arith.addf %722, %741 : vector<16x128xf32>
    %c1_565 = arith.constant 1 : index
    %c5_566 = arith.constant 5 : index
    %c5_567 = arith.constant 5 : index
    %c0_568 = arith.constant 0 : index
    %743 = vector.load %arg4[%c1_565, %c5_566, %c5_567, %c0_568] : memref<2x7x22x128xf32, #tpu.memory_space<vmem>>, vector<1x1x16x128xf32>
    %744 = vector.shape_cast %743 : vector<1x1x16x128xf32> to vector<16x128xf32>
    %745 = vector.broadcast %97 : f32 to vector<16x128xf32>
    %746 = arith.mulf %745, %744 : vector<16x128xf32>
    %747 = arith.addf %727, %746 : vector<16x128xf32>
    %c1_569 = arith.constant 1 : index
    %c6_570 = arith.constant 6 : index
    %c5_571 = arith.constant 5 : index
    %c0_572 = arith.constant 0 : index
    %748 = vector.load %arg4[%c1_569, %c6_570, %c5_571, %c0_572] : memref<2x7x22x128xf32, #tpu.memory_space<vmem>>, vector<1x1x16x128xf32>
    %749 = vector.shape_cast %748 : vector<1x1x16x128xf32> to vector<16x128xf32>
    %750 = vector.broadcast %98 : f32 to vector<16x128xf32>
    %751 = arith.mulf %750, %749 : vector<16x128xf32>
    %752 = arith.addf %732, %751 : vector<16x128xf32>
    %c1_573 = arith.constant 1 : index
    %c0_574 = arith.constant 0 : index
    %c6_575 = arith.constant 6 : index
    %c0_576 = arith.constant 0 : index
    %753 = vector.load %arg4[%c1_573, %c0_574, %c6_575, %c0_576] : memref<2x7x22x128xf32, #tpu.memory_space<vmem>>, vector<1x1x16x128xf32>
    %754 = vector.shape_cast %753 : vector<1x1x16x128xf32> to vector<16x128xf32>
    %755 = vector.broadcast %99 : f32 to vector<16x128xf32>
    %756 = arith.mulf %755, %754 : vector<16x128xf32>
    %757 = arith.addf %737, %756 : vector<16x128xf32>
    %c1_577 = arith.constant 1 : index
    %c1_578 = arith.constant 1 : index
    %c6_579 = arith.constant 6 : index
    %c0_580 = arith.constant 0 : index
    %758 = vector.load %arg4[%c1_577, %c1_578, %c6_579, %c0_580] : memref<2x7x22x128xf32, #tpu.memory_space<vmem>>, vector<1x1x16x128xf32>
    %759 = vector.shape_cast %758 : vector<1x1x16x128xf32> to vector<16x128xf32>
    %760 = vector.broadcast %100 : f32 to vector<16x128xf32>
    %761 = arith.mulf %760, %759 : vector<16x128xf32>
    %762 = arith.addf %742, %761 : vector<16x128xf32>
    %c1_581 = arith.constant 1 : index
    %c2_582 = arith.constant 2 : index
    %c6_583 = arith.constant 6 : index
    %c0_584 = arith.constant 0 : index
    %763 = vector.load %arg4[%c1_581, %c2_582, %c6_583, %c0_584] : memref<2x7x22x128xf32, #tpu.memory_space<vmem>>, vector<1x1x16x128xf32>
    %764 = vector.shape_cast %763 : vector<1x1x16x128xf32> to vector<16x128xf32>
    %765 = vector.broadcast %101 : f32 to vector<16x128xf32>
    %766 = arith.mulf %765, %764 : vector<16x128xf32>
    %767 = arith.addf %747, %766 : vector<16x128xf32>
    %c1_585 = arith.constant 1 : index
    %c3_586 = arith.constant 3 : index
    %c6_587 = arith.constant 6 : index
    %c0_588 = arith.constant 0 : index
    %768 = vector.load %arg4[%c1_585, %c3_586, %c6_587, %c0_588] : memref<2x7x22x128xf32, #tpu.memory_space<vmem>>, vector<1x1x16x128xf32>
    %769 = vector.shape_cast %768 : vector<1x1x16x128xf32> to vector<16x128xf32>
    %770 = vector.broadcast %102 : f32 to vector<16x128xf32>
    %771 = arith.mulf %770, %769 : vector<16x128xf32>
    %772 = arith.addf %752, %771 : vector<16x128xf32>
    %c1_589 = arith.constant 1 : index
    %c4_590 = arith.constant 4 : index
    %c6_591 = arith.constant 6 : index
    %c0_592 = arith.constant 0 : index
    %773 = vector.load %arg4[%c1_589, %c4_590, %c6_591, %c0_592] : memref<2x7x22x128xf32, #tpu.memory_space<vmem>>, vector<1x1x16x128xf32>
    %774 = vector.shape_cast %773 : vector<1x1x16x128xf32> to vector<16x128xf32>
    %775 = vector.broadcast %103 : f32 to vector<16x128xf32>
    %776 = arith.mulf %775, %774 : vector<16x128xf32>
    %777 = arith.addf %757, %776 : vector<16x128xf32>
    %c1_593 = arith.constant 1 : index
    %c5_594 = arith.constant 5 : index
    %c6_595 = arith.constant 6 : index
    %c0_596 = arith.constant 0 : index
    %778 = vector.load %arg4[%c1_593, %c5_594, %c6_595, %c0_596] : memref<2x7x22x128xf32, #tpu.memory_space<vmem>>, vector<1x1x16x128xf32>
    %779 = vector.shape_cast %778 : vector<1x1x16x128xf32> to vector<16x128xf32>
    %780 = vector.broadcast %104 : f32 to vector<16x128xf32>
    %781 = arith.mulf %780, %779 : vector<16x128xf32>
    %782 = arith.addf %762, %781 : vector<16x128xf32>
    %c1_597 = arith.constant 1 : index
    %c6_598 = arith.constant 6 : index
    %c6_599 = arith.constant 6 : index
    %c0_600 = arith.constant 0 : index
    %783 = vector.load %arg4[%c1_597, %c6_598, %c6_599, %c0_600] : memref<2x7x22x128xf32, #tpu.memory_space<vmem>>, vector<1x1x16x128xf32>
    %784 = vector.shape_cast %783 : vector<1x1x16x128xf32> to vector<16x128xf32>
    %785 = vector.broadcast %105 : f32 to vector<16x128xf32>
    %786 = arith.mulf %785, %784 : vector<16x128xf32>
    %787 = arith.addf %767, %786 : vector<16x128xf32>
    %788 = arith.addf %782, %787 : vector<16x128xf32>
    %789 = arith.addf %772, %777 : vector<16x128xf32>
    %790 = arith.addf %788, %789 : vector<16x128xf32>
    %791 = vector.extract_strided_slice %790 {offsets = [0, 0], sizes = [16, 16], strides = [1, 1]} : vector<16x128xf32> to vector<16x16xf32>
    %792 = arith.negf %791 : vector<16x16xf32>
    %793 = math.exp %792 : vector<16x16xf32>
    %cst_601 = arith.constant 1.000000e+00 : f32
    %794 = vector.broadcast %cst_601 : f32 to vector<16x16xf32>
    %795 = arith.addf %794, %793 : vector<16x16xf32>
    %796 = arith.divf %794, %795 : vector<16x16xf32>
    %797 = vector.extract_strided_slice %796 {offsets = [0, 0], sizes = [1, 16], strides = [1, 1]} : vector<16x16xf32> to vector<1x16xf32>
    %c0_602 = arith.constant 0 : index
    %c0_603 = arith.constant 0 : index
    %798 = vector.load %arg5[%c0_602, %c0_603] : memref<1x256xf32, #tpu.memory_space<vmem>>, vector<1x16xf32>
    tpu.vector_store %arg5[%c0_602, %c0_603], %797 {strides = array<i32>} : memref<1x256xf32, #tpu.memory_space<vmem>>, vector<1x16xf32>,
    %799 = vector.extract_strided_slice %796 {offsets = [1, 0], sizes = [1, 16], strides = [1, 1]} : vector<16x16xf32> to vector<1x16xf32>
    %c0_604 = arith.constant 0 : index
    %c16_605 = arith.constant 16 : index
    %800 = vector.load %arg5[%c0_604, %c16_605] : memref<1x256xf32, #tpu.memory_space<vmem>>, vector<1x16xf32>
    tpu.vector_store %arg5[%c0_604, %c16_605], %799 {strides = array<i32>} : memref<1x256xf32, #tpu.memory_space<vmem>>, vector<1x16xf32>,
    %801 = vector.extract_strided_slice %796 {offsets = [2, 0], sizes = [1, 16], strides = [1, 1]} : vector<16x16xf32> to vector<1x16xf32>
    %c0_606 = arith.constant 0 : index
    %c32_607 = arith.constant 32 : index
    %802 = vector.load %arg5[%c0_606, %c32_607] : memref<1x256xf32, #tpu.memory_space<vmem>>, vector<1x16xf32>
    tpu.vector_store %arg5[%c0_606, %c32_607], %801 {strides = array<i32>} : memref<1x256xf32, #tpu.memory_space<vmem>>, vector<1x16xf32>,
    %803 = vector.extract_strided_slice %796 {offsets = [3, 0], sizes = [1, 16], strides = [1, 1]} : vector<16x16xf32> to vector<1x16xf32>
    %c0_608 = arith.constant 0 : index
    %c48_609 = arith.constant 48 : index
    %804 = vector.load %arg5[%c0_608, %c48_609] : memref<1x256xf32, #tpu.memory_space<vmem>>, vector<1x16xf32>
    tpu.vector_store %arg5[%c0_608, %c48_609], %803 {strides = array<i32>} : memref<1x256xf32, #tpu.memory_space<vmem>>, vector<1x16xf32>,
    %805 = vector.extract_strided_slice %796 {offsets = [4, 0], sizes = [1, 16], strides = [1, 1]} : vector<16x16xf32> to vector<1x16xf32>
    %c0_610 = arith.constant 0 : index
    %c64_611 = arith.constant 64 : index
    %806 = vector.load %arg5[%c0_610, %c64_611] : memref<1x256xf32, #tpu.memory_space<vmem>>, vector<1x16xf32>
    tpu.vector_store %arg5[%c0_610, %c64_611], %805 {strides = array<i32>} : memref<1x256xf32, #tpu.memory_space<vmem>>, vector<1x16xf32>,
    %807 = vector.extract_strided_slice %796 {offsets = [5, 0], sizes = [1, 16], strides = [1, 1]} : vector<16x16xf32> to vector<1x16xf32>
    %c0_612 = arith.constant 0 : index
    %c80_613 = arith.constant 80 : index
    %808 = vector.load %arg5[%c0_612, %c80_613] : memref<1x256xf32, #tpu.memory_space<vmem>>, vector<1x16xf32>
    tpu.vector_store %arg5[%c0_612, %c80_613], %807 {strides = array<i32>} : memref<1x256xf32, #tpu.memory_space<vmem>>, vector<1x16xf32>,
    %809 = vector.extract_strided_slice %796 {offsets = [6, 0], sizes = [1, 16], strides = [1, 1]} : vector<16x16xf32> to vector<1x16xf32>
    %c0_614 = arith.constant 0 : index
    %c96_615 = arith.constant 96 : index
    %810 = vector.load %arg5[%c0_614, %c96_615] : memref<1x256xf32, #tpu.memory_space<vmem>>, vector<1x16xf32>
    tpu.vector_store %arg5[%c0_614, %c96_615], %809 {strides = array<i32>} : memref<1x256xf32, #tpu.memory_space<vmem>>, vector<1x16xf32>,
    %811 = vector.extract_strided_slice %796 {offsets = [7, 0], sizes = [1, 16], strides = [1, 1]} : vector<16x16xf32> to vector<1x16xf32>
    %c0_616 = arith.constant 0 : index
    %c112 = arith.constant 112 : index
    %812 = vector.load %arg5[%c0_616, %c112] : memref<1x256xf32, #tpu.memory_space<vmem>>, vector<1x16xf32>
    tpu.vector_store %arg5[%c0_616, %c112], %811 {strides = array<i32>} : memref<1x256xf32, #tpu.memory_space<vmem>>, vector<1x16xf32>,
    %813 = vector.extract_strided_slice %796 {offsets = [8, 0], sizes = [1, 16], strides = [1, 1]} : vector<16x16xf32> to vector<1x16xf32>
    %c0_617 = arith.constant 0 : index
    %c128 = arith.constant 128 : index
    %814 = vector.load %arg5[%c0_617, %c128] : memref<1x256xf32, #tpu.memory_space<vmem>>, vector<1x16xf32>
    tpu.vector_store %arg5[%c0_617, %c128], %813 {strides = array<i32>} : memref<1x256xf32, #tpu.memory_space<vmem>>, vector<1x16xf32>,
    %815 = vector.extract_strided_slice %796 {offsets = [9, 0], sizes = [1, 16], strides = [1, 1]} : vector<16x16xf32> to vector<1x16xf32>
    %c0_618 = arith.constant 0 : index
    %c144 = arith.constant 144 : index
    %816 = vector.load %arg5[%c0_618, %c144] : memref<1x256xf32, #tpu.memory_space<vmem>>, vector<1x16xf32>
    tpu.vector_store %arg5[%c0_618, %c144], %815 {strides = array<i32>} : memref<1x256xf32, #tpu.memory_space<vmem>>, vector<1x16xf32>,
    %817 = vector.extract_strided_slice %796 {offsets = [10, 0], sizes = [1, 16], strides = [1, 1]} : vector<16x16xf32> to vector<1x16xf32>
    %c0_619 = arith.constant 0 : index
    %c160 = arith.constant 160 : index
    %818 = vector.load %arg5[%c0_619, %c160] : memref<1x256xf32, #tpu.memory_space<vmem>>, vector<1x16xf32>
    tpu.vector_store %arg5[%c0_619, %c160], %817 {strides = array<i32>} : memref<1x256xf32, #tpu.memory_space<vmem>>, vector<1x16xf32>,
    %819 = vector.extract_strided_slice %796 {offsets = [11, 0], sizes = [1, 16], strides = [1, 1]} : vector<16x16xf32> to vector<1x16xf32>
    %c0_620 = arith.constant 0 : index
    %c176 = arith.constant 176 : index
    %820 = vector.load %arg5[%c0_620, %c176] : memref<1x256xf32, #tpu.memory_space<vmem>>, vector<1x16xf32>
    tpu.vector_store %arg5[%c0_620, %c176], %819 {strides = array<i32>} : memref<1x256xf32, #tpu.memory_space<vmem>>, vector<1x16xf32>,
    %821 = vector.extract_strided_slice %796 {offsets = [12, 0], sizes = [1, 16], strides = [1, 1]} : vector<16x16xf32> to vector<1x16xf32>
    %c0_621 = arith.constant 0 : index
    %c192 = arith.constant 192 : index
    %822 = vector.load %arg5[%c0_621, %c192] : memref<1x256xf32, #tpu.memory_space<vmem>>, vector<1x16xf32>
    tpu.vector_store %arg5[%c0_621, %c192], %821 {strides = array<i32>} : memref<1x256xf32, #tpu.memory_space<vmem>>, vector<1x16xf32>,
    %823 = vector.extract_strided_slice %796 {offsets = [13, 0], sizes = [1, 16], strides = [1, 1]} : vector<16x16xf32> to vector<1x16xf32>
    %c0_622 = arith.constant 0 : index
    %c208 = arith.constant 208 : index
    %824 = vector.load %arg5[%c0_622, %c208] : memref<1x256xf32, #tpu.memory_space<vmem>>, vector<1x16xf32>
    tpu.vector_store %arg5[%c0_622, %c208], %823 {strides = array<i32>} : memref<1x256xf32, #tpu.memory_space<vmem>>, vector<1x16xf32>,
    %825 = vector.extract_strided_slice %796 {offsets = [14, 0], sizes = [1, 16], strides = [1, 1]} : vector<16x16xf32> to vector<1x16xf32>
    %c0_623 = arith.constant 0 : index
    %c224 = arith.constant 224 : index
    %826 = vector.load %arg5[%c0_623, %c224] : memref<1x256xf32, #tpu.memory_space<vmem>>, vector<1x16xf32>
    tpu.vector_store %arg5[%c0_623, %c224], %825 {strides = array<i32>} : memref<1x256xf32, #tpu.memory_space<vmem>>, vector<1x16xf32>,
    %827 = vector.extract_strided_slice %796 {offsets = [15, 0], sizes = [1, 16], strides = [1, 1]} : vector<16x16xf32> to vector<1x16xf32>
    %c0_624 = arith.constant 0 : index
    %c240 = arith.constant 240 : index
    %828 = vector.load %arg5[%c0_624, %c240] : memref<1x256xf32, #tpu.memory_space<vmem>>, vector<1x16xf32>
    tpu.vector_store %arg5[%c0_624, %c240], %827 {strides = array<i32>} : memref<1x256xf32, #tpu.memory_space<vmem>>, vector<1x16xf32>,
    %c0_625 = arith.constant 0 : index
    %c0_626 = arith.constant 0 : index
    %829 = vector.load %arg5[%c0_625, %c0_626] : memref<1x256xf32, #tpu.memory_space<vmem>>, vector<1x256xf32>
    %c0_627 = arith.constant 0 : index
    %c0_628 = arith.constant 0 : index
    %c0_629 = arith.constant 0 : index
    %830 = vector.load %arg2[%c0_627, %c0_628, %c0_629] : memref<1x4x256xf32, #tpu.memory_space<vmem>>, vector<1x4x256xf32>
    %831 = vector.shape_cast %830 : vector<1x4x256xf32> to vector<4x256xf32>
    %832 = vector.broadcast %829 : vector<1x256xf32> to vector<4x256xf32>
    %833 = arith.mulf %831, %832 : vector<4x256xf32>
    %c0_630 = arith.constant 0 : index
    %c0_631 = arith.constant 0 : index
    %c0_632 = arith.constant 0 : index
    %834 = vector.load %arg3[%c0_630, %c0_631, %c0_632] : memref<1x4x256xf32, #tpu.memory_space<vmem>>, vector<1x4x256xf32>
    %835 = vector.shape_cast %834 : vector<1x4x256xf32> to vector<4x256xf32>
    %836 = vector.shape_cast %833 : vector<4x256xf32> to vector<1x4x256xf32>
    tpu.vector_store %arg3[%c0_630, %c0_631, %c0_632], %836 {strides = array<i32>} : memref<1x4x256xf32, #tpu.memory_space<vmem>>, vector<1x4x256xf32>,
    return
  }
  func.func @transform_0(%arg0: i32) -> i32 {
    %c0_i32 = arith.constant 0 : i32
    %c0_i32_0 = arith.constant 0 : i32
    return %c0_i32 : i32
  }
  func.func @transform_1(%arg0: i32) -> (i32, i32, i32) {
    %c0_i32 = arith.constant 0 : i32
    %c0_i32_0 = arith.constant 0 : i32
    %c0_i32_1 = arith.constant 0 : i32
    return %arg0, %c0_i32, %c0_i32_0 : i32, i32, i32
  }
  func.func @transform_2(%arg0: i32) -> (i32, i32, i32) {
    %c0_i32 = arith.constant 0 : i32
    %c0_i32_0 = arith.constant 0 : i32
    %c0_i32_1 = arith.constant 0 : i32
    return %arg0, %c0_i32, %c0_i32_0 : i32, i32, i32
  }
}

</mosaic_0001>

<bundles_post_ra>
// kernel: tpu_custom_call.1
= control target key start
LH: loop header
LB: loop body
LE: loop exit
PB: predicated region body
PF: predicated region fallthrough
CT: control target
= control target key end

     0   :  { %s3452_s0 = inlined_call_operand.hbm [shape: f32[98], index: 0, kind: input, shape index: {}]   ;;  %s3453_s1 = inlined_call_operand.hbm [shape: f32[2,4,256], index: 1, kind: input, shape index: {}]   ;;  %s3454_s2 = inlined_call_operand.hbm [shape: f32[2,4,256], index: 2, kind: output, shape index: {}]  }
   0x1   :  { %3605 = sst [smem:[#allocation138_spill]] %s3452_s0 }
   0x2   :  { %3606 = sst [smem:[#allocation139_spill]] %s3453_s1 }
   0x3   :  { %3607 = sst [smem:[#allocation140_spill]] %s3454_s2 }
   0x4   :  { %7 = vsyncpa [#allocation7], 0 }
   0x5   :  { %8 = vsyncpa [#allocation5], 0 }
   0x6   :  { %10 = vsyncpa [#allocation5 + $0x1], 0 }
   0x7   :  { %11 = vsyncpa [#allocation6], 0 }
   0x8   :  { %13 = vsyncpa [#allocation6 + $0x1], 0  ;;  %s1932_s9 = smov 0   ;;  %s1934_s10 = smov 0  }
   0x9   :  { %s1936_s11 = smov 0   ;;  %s1938_s12 = smov 0  }
   0xa LB: > { %3608 = sst [smem:[#allocation13_spill]] %s1877_s9  ;;  %s1953_s13 = sadd.s32 4294967295, %s1889_s12   ;;  %s1889_s12 = sphi %s1938_s12, %s4106_s12   ;;  %s1885_s11 = sphi %s1936_s11, %s4109_s11   ;;  %s1881_s10 = sphi %s1934_s10, %s4108_s10   ;;  %s1877_s9 = sphi %s1932_s9, %s4107_s9  }
   0xb   : > { %3609 = sst [smem:[#allocation14_spill]] %s1881_s10  ;;  %s1570_s14 = sadd.s32 4294967294, %s1889_s12  }
   0xc   : > { %3610 = sst [smem:[#allocation15_spill]] %s1885_s11  ;;  %p60_p0 = scmp.ne.s32.totalorder %s1881_s10, %s1877_s9 }
   0xd   : > { %3611 = sst [smem:[#allocation16_spill]] %s1889_s12  ;;  %p3455_p1 = scmp.eq.s32.totalorder %s1953_s13, 0 }
   0xe   : > { %3612 = sst [smem:[#allocation17_spill]] %s1953_s13  ;;  %p90_p3 = scmp.eq.s32.totalorder %s1570_s14, 1 }
   0xf   : > { %p1962_p4 = por %p3455_p1, %p60_p0  ;;  %p1571_p5 = scmp.ge.s32.totalorder %s1889_s12, 1 }
  0x10   : > { %p1967_p6 = por %p90_p3, %p60_p0  ;;  %p97_p7 = scmp.lt.s32.totalorder %s1889_s12, 3 }
  0x11   : > { %s3613_s15 = scalar_select %p1962_p4, 1, 0 }
  0x12   : > { %s3614_s16 = scalar_select %p1967_p6, 1, 0 }
  0x13   : > { %p1972_p8 = pnand %p1571_p5, %p97_p7  ;;  %s1978_s18 = sadd.s32 1, %s1889_s12  }
  0x14   : > { %3615 = sst [smem:[#allocation18_spill]] %s3614_s16  ;;  %s44_s19 = ssub.s32 %s1889_s12, %s1978_s18 }
  0x15   : > { %3617 = sst [smem:[#allocation19_spill]] %s1978_s18  ;;  %p1695_p10 = pneg %p1972_p8 }
  0x16   : > { %s47_s20 = sadd.s32 1, %s1885_s11  ;;  %p1991_p12 = scmp.eq.s32.totalorder %s44_s19, 0 }
  0x17   : > { %p1987_p11 = pnand %p1695_p10, %p3455_p1  ;;  %p54_p13 = scmp.ne.s32.totalorder %s1885_s11, %s1881_s10 }
  0x18   : > { %p55_p0 = scmp.eq.s32.totalorder %s1889_s12, 0  ;;  %p1708_p3 = scmp.lt.s32.totalorder %s1889_s12, 2 }
  0x19   : > { %s3620_s0 = sld [smem:[#allocation138_spill]]  ;;  %p1778_p7 = pneg %p1987_p11 }
  0x1f   : > { %s1776_s25 = scalar_lea.hbm %s3620_s0, 16 }
  0x20   : > { %p1777_p5 = scmp.ne.s32.totalorder %s3620_s0, %s1776_s25  ;;  %p1783_p1 = scmp.lt.u32.totalorder %s1776_s25, %s3620_s0 }
  0x22   : > { %p1779_p10 = pnand %p1778_p7, %p1777_p5 }
  0x24   : > { %p1780_p9 = pneg %p1779_p10 }
  0x26   : > { %p1785_p2 = pnand %p1783_p1, %p1780_p9 }
  0x28   : > { %1788 = shalt.err (!%p1785_p2)
}
  0x29   : > { %s1891_s30 = smov [#allocation4]   ;;  %p56_p1 = por %p55_p0, %p54_p13 }
  0x2a   : > { %1698 = dma.hbm_to_smem (!%p1987_p11), %s3620_s0, 16, %s1891_s30, [#allocation7]  }
  0x2b   : > { %s2018_s5 = scalar_select %p1991_p12, %s1885_s11, %s47_s20  }
  0x2c   : > { %p3622_p2 = scmp.eq.s32.totalorder %s1953_s13, 1  ;;  %s119_s7 = sand.u32 1, %s1885_s11  }
  0x2d   : > { %3621 = sst [smem:[#allocation20_spill]] %s2018_s5  ;;  %s1685_s8 = sshll.u32 %s1889_s12, 7 }
  0x2e   : > { %p2030_p9 = por %p3622_p2, %p54_p13  ;;  %s1574_s14 = sshll.u32 %s119_s7, 3 }
  0x2f   : > { %s3625_s1 = sld [smem:[#allocation139_spill]]  ;;  %s123_s20 = scalar_lea.vmem [#allocation8], %s1574_s14 }
  0x30   : > { %s3623_s6 = scalar_select %p2030_p9, 1, 0 }
  0x31   : > { %s131_s22 = sshll.u32 %s123_s20, 4  ;;  %p2043_p11 = pnand %p1708_p3, %p56_p1  ;;  %s2047_s22 = int_to_ptr.vmem [resolvable:$true] %s131_s22 }
  0x32   : > { %3624 = sst [smem:[#allocation21_spill]] %s3623_s6  ;;  %s120_s25 = scalar_lea.sflag [#allocation5], %s119_s7 }
  0x33   : > { %p1791_p13 = pneg %p2043_p11 }
  0x35   : > { %s2039_s23 = scalar_lea.hbm %s3625_s1, %s1685_s8  ;;  %s1794_s29 = scalar_lea.hbm %s3625_s1, 256 }
  0x36   : > { %s1789_s26 = scalar_lea.hbm %s2039_s23, 128  ;;  %p1795_p3 = scmp.lt.u32.totalorder %s2039_s23, %s3625_s1 }
  0x37   : > { %p1790_p12 = scmp.ne.s32.totalorder %s2039_s23, %s1789_s26  ;;  %p1796_p7 = scmp.lt.u32.totalorder %s1794_s29, %s1789_s26 }
  0x38   : > { %p1798_p1 = scmp.lt.u32.totalorder %s1789_s26, %s2039_s23 }
  0x39   : > { %p1792_p0 = pnand %p1791_p13, %p1790_p12  ;;  %p1797_p10 = por %p1796_p7, %p1795_p3 }
  0x3b   : > { %p1793_p5 = pneg %p1792_p0  ;;  %p1799_p2 = por %p1798_p1, %p1797_p10 }
  0x3d   : > { %p1800_p6 = pnand %p1799_p2, %p1793_p5 }
  0x3f   : > { %1803 = shalt.err (!%p1800_p6)
}
  0x40   : > { %s1804_s4 = scalar_lea.vmem %s2047_s22, 128  ;;  %s1892_s7 = smov [#allocation8]  }
  0x41   : > { %p1805_p12 = scmp.ne.s32.totalorder %s2047_s22, %s1804_s4  ;;  %s1809_s8 = sshll.u32 %s1892_s7, 4  ;;  %s1810_s8 = int_to_ptr.vmem [resolvable:$false] %s1809_s8 }
  0x42   : > { %s1811_s14 = scalar_lea.vmem %s1810_s8, 256  ;;  %p1812_p4 = scmp.lt.s32.totalorder %s2047_s22, %s1810_s8 }
  0x43   : > { %p1807_p0 = pnand %p1805_p12, %p1791_p13  ;;  %p1813_p3 = scmp.lt.s32.totalorder %s1811_s14, %s1804_s4 }
  0x45   : > { %p1808_p9 = pneg %p1807_p0  ;;  %p1814_p7 = por %p1813_p3, %p1812_p4 }
  0x47   : > { %p1815_p10 = pnand %p1814_p7, %p1808_p9 }
  0x49   : > { %1818 = shalt.err (!%p1815_p10)
}
  0x4a   : > { %1702 = dma.hbm_to_vmem [thread:$0]  (!%p2043_p11), %s2039_s23, 128, %s2047_s22, %s120_s25  }
  0x4b   : > { %140 = sbr.rel (%p1972_p8) target bundleno = 747 (0x2eb), region = 28 }
  0x52   : > { %p3627_p6 = scmp.eq.s32.totalorder %s1953_s13, 0 }
  0x54   : > { %1864 = dma.done.wait (%p3627_p6), [#allocation7], 16   ;;  %p3628_p13 = pmov %p3627_p6 }
  0x55   : > { %s2081_s19 = sand.u32 1, %s1881_s10   ;;  %p3631_p4 = scmp.ne.s32.totalorder %s3613_s15, 0 }
  0x56   : > { %1866 = vsyncadd (%p3628_p13), [#allocation7], 4294967280  ;;  %3629 = sst [smem:[#allocation22_spill]] %s2081_s19  ;;  %s3458_s21 = sshll.u32 %s2081_s19, 3 }
  0x57   : > { %s147_s20 = scalar_lea.sflag [#allocation5], %s2081_s19  ;;  %s2087_s23 = scalar_lea.vmem [#allocation8], %s3458_s21 }
  0x58   : > { %3630 = sst [smem:[#allocation23_spill]] %s2087_s23 }
  0x59   : > { %1868 = dma.done.wait (%p3631_p4), %s147_s20, 128  }
  0x5a   : > { %1870 = vsyncadd (%p3631_p4), %s147_s20, 4294967168 }
  0x5b   : > { %155 = sfence }
  0x5c   : > { %v277_v0 = vld [vmem:[%s2087_s23] sm:$0xff]  ;;  %vm281_vm0 = vcmask 1043456   ;;  %v1893_v4 = vmov 0.0   ;;  %s1894_s15 = smov 99   ;;  %s1895_s17 = smov 3   ;;  %vm316_vm1 = vcmask 147480  }
  0x5d   : > { %v282_v1 = vsel %vm281_vm0, %v277_v0, 0.0  ;;  %v279_v2 = vcombine.high %v277_v0, %v277_v0  ;;  %172 = vst [vmem:[#allocation2] sm:$0xff] %v1893_v4  ;;  %173 = vst [vmem:[#allocation2 + $0x8] sm:$0xff] %v1893_v4  ;;  %s1896_s22 = smov 83   ;;  %s1897_s24 = smov 115   ;;  %v296_v17 = vsel %vm281_vm0, %v277_v0, -inf }
  0x5e   : > { %v283_v3 = vrot.slane %v282_v1, 4  ;;  %174 = vst [vmem:[#allocation2 + $0x10] sm:$0x3f] %v1893_v4  ;;  %176 = vst [vmem:[#allocation2 + $0xa8] sm:$0xff] %v1893_v4  ;;  %s1898_s25 = smov 51   ;;  %s1899_s26 = smov 67  }
  0x5f   : > { %177 = vst [vmem:[#allocation2 + $0xb0] sm:$0xff] %v1893_v4  ;;  %178 = vst [vmem:[#allocation2 + $0xb8] sm:$0x3f] %v1893_v4  ;;  %v289_v5 = vsel %vm281_vm0, %v279_v2, 0.0  ;;  %v297_v19 = vrot.slane %v296_v17, 4  ;;  %s1900_s27 = smov 19  }
  0x60   : > { %v284_v6 = vadd.f32 %v283_v3, %v282_v1  ;;  %v290_v7 = vrot.slane %v289_v5, 4  ;;  %s1901_s28 = smov 35   ;;  %v303_v24 = vsel %vm281_vm0, %v279_v2, -inf  ;;  %s1902_s29 = smov 126  }
  0x61   : > { %v298_v21 = vmax.f32 %v296_v17, %v297_v19  ;;  %v304_v26 = vrot.slane %v303_v24, 4  ;;  %s1903_s30 = smov 127   ;;  %s1904_s3 = smov 125  }
  0x62   : > { %v285_v8 = vrot.slane %v284_v6, 2  ;;  %v291_v10 = vadd.f32 %v290_v7, %v289_v5  ;;  %s1905_s4 = smov 124   ;;  %s1906_s7 = smov 123  }
  0x63   : > { %v299_v22 = vrot.slane %v298_v21, 2  ;;  %v305_v28 = vmax.f32 %v303_v24, %v304_v26  ;;  %s1907_s8 = smov 122   ;;  %s2221_s14 = sld [smem:[#allocation4]] }
  0x64   : > { %v286_v9 = vadd.f32 %v285_v8, %v284_v6  ;;  %v292_v13 = vrot.slane %v291_v10, 2  ;;  %s2223_s20 = sld [smem:[#allocation4 + $0x7]]  ;;  %s2253_s21 = sld [smem:[#allocation4 + $0x33]] }
  0x65   : > { %v300_v23 = vmax.f32 %v298_v21, %v299_v22  ;;  %v306_v29 = vrot.slane %v305_v28, 2  ;;  %s2255_s0 = sld [smem:[#allocation4 + $0x34]]  ;;  %s2257_s1 = sld [smem:[#allocation4 + $0x1]] }
  0x66   : > { %v287_v11 = vrot.slane %v286_v9, 1  ;;  %v293_v15 = vadd.f32 %v292_v13, %v291_v10  ;;  %s2259_s5 = sld [smem:[#allocation4 + $0x4]]  ;;  %s2261_s11 = sld [smem:[#allocation4 + $0x39]] }
  0x67   : > { %v301_v25 = vrot.slane %v300_v23, 1  ;;  %v307_v30 = vmax.f32 %v305_v28, %v306_v29  ;;  %s2263_s10 = sld [smem:[#allocation4 + $0x40]]  ;;  %s2265_s18 = sld [smem:[#allocation4 + $0x47]] }
  0x68   : > { %v288_v12 = vadd.f32 %v287_v11, %v286_v9  ;;  %v294_v16 = vrot.slane %v293_v15, 1  ;;  %s2267_s12 = sld [smem:[#allocation4 + $0x4e]]  ;;  %s2269_s16 = sld [smem:[#allocation4 + $0x55]] }
  0x69   : > { %v302_v27 = vmax.f32 %v300_v23, %v301_v25  ;;  %v308_v31 = vrot.slane %v307_v30, 1  ;;  %s2271_s9 = sld [smem:[#allocation4 + $0x5c]]  ;;  %s2273_s2 = sld [smem:[#allocation4 + $0x5]]  ;;  %v573_v10 = vstv %s2221_s14 }
  0x6a   : > { %v310_v14 = vmul.f32 0.25, %v288_v12  ;;  %v295_v18 = vadd.f32 %v294_v16, %v293_v15  ;;  %3635 = sst [smem:[#allocation27_spill]] %s2253_s21  ;;  %s2275_s6 = sld [smem:[#allocation4 + $0x3]]  ;;  %v622_v11 = vstv %s2223_s20 }
  0x6b   : > { %v309_v32 = vmax.f32 %v307_v30, %v308_v31  ;;  %3636 = sst [smem:[#allocation28_spill]] %s2255_s0  ;;  %s2277_s19 = sld [smem:[#allocation4 + $0x3a]] }
  0x6c   : > { %322 = vrot.lane.b32.xlu1 %v310_v14, %s1894_s15  ;;  %313 = vrot.lane.b32.xlu0 %v310_v14, %s1895_s17  ;;  %v311_v20 = vmul.f32 0.25, %v295_v18  ;;  %3637 = sst [smem:[#allocation29_spill]] %s2257_s1  ;;  %s2279_s13 = sld [smem:[#allocation4 + $0x41]] }
  0x6d   : > { %3638 = sst [smem:[#allocation30_spill]] %s2259_s5  ;;  %s2281_s23 = sld [smem:[#allocation4 + $0x48]] }
  0x6e   : > { %3639 = sst [smem:[#allocation31_spill]] %s2261_s11  ;;  %s2283_s11 = sld [smem:[#allocation4 + $0x4f]] }
  0x6f   : > { %3640 = sst [smem:[#allocation32_spill]] %s2263_s10  ;;  %s2285_s10 = sld [smem:[#allocation4 + $0x56]] }
  0x70   : > { %326 = vrot.lane.b32.xlu1 %v310_v14, %s1896_s22  ;;  %318 = vrot.lane.b32.xlu0 %v310_v14, %s1897_s24  ;;  %3641 = sst [smem:[#allocation33_spill]] %s2265_s18  ;;  %s2287_s18 = sld [smem:[#allocation4 + $0x5d]] }
  0x71   : > { %3642 = sst [smem:[#allocation34_spill]] %s2267_s12  ;;  %s2289_s12 = sld [smem:[#allocation4 + $0x8]] }
  0x72   : > { %3643 = sst [smem:[#allocation35_spill]] %s2269_s16  ;;  %s2330_s14 = sld [smem:[#allocation4 + $0x21]] }
  0x73   : > { %3644 = sst [smem:[#allocation36_spill]] %s2271_s9  ;;  %s2291_s16 = sld [smem:[#allocation4 + $0x6]] }
  0x74   : > { %334 = vrot.lane.b32.xlu1 %v310_v14, %s1898_s25  ;;  %330 = vrot.lane.b32.xlu0 %v310_v14, %s1899_s26  ;;  %3645 = sst [smem:[#allocation37_spill]] %s2273_s2  ;;  %s2293_s2 = sld [smem:[#allocation4 + $0xf]] }
  0x75   : > { %3646 = sst [smem:[#allocation38_spill]] %s2275_s6  ;;  %s2295_s6 = sld [smem:[#allocation4 + $0x16]] }
  0x76   : > { %3647 = sst [smem:[#allocation39_spill]] %s2277_s19  ;;  %s2297_s19 = sld [smem:[#allocation4 + $0x1d]] }
  0x77   : > { %3648 = sst [smem:[#allocation40_spill]] %s2279_s13  ;;  %s2299_s13 = sld [smem:[#allocation4 + $0x24]] }
  0x78   : > { %342 = vrot.lane.b32.xlu1 %v310_v14, %s1900_s27  ;;  %338 = vrot.lane.b32.xlu0 %v310_v14, %s1901_s28  ;;  %3649 = sst [smem:[#allocation41_spill]] %s2281_s23  ;;  %s2301_s23 = sld [smem:[#allocation4 + $0x2b]] }
  0x79   : > { %3650 = sst [smem:[#allocation42_spill]] %s2283_s11  ;;  %s2303_s11 = sld [smem:[#allocation4 + $0xb]] }
  0x7a   : > { %3651 = sst [smem:[#allocation43_spill]] %s2285_s10  ;;  %s2305_s10 = sld [smem:[#allocation4 + $0x12]] }
  0x7b   : > { %3652 = sst [smem:[#allocation44_spill]] %s2287_s18  ;;  %s2332_s20 = sld [smem:[#allocation4 + $0x28]] }
  0x7c   : > { %351 = vrot.lane.b32.xlu1 %v311_v20, %s1897_s24  ;;  %347 = vrot.lane.b32.xlu0 %v311_v20, %s1895_s17  ;;  %3653 = sst [smem:[#allocation45_spill]] %s2289_s12  ;;  %s2307_s12 = sld [smem:[#allocation4 + $0x19]] }
  0x7d   : > { %3654 = sst [smem:[#allocation46_spill]] %s2291_s16  ;;  %s2467_s9 = sld [smem:[#allocation4 + $0x36]] }
  0x7e   : > { %3655 = sst [smem:[#allocation47_spill]] %s2293_s2  ;;  %s2311_s2 = sld [smem:[#allocation4 + $0x20]] }
  0x7f   : > { %3656 = sst [smem:[#allocation48_spill]] %s2295_s6  ;;  %s2313_s6 = sld [smem:[#allocation4 + $0x27]] }
  0x80   : > { %359 = vrot.lane.b32.xlu1 %v311_v20, %s1896_s22  ;;  %355 = vrot.lane.b32.xlu0 %v311_v20, %s1894_s15  ;;  %3657 = sst [smem:[#allocation49_spill]] %s2297_s19  ;;  %s2508_s18 = sld [smem:[#allocation4 + $0x5e]] }
  0x81   : > { %3658 = sst [smem:[#allocation50_spill]] %s2299_s13  ;;  %s3789_s19 = sld [smem:[#allocation46_spill]] }
  0x82   : > { %3659 = sst [smem:[#allocation51_spill]] %s2301_s23  ;;  %s3797_s16 = sld [smem:[#allocation40_spill]] }
  0x83   : > { %3660 = sst [smem:[#allocation52_spill]] %s2303_s11  ;;  %s2316_s23 = sld [smem:[#allocation4 + $0x2e]] }
  0x84   : > { %367 = vrot.lane.b32.xlu1 %v311_v20, %s1898_s25  ;;  %363 = vrot.lane.b32.xlu0 %v311_v20, %s1899_s26  ;;  %3661 = sst [smem:[#allocation53_spill]] %s2305_s10  ;;  %s2318_s11 = sld [smem:[#allocation4 + $0xc]] }
  0x85   : > { %3662 = sst [smem:[#allocation54_spill]] %s2307_s12  ;;  %s2587_s12 = sld [smem:[#allocation4 + $0x4c]] }
  0x86   : > { %3663 = sst [smem:[#allocation55_spill]] %s2311_s2  ;;  %s2322_s2 = sld [smem:[#allocation4 + $0x13]] }
  0x87   : > { %3664 = sst [smem:[#allocation56_spill]] %s2313_s6  ;;  %s2324_s6 = sld [smem:[#allocation4 + $0x1a]] }
  0x88   : > { %375 = vrot.lane.b32.xlu1 %v311_v20, %s1900_s27  ;;  %371 = vrot.lane.b32.xlu0 %v311_v20, %s1901_s28  ;;  %3669 = sst [smem:[#allocation61_spill]] %s2330_s14  ;;  %s2441_s14 = sld [smem:[#allocation4 + $0x22]] }
  0x89   : > { %3665 = sst [smem:[#allocation57_spill]] %s2316_s23  ;;  %s3808_s10 = sld [smem:[#allocation44_spill]] }
  0x8a   : > { %3666 = sst [smem:[#allocation58_spill]] %s2318_s11  ;;  %s2554_s23 = sld [smem:[#allocation4 + $0x44]] }
  0x8b   : > { %3670 = sst [smem:[#allocation62_spill]] %s2332_s20  ;;  %s2414_s20 = sld [smem:[#allocation4 + $0x35]] }
  0x8c   : > { %447 = vrot.lane.b32.xlu1 %v302_v27, %s1897_s24  ;;  %443 = vrot.lane.b32.xlu0 %v302_v27, %s1895_s17  ;;  %3667 = sst [smem:[#allocation59_spill]] %s2322_s2  ;;  %s2568_s11 = sld [smem:[#allocation4 + $0x59]] }
  0x8d   : > { %3668 = sst [smem:[#allocation60_spill]] %s2324_s6  ;;  %s3799_s6 = sld [smem:[#allocation41_spill]] }
  0x8e   : > { %3697 = sst [smem:[#allocation81_spill]] %s2441_s14  ;;  %s2510_s14 = sld [smem:[#allocation4 + $0x37]] }
  0x8f   : > { %3708 = sst [smem:[#allocation88_spill]] %s2467_s9  ;;  %s3756_s13 = sld [smem:[#allocation81_spill]] }
  0x90   : > { %455 = vrot.lane.b32.xlu1 %v302_v27, %s1896_s22  ;;  %451 = vrot.lane.b32.xlu0 %v302_v27, %s1894_s15  ;;  %3722 = sst [smem:[#allocation97_spill]] %s2508_s18  ;;  %s3807_s2 = sld [smem:[#allocation43_spill]] }
  0x91   : > { %3688 = sst [smem:[#allocation76_spill]] %s2414_s20  ;;  %s2530_s20 = sld [smem:[#allocation4 + $0x4a]] }
  0x92   : > { %3745 = sst [smem:[#allocation108_spill]] %s2554_s23  ;;  %s3816_s18 = sld [smem:[#allocation47_spill]] }
  0x93   : > { %3754 = sst [smem:[#allocation111_spill]] %s2568_s11  ;;  %s3779_s11 = sld [smem:[#allocation31_spill]] }
  0x94   : > { %463 = vrot.lane.b32.xlu1 %v302_v27, %s1898_s25  ;;  %459 = vrot.lane.b32.xlu0 %v302_v27, %s1899_s26  ;;  %3723 = sst [smem:[#allocation98_spill]] %s2510_s14  ;;  %s2578_s14 = sld [smem:[#allocation4 + $0x3e]] }
  0x95   : > { %3760 = sst [smem:[#allocation114_spill]] %s2587_s12  ;;  %s3794_s12 = sld [smem:[#allocation45_spill]] }
  0x96   : > { %s3841_s23 = sld [smem:[#allocation57_spill]]  ;;  %s3844_s9 = sld [smem:[#allocation61_spill]] }
  0x97   : > { %3731 = sst [smem:[#allocation103_spill]] %s2530_s20  ;;  %s2580_s20 = sld [smem:[#allocation4 + $0x45]] }
  0x98   : > { %471 = vrot.lane.b32.xlu1 %v302_v27, %s1900_s27  ;;  %467 = vrot.lane.b32.xlu0 %v302_v27, %s1901_s28 }
  0x9a   : > { %3757 = sst [smem:[#allocation81_spill]] %s2578_s14  ;;  %s3795_s14 = sld [smem:[#allocation39_spill]] }
  0x9c   : > { %480 = vrot.lane.b32.xlu1 %v309_v32, %s1897_s24  ;;  %476 = vrot.lane.b32.xlu0 %v309_v32, %s1895_s17  ;;  %s2227_s17 = sld [smem:[#allocation4 + $0x15]]  ;;  %s2231_s24 = sld [smem:[#allocation4 + $0x23]] }
  0x9d   : > { %3758 = sst [smem:[#allocation113_spill]] %s2580_s20  ;;  %s3782_s20 = sld [smem:[#allocation33_spill]] }
  0xa0   : > { %488 = vrot.lane.b32.xlu1 %v309_v32, %s1896_s22  ;;  %484 = vrot.lane.b32.xlu0 %v309_v32, %s1894_s15  ;;  %s2225_s15 = sld [smem:[#allocation4 + $0xe]]  ;;  %s2229_s22 = sld [smem:[#allocation4 + $0x1c]] }
  0xa2   : > { %v720_v16 = vstv %s2227_s17  ;;  %v818_v19 = vstv %s2231_s24  ;;  %s2342_s17 = sld [smem:[#allocation4 + $0x9]]  ;;  %s2351_s24 = sld [smem:[#allocation4 + $0x17]] }
  0xa4   : > { %496 = vrot.lane.b32.xlu1 %v309_v32, %s1898_s25  ;;  %492 = vrot.lane.b32.xlu0 %v309_v32, %s1899_s26  ;;  %s2233_s25 = sld [smem:[#allocation4 + $0x2a]]  ;;  %s2235_s26 = sld [smem:[#allocation4 + $0x31]] }
  0xa6   : > { %v671_v15 = vstv %s2225_s15  ;;  %v769_v17 = vstv %s2229_s22  ;;  %s2340_s15 = sld [smem:[#allocation4 + $0x2f]]  ;;  %s2349_s22 = sld [smem:[#allocation4 + $0x10]] }
  0xa8   : > { %504 = vrot.lane.b32.xlu1 %v309_v32, %s1900_s27  ;;  %500 = vrot.lane.b32.xlu0 %v309_v32, %s1901_s28  ;;  %s2237_s27 = sld [smem:[#allocation4 + $0x38]]  ;;  %s2239_s28 = sld [smem:[#allocation4 + $0x3f]] }
  0xa9   : > { %3672 = sst [smem:[#allocation64_spill]] %s2342_s17  ;;  %s2362_s17 = sld [smem:[#allocation4 + $0x25]] }
  0xaa   : > { %v867_v21 = vstv %s2233_s25  ;;  %v916_v24 = vstv %s2235_s26  ;;  %3674 = sst [smem:[#allocation66_spill]] %s2351_s24  ;;  %s2360_s25 = sld [smem:[#allocation4 + $0x1e]] }
  0xab   : > { %s2372_s24 = sld [smem:[#allocation4 + $0x2c]]  ;;  %s2570_s26 = sld [smem:[#allocation4 + $0x60]] }
  0xac   : > { %3671 = sst [smem:[#allocation63_spill]] %s2340_s15  ;;  %s2412_s15 = sld [smem:[#allocation4 + $0x2d]] }
  0xad   : > { %3673 = sst [smem:[#allocation65_spill]] %s2349_s22  ;;  %s2374_s22 = sld [smem:[#allocation4 + $0xa]] }
  0xae   : > { %v965_v25 = vstv %s2237_s27  ;;  %v1014_v26 = vstv %s2239_s28  ;;  %s2492_s27 = sld [smem:[#allocation4 + $0x50]]  ;;  %s2552_s28 = sld [smem:[#allocation4 + $0x3d]] }
  0xaf   : > { %3676 = sst [smem:[#allocation68_spill]] %s2362_s17  ;;  %s3685_s17 = sld [smem:[#allocation33_spill]] }
  0xb0   : > { %3675 = sst [smem:[#allocation67_spill]] %s2360_s25  ;;  %s2456_s25 = sld [smem:[#allocation4 + $0x30]] }
  0xb1   : > { %3677 = sst [smem:[#allocation69_spill]] %s2372_s24  ;;  %s2402_s24 = sld [smem:[#allocation4 + $0x26]] }
  0xb2   : > { %3687 = sst [smem:[#allocation75_spill]] %s2412_s15  ;;  %s3695_s15 = sld [smem:[#allocation37_spill]] }
  0xb3   : > { %3678 = sst [smem:[#allocation70_spill]] %s2374_s22  ;;  %s2400_s22 = sld [smem:[#allocation4 + $0x1f]] }
  0xb4   : > { %3716 = sst [smem:[#allocation93_spill]] %s2492_s27  ;;  %s3838_s27 = sld [smem:[#allocation56_spill]] }
  0xb5   : > { %3743 = sst [smem:[#allocation107_spill]] %s2552_s28  ;;  %s3843_s28 = sld [smem:[#allocation60_spill]] }
  0xb6   : > { %3703 = sst [smem:[#allocation85_spill]] %s2456_s25  ;;  %s3804_s25 = sld [smem:[#allocation42_spill]] }
  0xb7   : > { %3682 = sst [smem:[#allocation74_spill]] %s2402_s24  ;;  %s3696_s24 = sld [smem:[#allocation38_spill]] }
  0xb8   : > { %3755 = sst [smem:[#allocation112_spill]] %s2570_s26  ;;  %s3780_s26 = sld [smem:[#allocation32_spill]] }
  0xb9   : > { %3681 = sst [smem:[#allocation73_spill]] %s2400_s22  ;;  %s2439_s22 = sld [smem:[#allocation4 + $0x1b]] }
  0xde   : > { %v323_v33 = vpop.permute.xlu1 %322  ;;  %v314_v34 = vpop.permute.xlu0 %313 }
  0xdf   : > { %325 = vst.msk [vmem:[#allocation2 + $0x5] sm:$0x1] %vm316_vm1, %v323_v33  ;;  %317 = vst.msk [vmem:[#allocation2 + $0x3] sm:$0x1] %vm316_vm1, %v314_v34 }
  0xe2   : > { %v327_v35 = vpop.permute.xlu1 %326  ;;  %v319_v36 = vpop.permute.xlu0 %318 }
  0xe3   : > { %329 = vst.msk [vmem:[#allocation2 + $0x6] sm:$0x1] %vm316_vm1, %v327_v35  ;;  %321 = vst.msk [vmem:[#allocation2 + $0x4] sm:$0x1] %vm316_vm1, %v319_v36 }
  0xe6   : > { %v335_v37 = vpop.permute.xlu1 %334  ;;  %v331_v38 = vpop.permute.xlu0 %330 }
  0xe7   : > { %337 = vst.msk [vmem:[#allocation2 + $0x8] sm:$0x1] %vm316_vm1, %v335_v37  ;;  %333 = vst.msk [vmem:[#allocation2 + $0x7] sm:$0x1] %vm316_vm1, %v331_v38 }
  0xea   : > { %v343_v39 = vpop.permute.xlu1 %342  ;;  %v339_v40 = vpop.permute.xlu0 %338 }
  0xeb   : > { %345 = vst.msk [vmem:[#allocation2 + $0xa] sm:$0x1] %vm316_vm1, %v343_v39  ;;  %341 = vst.msk [vmem:[#allocation2 + $0x9] sm:$0x1] %vm316_vm1, %v339_v40 }
  0xee   : > { %v2138_v41 = vld [vmem:[#allocation2] sm:$0xff]  ;;  %v352_v42 = vpop.permute.xlu1 %351  ;;  %v348_v43 = vpop.permute.xlu0 %347 }
  0xef   : > { %354 = vst.msk [vmem:[#allocation2 + $0xc] sm:$0x1] %vm316_vm1, %v352_v42  ;;  %350 = vst.msk [vmem:[#allocation2 + $0xb] sm:$0x1] %vm316_vm1, %v348_v43  ;;  %392 = vrot.lane.b32.xlu1 %v2138_v41, %s1902_s29  ;;  %v620_v9 = vld [vmem:[#allocation2 + $0x1] sm:$0xff]  ;;  %v2354_v34 = vmul.f32 %v573_v10, %v2138_v41 }
  0xf0   : > { %v2356_v35 = vmul.f32 %v622_v11, %v620_v9 }
  0xf2   : > { %v360_v44 = vpop.permute.xlu1 %359  ;;  %v356_v45 = vpop.permute.xlu0 %355  ;;  %v669_v12 = vld [vmem:[#allocation2 + $0x2] sm:$0xff] }
  0xf3   : > { %362 = vst.msk [vmem:[#allocation2 + $0xe] sm:$0x1] %vm316_vm1, %v360_v44  ;;  %358 = vst.msk [vmem:[#allocation2 + $0xd] sm:$0x1] %vm316_vm1, %v356_v45  ;;  %v718_v13 = vld [vmem:[#allocation2 + $0x3] sm:$0xff]  ;;  %v2364_v40 = vmul.f32 %v671_v15, %v669_v12 }
  0xf4   : > { %v2366_v42 = vmul.f32 %v720_v16, %v718_v13 }
  0xf6   : > { %v368_v46 = vpop.permute.xlu1 %367  ;;  %v364_v47 = vpop.permute.xlu0 %363  ;;  %v767_v14 = vld [vmem:[#allocation2 + $0x4] sm:$0xff] }
  0xf7   : > { %370 = vst.msk [vmem:[#allocation2 + $0x10] sm:$0x1] %vm316_vm1, %v368_v46  ;;  %366 = vst.msk [vmem:[#allocation2 + $0xf] sm:$0x1] %vm316_vm1, %v364_v47  ;;  %v816_v18 = vld [vmem:[#allocation2 + $0x5] sm:$0xff]  ;;  %v2368_v43 = vmul.f32 %v769_v17, %v767_v14 }
  0xf8   : > { %v2370_v44 = vmul.f32 %v818_v19, %v816_v18 }
  0xfa   : > { %v376_v48 = vpop.permute.xlu1 %375  ;;  %v372_v49 = vpop.permute.xlu0 %371  ;;  %v865_v20 = vld [vmem:[#allocation2 + $0x6] sm:$0xff] }
  0xfb   : > { %378 = vst.msk [vmem:[#allocation2 + $0x12] sm:$0x1] %vm316_vm1, %v376_v48  ;;  %374 = vst.msk [vmem:[#allocation2 + $0x11] sm:$0x1] %vm316_vm1, %v372_v49  ;;  %v2376_v45 = vmul.f32 %v867_v21, %v865_v20  ;;  %v3572_v20 = vstv %s3695_s15  ;;  %s2482_s15 = sld [smem:[#allocation4 + $0x49]] }
  0xfe   : > { %v448_v50 = vpop.permute.xlu1 %447  ;;  %v444_v51 = vpop.permute.xlu0 %443  ;;  %v2185_v4 = vld [vmem:[#allocation2 + $0x8] sm:$0xff] }
  0xff   : > { %450 = vst.msk [vmem:[#allocation2 + $0xac] sm:$0x1] %vm316_vm1, %v448_v50  ;;  %446 = vst.msk [vmem:[#allocation2 + $0xab] sm:$0x1] %vm316_vm1, %v444_v51  ;;  %v621_v22 = vld [vmem:[#allocation2 + $0x9] sm:$0xff]  ;;  %v2379_v46 = vmul.f32 %v573_v10, %v2185_v4  ;;  %v3586_v10 = vstv %s3685_s17  ;;  %s2494_s17 = sld [smem:[#allocation4 + $0x57]] }
 0x100   : > { %v2381_v47 = vmul.f32 %v622_v11, %v621_v22 }
 0x101   : > { %3714 = sst [smem:[#allocation92_spill]] %s2482_s15 }
 0x102   : > { %v456_v52 = vpop.permute.xlu1 %455  ;;  %v452_v53 = vpop.permute.xlu0 %451  ;;  %v381_v5 = vld [vmem:[#allocation2 + $0x10] sm:$0x3f]  ;;  %s3720_s15 = sld [smem:[#allocation52_spill]] }
 0x103   : > { %458 = vst.msk [vmem:[#allocation2 + $0xae] sm:$0x1] %vm316_vm1, %v456_v52  ;;  %454 = vst.msk [vmem:[#allocation2 + $0xad] sm:$0x1] %vm316_vm1, %v452_v53  ;;  %v670_v23 = vld [vmem:[#allocation2 + $0xa] sm:$0xff] }
 0x104   : > { %v719_v28 = vld [vmem:[#allocation2 + $0xb] sm:$0xff]  ;;  %v2383_v48 = vmul.f32 %v671_v15, %v670_v23 }
 0x105   : > { %v768_v29 = vld [vmem:[#allocation2 + $0xc] sm:$0xff]  ;;  %v2391_v52 = vmul.f32 %v720_v16, %v719_v28  ;;  %3717 = sst [smem:[#allocation94_spill]] %s2494_s17  ;;  %s3818_s17 = sld [smem:[#allocation49_spill]] }
 0x106   : > { %v464_v54 = vpop.permute.xlu1 %463  ;;  %v460_v55 = vpop.permute.xlu0 %459  ;;  %v817_v36 = vld [vmem:[#allocation2 + $0xd] sm:$0xff]  ;;  %v2393_v53 = vmul.f32 %v769_v17, %v768_v29 }
 0x107   : > { %466 = vst.msk [vmem:[#allocation2 + $0xb0] sm:$0x1] %vm316_vm1, %v464_v54  ;;  %462 = vst.msk [vmem:[#allocation2 + $0xaf] sm:$0x1] %vm316_vm1, %v460_v55  ;;  %v866_v37 = vld [vmem:[#allocation2 + $0xe] sm:$0xff]  ;;  %v2395_v54 = vmul.f32 %v818_v19, %v817_v36 }
 0x108   : > { %v2397_v55 = vmul.f32 %v867_v21, %v866_v37  ;;  %v3590_v21 = vstv %s3696_s24  ;;  %s2480_s24 = sld [smem:[#allocation4 + $0x42]] }
 0x10a   : > { %v472_v56 = vpop.permute.xlu1 %471  ;;  %v468_v57 = vpop.permute.xlu0 %467 }
 0x10b   : > { %474 = vst.msk [vmem:[#allocation2 + $0xb2] sm:$0x1] %vm316_vm1, %v472_v56  ;;  %470 = vst.msk [vmem:[#allocation2 + $0xb1] sm:$0x1] %vm316_vm1, %v468_v57 }
 0x10e   : > { %v2158_v58 = vld [vmem:[#allocation2 + $0xa8] sm:$0xff]  ;;  %v481_v59 = vpop.permute.xlu1 %480  ;;  %v477_v60 = vpop.permute.xlu0 %476  ;;  %3713 = sst [smem:[#allocation91_spill]] %s2480_s24  ;;  %s3848_s24 = sld [smem:[#allocation63_spill]] }
 0x10f   : > { %483 = vst.msk [vmem:[#allocation2 + $0xb4] sm:$0x1] %vm316_vm1, %v481_v59  ;;  %479 = vst.msk [vmem:[#allocation2 + $0xb3] sm:$0x1] %vm316_vm1, %v477_v60  ;;  %511 = vrot.lane.b32.xlu0 %v2158_v58, %s1903_s30  ;;  %v2407_v56 = vmul.f32 %v916_v24, %v2158_v58  ;;  %v930_v60 = vstv %s2253_s21  ;;  %s2465_s21 = sld [smem:[#allocation4 + $0x3b]] }
 0x112   : > { %v489_v61 = vpop.permute.xlu1 %488  ;;  %v485_v62 = vpop.permute.xlu0 %484  ;;  %v1012_v49 = vld [vmem:[#allocation2 + $0xaa] sm:$0xff] }
 0x113   : > { %491 = vst.msk [vmem:[#allocation2 + $0xb6] sm:$0x1] %vm316_vm1, %v489_v61  ;;  %487 = vst.msk [vmem:[#allocation2 + $0xb5] sm:$0x1] %vm316_vm1, %v485_v62  ;;  %521 = vrot.lane.b32.xlu0 %v2158_v58, %s1902_s29  ;;  %v1061_v50 = vld [vmem:[#allocation2 + $0xab] sm:$0xff]  ;;  %v3585_v61 = vstv %s2255_s0  ;;  %v580_v62 = vstv %s2257_s1  ;;  %s2429_s0 = sld [smem:[#allocation4 + $0xd]] }
 0x114   : > { %s2431_s1 = sld [smem:[#allocation4 + $0x14]] }
 0x115   : > { %3707 = sst [smem:[#allocation87_spill]] %s2465_s21  ;;  %s3773_s21 = sld [smem:[#allocation37_spill]] }
 0x116   : > { %v497_v63 = vpop.permute.xlu1 %496  ;;  %v493_v0 = vpop.permute.xlu0 %492  ;;  %v1110_v57 = vld [vmem:[#allocation2 + $0xac] sm:$0xff] }
 0x117   : > { %499 = vst.msk [vmem:[#allocation2 + $0xb8] sm:$0x1] %vm316_vm1, %v497_v63  ;;  %495 = vst.msk [vmem:[#allocation2 + $0xb7] sm:$0x1] %vm316_vm1, %v493_v0  ;;  %531 = vrot.lane.b32.xlu0 %v2158_v58, %s1904_s3  ;;  %v1159_v59 = vld [vmem:[#allocation2 + $0xad] sm:$0xff] }
 0x119   : > { %3693 = sst [smem:[#allocation80_spill]] %s2429_s0  ;;  %s3775_s0 = sld [smem:[#allocation38_spill]] }
 0x11a   : > { %v505_v1 = vpop.permute.xlu1 %504  ;;  %v501_v2 = vpop.permute.xlu0 %500 }
 0x11b   : > { %507 = vst.msk [vmem:[#allocation2 + $0xba] sm:$0x1] %vm316_vm1, %v505_v1  ;;  %503 = vst.msk [vmem:[#allocation2 + $0xb9] sm:$0x1] %vm316_vm1, %v501_v2  ;;  %382 = vrot.lane.b32.xlu0 %v2138_v41, %s1903_s30  ;;  %v1208_v1 = vld [vmem:[#allocation2 + $0xae] sm:$0xff]  ;;  %v601_v2 = vstv %s2259_s5  ;;  %s2522_s5 = sld [smem:[#allocation4 + $0x3c]] }
 0x11e   : > { %v2176_v3 = vld [vmem:[#allocation2 + $0xb0] sm:$0xff] }
 0x11f   : > { %513 = vrot.lane.b32.xlu1 %v2176_v3, %s1903_s30  ;;  %412 = vrot.lane.b32.xlu0 %v2138_v41, %s1905_s4  ;;  %v2472_v22 = vmul.f32 %v916_v24, %v2176_v3 }
 0x121   : > { %3709 = vst [vmem:[#allocation89_spill] sm:$0xff] %v2472_v22  ;;  %3728 = sst [smem:[#allocation101_spill]] %s2522_s5  ;;  %s2562_s5 = sld [smem:[#allocation4 + $0x52]] }
 0x122   : > { %v510_v6 = vld [vmem:[#allocation2 + $0xb8] sm:$0x3f] }
 0x123   : > { %523 = vrot.lane.b32.xlu1 %v2176_v3, %s1902_s29  ;;  %422 = vrot.lane.b32.xlu0 %v2138_v41, %s1906_s7  ;;  %v1013_v17 = vld [vmem:[#allocation2 + $0xb2] sm:$0xff] }
 0x124   : > { %v1062_v18 = vld [vmem:[#allocation2 + $0xb3] sm:$0xff] }
 0x125   : > { %v1111_v28 = vld [vmem:[#allocation2 + $0xb4] sm:$0xff] }
 0x126   : > { %v1160_v29 = vld [vmem:[#allocation2 + $0xb5] sm:$0xff] }
 0x127   : > { %384 = vrot.lane.b32.xlu1 %v2185_v4, %s1903_s30  ;;  %402 = vrot.lane.b32.xlu0 %v2138_v41, %s1904_s3  ;;  %3750 = sst [smem:[#allocation110_spill]] %s2562_s5  ;;  %s3851_s5 = sld [smem:[#allocation64_spill]] }
 0x12b   : > { %414 = vrot.lane.b32.xlu1 %v2185_v4, %s1905_s4  ;;  %432 = vrot.lane.b32.xlu0 %v2138_v41, %s1907_s8  ;;  %v963_v41 = vld [vmem:[#allocation2 + $0xa9] sm:$0xff] }
 0x12c   : > { %v2418_v63 = vmul.f32 %v965_v25, %v963_v41 }
 0x12e   : > { %3689 = vst [vmem:[#allocation77_spill] sm:$0xff] %v2418_v63 }
 0x12f   : > { %424 = vrot.lane.b32.xlu1 %v2185_v4, %s1906_s7  ;;  %386 = vrot.lane.b32.xlu0 %v381_v5, %s1903_s30 }
 0x133   : > { %396 = vrot.lane.b32.xlu1 %v381_v5, %s1902_s29  ;;  %394 = vrot.lane.b32.xlu0 %v2185_v4, %s1902_s29 }
 0x137   : > { %404 = vrot.lane.b32.xlu1 %v2185_v4, %s1904_s3  ;;  %406 = vrot.lane.b32.xlu0 %v381_v5, %s1904_s3 }
 0x13b   : > { %434 = vrot.lane.b32.xlu1 %v2185_v4, %s1907_s8  ;;  %426 = vrot.lane.b32.xlu0 %v381_v5, %s1906_s7  ;;  %v964_v4 = vld [vmem:[#allocation2 + $0xb1] sm:$0xff] }
 0x13c   : > { %v2476_v23 = vmul.f32 %v965_v25, %v964_v4 }
 0x13e   : > { %3710 = vst [vmem:[#allocation90_spill] sm:$0xff] %v2476_v23 }
 0x13f   : > { %416 = vrot.lane.b32.xlu1 %v381_v5, %s1905_s4  ;;  %541 = vrot.lane.b32.xlu0 %v2158_v58, %s1905_s4 }
 0x143   : > { %436 = vrot.lane.b32.xlu1 %v381_v5, %s1907_s8  ;;  %515 = vrot.lane.b32.xlu0 %v510_v6, %s1903_s30  ;;  %s2243_s30 = sld [smem:[#allocation4 + $0x4d]] }
 0x147   : > { %533 = vrot.lane.b32.xlu1 %v2176_v3, %s1904_s3  ;;  %553 = vrot.lane.b32.xlu0 %v2176_v3, %s1906_s7 }
 0x149   : > { %v1112_v31 = vstv %s2243_s30  ;;  %s2597_s30 = sld [smem:[#allocation4 + $0x61]] }
 0x14a   : > { %v2445_v12 = vmul.f32 %v1112_v31, %v1110_v57  ;;  %v2498_v57 = vmul.f32 %v1014_v26, %v1013_v17 }
 0x14b   : > { %543 = vrot.lane.b32.xlu1 %v2176_v3, %s1905_s4  ;;  %563 = vrot.lane.b32.xlu0 %v2176_v3, %s1907_s8 }
 0x14c   : > { %3698 = vst [vmem:[#allocation82_spill] sm:$0xff] %v2445_v12  ;;  %3719 = vst [vmem:[#allocation95_spill] sm:$0xff] %v2498_v57  ;;  %v3819_v57 = vstv %s3804_s25  ;;  %s3829_s25 = sld [smem:[#allocation58_spill]] }
 0x14f   : > { %551 = vrot.lane.b32.xlu1 %v2158_v58, %s1906_s7  ;;  %535 = vrot.lane.b32.xlu0 %v510_v6, %s1904_s3  ;;  %s2245_s3 = sld [smem:[#allocation4 + $0x54]]  ;;  %3766 = sst [smem:[#allocation116_spill]] %s2597_s30 }
 0x150   : > { %s3785_s30 = sld [smem:[#allocation52_spill]] }
 0x153   : > { %561 = vrot.lane.b32.xlu1 %v2158_v58, %s1907_s8  ;;  %555 = vrot.lane.b32.xlu0 %v510_v6, %s1906_s7  ;;  %s2249_s7 = sld [smem:[#allocation4 + $0x2]]  ;;  %v2422_v58 = vmul.f32 %v1014_v26, %v1012_v49  ;;  %v2514_v26 = vmul.f32 %v1112_v31, %v1111_v28  ;;  %v3589_v49 = vstv %s3720_s15  ;;  %s2544_s15 = sld [smem:[#allocation4 + $0x5f]] }
 0x155   : > { %v1161_v32 = vstv %s2245_s3  ;;  %3690 = vst [vmem:[#allocation78_spill] sm:$0xff] %v2422_v58  ;;  %3725 = vst [vmem:[#allocation99_spill] sm:$0xff] %v2514_v26  ;;  %s2532_s3 = sld [smem:[#allocation4 + $0x51]]  ;;  %v3852_v58 = vstv %s3841_s23 }
 0x156   : > { %v2449_v13 = vmul.f32 %v1161_v32, %v1159_v59 }
 0x157   : > { %525 = vrot.lane.b32.xlu1 %v510_v6, %s1902_s29  ;;  %s2241_s29 = sld [smem:[#allocation4 + $0x46]] }
 0x158   : > { %3699 = vst [vmem:[#allocation83_spill] sm:$0xff] %v2449_v13 }
 0x159   : > { %3633 = sst [smem:[#allocation25_spill]] %s2249_s7  ;;  %v3569_v38 = vstv %s2249_s7  ;;  %s2389_s7 = sld [smem:[#allocation4 + $0x18]] }
 0x15a   : > { %3739 = sst [smem:[#allocation106_spill]] %s2544_s15  ;;  %s2589_s15 = sld [smem:[#allocation4 + $0x53]] }
 0x15b   : > { %545 = vrot.lane.b32.xlu1 %v510_v6, %s1905_s4  ;;  %s2247_s4 = sld [smem:[#allocation4 + $0x5b]]  ;;  %3732 = sst [smem:[#allocation104_spill]] %s2532_s3 }
 0x15c   : > { %s3846_s3 = sld [smem:[#allocation62_spill]] }
 0x15d   : > { %v1063_v30 = vstv %s2241_s29  ;;  %s2595_s29 = sld [smem:[#allocation4 + $0x5a]] }
 0x15e   : > { %v2426_v0 = vmul.f32 %v1063_v30, %v1061_v50  ;;  %v2502_v59 = vmul.f32 %v1063_v30, %v1062_v18  ;;  %v2518_v30 = vmul.f32 %v1161_v32, %v1160_v29 }
 0x15f   : > { %565 = vrot.lane.b32.xlu1 %v510_v6, %s1907_s8  ;;  %s2251_s8 = sld [smem:[#allocation4 + $0x32]]  ;;  %3680 = sst [smem:[#allocation72_spill]] %s2389_s7 }
 0x160   : > { %s3683_s7 = sld [smem:[#allocation31_spill]]  ;;  %3691 = vst [vmem:[#allocation79_spill] sm:$0xff] %v2426_v0  ;;  %3721 = vst [vmem:[#allocation96_spill] sm:$0xff] %v2502_v59 }
 0x161   : > { %v2218_v7 = vpop.permute.xlu1 %392  ;;  %3632 = sst [smem:[#allocation24_spill]] %s2247_s4  ;;  %v3527_v33 = vstv %s2247_s4  ;;  %3727 = vst [vmem:[#allocation100_spill] sm:$0xff] %v2518_v30 }
 0x162   : > { %399 = vst [vmem:[#allocation2 + $0x30] sm:$0xff] %v2218_v7  ;;  %v2460_v16 = vmul.f32 %v3527_v33, %v1208_v1  ;;  %s2524_s4 = sld [smem:[#allocation4 + $0x43]]  ;;  %3761 = sst [smem:[#allocation115_spill]] %s2589_s15  ;;  %v2625_v18 = vmul.f32 %v3569_v38, %v2218_v7 }
 0x163   : > { %s3791_s15 = sld [smem:[#allocation35_spill]] }
 0x164   : > { %3704 = vst [vmem:[#allocation86_spill] sm:$0xff] %v2460_v16 }
 0x165   : > { %3634 = sst [smem:[#allocation26_spill]] %s2251_s8  ;;  %v923_v39 = vstv %s2251_s8  ;;  %s2387_s8 = sld [smem:[#allocation4 + $0x11]] }
 0x166   : > { %v3588_v6 = vstv %s3683_s7  ;;  %s2454_s7 = sld [smem:[#allocation4 + $0x29]] }
 0x168   : > { %3729 = sst [smem:[#allocation102_spill]] %s2524_s4  ;;  %s2560_s4 = sld [smem:[#allocation4 + $0x4b]] }
 0x16b   : > { %3679 = sst [smem:[#allocation71_spill]] %s2387_s8  ;;  %s3684_s8 = sld [smem:[#allocation32_spill]] }
 0x16c   : > { %3702 = sst [smem:[#allocation84_spill]] %s2454_s7  ;;  %s3771_s7 = sld [smem:[#allocation25_spill]] }
 0x16e   : > { %3749 = sst [smem:[#allocation109_spill]] %s2560_s4  ;;  %s3793_s4 = sld [smem:[#allocation36_spill]] }
 0x171   : > { %v3587_v9 = vstv %s3684_s8  ;;  %s2542_s8 = sld [smem:[#allocation4 + $0x58]] }
 0x177   : > { %3737 = sst [smem:[#allocation105_spill]] %s2542_s8  ;;  %s3762_s8 = sld [smem:[#allocation101_spill]] }
 0x178   : > { %3764 = sst [smem:[#allocation101_spill]] %s2595_s29  ;;  %s3787_s29 = sld [smem:[#allocation34_spill]] }
 0x181   : > { %v2309_v8 = vpop.permute.xlu0 %511 }
 0x182   : > { %518 = vst [vmem:[#allocation2 + $0xc0] sm:$0xff] %v2309_v8 }
 0x185   : > { %v2338_v27 = vpop.permute.xlu0 %521 }
 0x186   : > { %528 = vst [vmem:[#allocation2 + $0xd8] sm:$0xff] %v2338_v27 }
 0x189   : > { %v2385_v51 = vpop.permute.xlu0 %531 }
 0x18a   : > { %538 = vst [vmem:[#allocation2 + $0xf0] sm:$0xff] %v2385_v51 }
 0x18d   : > { %v2433_v5 = vpop.permute.xlu0 %382 }
 0x18e   : > { %389 = vst [vmem:[#allocation2 + $0x18] sm:$0xff] %v2433_v5 }
 0x191   : > { %v2484_v41 = vpop.permute.xlu1 %513  ;;  %v2486_v3 = vpop.permute.xlu0 %412 }
 0x192   : > { %519 = vst [vmem:[#allocation2 + $0xc8] sm:$0xff] %v2484_v41  ;;  %419 = vst [vmem:[#allocation2 + $0x60] sm:$0xff] %v2486_v3  ;;  %v602_v29 = vmul.f32 %v601_v2, %v2486_v3  ;;  %v2658_v3 = vmul.f32 %v3585_v61, %v2385_v51 }
 0x194   : > { %v604_v17 = vadd.f32 %v602_v29, %v2354_v34 }
 0x195   : > { %v2534_v31 = vpop.permute.xlu1 %523  ;;  %v2536_v32 = vpop.permute.xlu0 %422 }
 0x196   : > { %529 = vst [vmem:[#allocation2 + $0xe0] sm:$0xff] %v2534_v31  ;;  %429 = vst [vmem:[#allocation2 + $0x78] sm:$0xff] %v2536_v32  ;;  %v609_v36 = vmul.f32 %v3572_v20, %v2536_v32  ;;  %v581_v32 = vmul.f32 %v580_v62, %v2433_v5  ;;  %v2648_v20 = vmul.f32 %v923_v39, %v2309_v8 }
 0x197   : > { %v2663_v5 = vmul.f32 %v923_v39, %v2484_v41 }
 0x198   : > { %3781 = vst [vmem:[#allocation117_spill] sm:$0xff] %v2648_v20  ;;  %v2675_v51 = vadd.f32 %v609_v36, %v581_v32 }
 0x199   : > { %v2572_v4 = vpop.permute.xlu1 %384  ;;  %v403_v24 = vpop.permute.xlu0 %402  ;;  %v970_v11 = vld [vmem:[#allocation2 + $0xc1] sm:$0xff]  ;;  %3784 = vst [vmem:[#allocation119_spill] sm:$0xff] %v2663_v5 }
 0x19a   : > { %390 = vst [vmem:[#allocation2 + $0x20] sm:$0xff] %v2572_v4  ;;  %409 = vst [vmem:[#allocation2 + $0x48] sm:$0xff] %v403_v24  ;;  %v1019_v37 = vld [vmem:[#allocation2 + $0xc2] sm:$0xff]  ;;  %v595_v25 = vmul.f32 %v3590_v21, %v403_v24  ;;  %v2667_v8 = vmul.f32 %v3588_v6, %v970_v11  ;;  %v582_v6 = vmul.f32 %v580_v62, %v2572_v4  ;;  %v3803_v21 = vstv %s3793_s4  ;;  %s3817_s4 = sld [smem:[#allocation48_spill]] }
 0x19b   : > { %v1068_v19 = vld [vmem:[#allocation2 + $0xc3] sm:$0xff]  ;;  %v2681_v11 = vmul.f32 %v3587_v9, %v1019_v37  ;;  %v3796_v37 = vstv %s3787_s29  ;;  %v3809_v62 = vstv %s3773_s21  ;;  %s3824_s21 = sld [smem:[#allocation50_spill]] }
 0x19c   : > { %v1117_v24 = vld [vmem:[#allocation2 + $0xc4] sm:$0xff]  ;;  %3786 = vst [vmem:[#allocation120_spill] sm:$0xff] %v2667_v8  ;;  %v2685_v34 = vmul.f32 %v3586_v10, %v1068_v19 }
 0x19d   : > { %v415_v28 = vpop.permute.xlu1 %414  ;;  %v2603_v33 = vpop.permute.xlu0 %432  ;;  %v1166_v1 = vld [vmem:[#allocation2 + $0xc5] sm:$0xff]  ;;  %3790 = vst [vmem:[#allocation122_spill] sm:$0xff] %v2681_v11  ;;  %v977_v29 = vld [vmem:[#allocation2 + $0xd9] sm:$0xff]  ;;  %v2694_v61 = vmul.f32 %v3796_v37, %v1117_v24  ;;  %v3806_v24 = vstv %s3794_s12 }
 0x19e   : > { %420 = vst [vmem:[#allocation2 + $0x68] sm:$0xff] %v415_v28  ;;  %439 = vst [vmem:[#allocation2 + $0x90] sm:$0xff] %v2603_v33  ;;  %v1215_v38 = vld [vmem:[#allocation2 + $0xc6] sm:$0xff]  ;;  %v1075_v36 = vld [vmem:[#allocation2 + $0xdb] sm:$0xff] }
 0x19f   : > { %3792 = vst [vmem:[#allocation123_spill] sm:$0xff] %v2685_v34  ;;  %3798 = vst [vmem:[#allocation124_spill] sm:$0xff] %v2694_v61  ;;  %v1124_v19 = vld [vmem:[#allocation2 + $0xdc] sm:$0xff]  ;;  %v2709_v30 = vmul.f32 %v3803_v21, %v1215_v38 }
 0x1a0   : > { %v1173_v10 = vld [vmem:[#allocation2 + $0xdd] sm:$0xff]  ;;  %v3868_v5 = vstv %s3817_s4 }
 0x1a1   : > { %v425_v14 = vpop.permute.xlu1 %424  ;;  %v387_v15 = vpop.permute.xlu0 %386  ;;  %v627_v50 = vld [vmem:[#allocation2 + $0x19] sm:$0xff]  ;;  %3805 = vst [vmem:[#allocation126_spill] sm:$0xff] %v2709_v30 }
 0x1a2   : > { %430 = vst [vmem:[#allocation2 + $0x80] sm:$0xff] %v425_v14  ;;  %391 = vst [vmem:[#allocation2 + $0x28] sm:$0x3f] %v387_v15  ;;  %v2653_v15 = vmul.f32 %v930_v60, %v2338_v27  ;;  %v2673_v27 = vmul.f32 %v930_v60, %v2534_v31  ;;  %v1026_v60 = vld [vmem:[#allocation2 + $0xda] sm:$0xff]  ;;  %v603_v31 = vmul.f32 %v601_v2, %v415_v28  ;;  %v3800_v28 = vstv %s3789_s19 }
 0x1a3   : > { %v1222_v9 = vld [vmem:[#allocation2 + $0xde] sm:$0xff]  ;;  %v625_v2 = vadd.f32 %v2356_v35, %v595_v25  ;;  %v630_v37 = vmul.f32 %v3806_v24, %v627_v50  ;;  %v610_v4 = vmul.f32 %v3809_v62, %v425_v14  ;;  %v3810_v35 = vstv %s3795_s14  ;;  %s3836_s14 = sld [smem:[#allocation55_spill]] }
 0x1a4   : > { %3783 = vst [vmem:[#allocation118_spill] sm:$0xff] %v2653_v15  ;;  %3788 = vst [vmem:[#allocation121_spill] sm:$0xff] %v2673_v27  ;;  %v676_v16 = vld [vmem:[#allocation2 + $0x1a] sm:$0xff]  ;;  %v2717_v25 = vmul.f32 %v3810_v35, %v977_v29  ;;  %v2729_v14 = vmul.f32 %v3819_v57, %v1124_v19  ;;  %v3821_v29 = vstv %s3807_s2  ;;  %v3830_v19 = vstv %s3817_s4  ;;  %s3834_s2 = sld [smem:[#allocation54_spill]]  ;;  %s3885_s4 = sld [smem:[#allocation69_spill]] }
 0x1a5   : > { %v648_v39 = vld [vmem:[#allocation2 + $0x61] sm:$0xff]  ;;  %v397_v41 = vpop.permute.xlu1 %396  ;;  %v2677_v7 = vpop.permute.xlu0 %394  ;;  %v2733_v62 = vmul.f32 %v3821_v29, %v1173_v10  ;;  %v3831_v29 = vstv %s3818_s17  ;;  %v3858_v15 = vstv %s3846_s3 }
 0x1a6   : > { %v651_v32 = vmul.f32 %v3589_v49, %v648_v39  ;;  %401 = vst [vmem:[#allocation2 + $0x40] sm:$0x3f] %v397_v41  ;;  %400 = vst [vmem:[#allocation2 + $0x38] sm:$0xff] %v2677_v7  ;;  %v616_v39 = vmul.f32 %v3800_v28, %v2603_v33  ;;  %v3801_v41 = vstv %s3791_s15  ;;  %v725_v26 = vld [vmem:[#allocation2 + $0x1b] sm:$0xff]  ;;  %v3812_v33 = vstv %s3797_s16  ;;  %s3827_s16 = sld [smem:[#allocation53_spill]]  ;;  %s3856_s15 = sld [smem:[#allocation65_spill]] }
 0x1a7   : > { %v2705_v49 = vmul.f32 %v3801_v41, %v1166_v1  ;;  %v774_v59 = vld [vmem:[#allocation2 + $0x1c] sm:$0xff]  ;;  %3811 = vst [vmem:[#allocation127_spill] sm:$0xff] %v2717_v25  ;;  %v2721_v28 = vmul.f32 %v3812_v33, %v1026_v60  ;;  %v3814_v1 = vstv %s3799_s6  ;;  %3820 = vst [vmem:[#allocation130_spill] sm:$0xff] %v2729_v14  ;;  %v3823_v60 = vstv %s3808_s10  ;;  %s3826_s6 = sld [smem:[#allocation51_spill]] }
 0x1a8   : > { %v2725_v41 = vmul.f32 %v3814_v1, %v1075_v36  ;;  %v823_v38 = vld [vmem:[#allocation2 + $0x1d] sm:$0xff]  ;;  %v653_v50 = vadd.f32 %v651_v32, %v625_v2  ;;  %3822 = vst [vmem:[#allocation131_spill] sm:$0xff] %v2733_v62  ;;  %v2737_v35 = vmul.f32 %v3823_v60, %v1222_v9  ;;  %v2740_v36 = vadd.f32 %v603_v31, %v2379_v46  ;;  %s3832_s10 = sld [smem:[#allocation59_spill]]  ;;  %v893_v46 = vld [vmem:[#allocation2 + $0x66] sm:$0xff] }
 0x1a9   : > { %3802 = vst [vmem:[#allocation125_spill] sm:$0xff] %v2705_v49  ;;  %3813 = vst [vmem:[#allocation128_spill] sm:$0xff] %v2721_v28  ;;  %v872_v21 = vld [vmem:[#allocation2 + $0x1e] sm:$0xff]  ;;  %v405_v30 = vpop.permute.xlu1 %404  ;;  %v407_v34 = vpop.permute.xlu0 %406  ;;  %v3828_v2 = vstv %s3816_s18  ;;  %v2746_v10 = vmul.f32 %v3830_v19, %v725_v26  ;;  %v2750_v9 = vmul.f32 %v3831_v29, %v774_v59  ;;  %v2753_v31 = vadd.f32 %v616_v39, %v2625_v18 }
 0x1aa   : > { %3815 = vst [vmem:[#allocation129_spill] sm:$0xff] %v2725_v41  ;;  %v697_v24 = vld [vmem:[#allocation2 + $0x62] sm:$0xff]  ;;  %3825 = vst [vmem:[#allocation132_spill] sm:$0xff] %v2737_v35  ;;  %v655_v1 = vld [vmem:[#allocation2 + $0x79] sm:$0xff]  ;;  %v679_v57 = vmul.f32 %v3828_v2, %v676_v16  ;;  %v632_v14 = vadd.f32 %v630_v37, %v604_v17  ;;  %v3833_v62 = vstv %s3824_s21  ;;  %v612_v26 = vadd.f32 %v610_v4, %v582_v6 }
 0x1ab   : > { %v746_v33 = vld [vmem:[#allocation2 + $0x63] sm:$0xff]  ;;  %v704_v32 = vld [vmem:[#allocation2 + $0x7a] sm:$0xff]  ;;  %410 = vst [vmem:[#allocation2 + $0x50] sm:$0xff] %v405_v30  ;;  %411 = vst [vmem:[#allocation2 + $0x58] sm:$0x3f] %v407_v34  ;;  %v2757_v34 = vmul.f32 %v3833_v62, %v823_v38  ;;  %v3840_v18 = vstv %s3829_s25  ;;  %v3845_v13 = vstv %s3834_s2  ;;  %v3863_v28 = vstv %s3775_s0  ;;  %s3874_s0 = sld [smem:[#allocation67_spill]] }
 0x1ac   : > { %v795_v60 = vld [vmem:[#allocation2 + $0x64] sm:$0xff]  ;;  %v753_v59 = vld [vmem:[#allocation2 + $0x7b] sm:$0xff]  ;;  %v3839_v29 = vstv %s3827_s16  ;;  %v658_v39 = vmul.f32 %v3840_v18, %v655_v1  ;;  %v681_v17 = vadd.f32 %v679_v57, %v653_v50  ;;  %v2773_v61 = vmul.f32 %v3845_v13, %v746_v33 }
 0x1ad   : > { %v844_v35 = vld [vmem:[#allocation2 + $0x65] sm:$0xff]  ;;  %v3835_v23 = vstv %s3826_s6  ;;  %v802_v2 = vld [vmem:[#allocation2 + $0x7c] sm:$0xff]  ;;  %v2765_v49 = vmul.f32 %v3839_v29, %v697_v24  ;;  %v435_v6 = vpop.permute.xlu1 %434  ;;  %v427_v4 = vpop.permute.xlu0 %426  ;;  %v3847_v24 = vstv %s3836_s14  ;;  %v3849_v1 = vstv %s3838_s27 }
 0x1ae   : > { %v2761_v16 = vmul.f32 %v3835_v23, %v872_v21  ;;  %v628_v19 = vld [vmem:[#allocation2 + $0x21] sm:$0xff]  ;;  %v3842_v37 = vstv %s3832_s10  ;;  %v634_v21 = vld [vmem:[#allocation2 + $0x31] sm:$0xff]  ;;  %v2777_v29 = vmul.f32 %v3847_v24, %v795_v60  ;;  %v2781_v50 = vmul.f32 %v3849_v1, %v844_v35  ;;  %v635_v18 = vld [vmem:[#allocation2 + $0x39] sm:$0xff]  ;;  %440 = vst [vmem:[#allocation2 + $0x98] sm:$0xff] %v435_v6 }
 0x1af   : > { %v707_v38 = vmul.f32 %v3842_v37, %v704_v32  ;;  %v851_v62 = vld [vmem:[#allocation2 + $0x7d] sm:$0xff]  ;;  %v3850_v32 = vstv %s3771_s7  ;;  %v683_v37 = vld [vmem:[#allocation2 + $0x32] sm:$0xff]  ;;  %431 = vst [vmem:[#allocation2 + $0x88] sm:$0x3f] %v427_v4  ;;  %v2790_v13 = vmul.f32 %v3852_v58, %v893_v46  ;;  %v3854_v33 = vstv %s3843_s28  ;;  %v824_v46 = vld [vmem:[#allocation2 + $0x25] sm:$0xff]  ;;  %s3862_s7 = sld [smem:[#allocation70_spill]] }
 0x1b0   : > { %3837 = vst [vmem:[#allocation133_spill] sm:$0xff] %v2761_v16  ;;  %v900_v23 = vld [vmem:[#allocation2 + $0x7e] sm:$0xff]  ;;  %v2786_v57 = vmul.f32 %v3850_v32, %v2677_v7  ;;  %v2794_v60 = vmul.f32 %v3854_v33, %v753_v59  ;;  %v3855_v24 = vstv %s3844_s9  ;;  %v3857_v1 = vstv %s3794_s12  ;;  %s3865_s12 = sld [smem:[#allocation66_spill]] }
 0x1b1   : > { %3853 = vst [vmem:[#allocation134_spill] sm:$0xff] %v2790_v13  ;;  %v2798_v35 = vmul.f32 %v3855_v24, %v802_v2  ;;  %v631_v12 = vmul.f32 %v3857_v1, %v628_v19  ;;  %v677_v7 = vld [vmem:[#allocation2 + $0x22] sm:$0xff]  ;;  %v2804_v41 = vmul.f32 %v3858_v15, %v851_v62  ;;  %v3859_v4 = vstv %s3848_s24  ;;  %v684_v2 = vld [vmem:[#allocation2 + $0x3a] sm:$0xff]  ;;  %v2818_v22 = vpop.permute.xlu0 %541 }
 0x1b2   : > { %v726_v32 = vld [vmem:[#allocation2 + $0x23] sm:$0xff]  ;;  %v2808_v58 = vmul.f32 %v3859_v4, %v900_v23  ;;  %v3861_v59 = vstv %s3851_s5  ;;  %v732_v24 = vld [vmem:[#allocation2 + $0x33] sm:$0xff]  ;;  %v596_v19 = vmul.f32 %v3863_v28, %v405_v30  ;;  %v660_v1 = vadd.f32 %v658_v39, %v632_v14  ;;  %v733_v23 = vld [vmem:[#allocation2 + $0x3b] sm:$0xff]  ;;  %548 = vst [vmem:[#allocation2 + $0x108] sm:$0xff] %v2818_v22  ;;  %s3876_s5 = sld [smem:[#allocation80_spill]] }
 0x1b3   : > { %v775_v0 = vld [vmem:[#allocation2 + $0x24] sm:$0xff]  ;;  %v637_v33 = vmul.f32 %v3861_v59, %v634_v21  ;;  %v709_v27 = vadd.f32 %v707_v38, %v681_v17  ;;  %v3864_v25 = vmov %v3861_v59  ;;  %v3866_v62 = vstv %s3856_s15  ;;  %s3879_s15 = sld [smem:[#allocation71_spill]]  ;;  %v837_v8 = vld [vmem:[#allocation2 + $0x4d] sm:$0xff] }
 0x1b4   : > { %3860 = vst [vmem:[#allocation135_spill] sm:$0xff] %v2808_v58  ;;  %v638_v15 = vmul.f32 %v3864_v25, %v635_v18  ;;  %v686_v16 = vmul.f32 %v3866_v62, %v683_v37  ;;  %v641_v4 = vld [vmem:[#allocation2 + $0x49] sm:$0xff]  ;;  %v417_v58 = vpop.permute.xlu1 %416  ;;  %v3867_v21 = vstv %s3816_s18  ;;  %v2826_v30 = vmul.f32 %v3868_v5, %v726_v32  ;;  %s3886_s18 = sld [smem:[#allocation73_spill]] }
 0x1b5   : > { %v2822_v59 = vmul.f32 %v3867_v21, %v677_v7  ;;  %v3869_v28 = vstv %s3818_s17  ;;  %v3870_v39 = vstv %s3862_s7  ;;  %421 = vst [vmem:[#allocation2 + $0x70] sm:$0x3f] %v417_v58  ;;  %v2836_v25 = vadd.f32 %v631_v12, %v2740_v36  ;;  %s3881_s17 = sld [smem:[#allocation72_spill]] }
 0x1b6   : > { %v2830_v14 = vmul.f32 %v3869_v28, %v775_v0  ;;  %v644_v17 = vmul.f32 %v3870_v39, %v641_v4  ;;  %v3871_v38 = vstv %s3824_s21  ;;  %v3872_v37 = vmov %v3866_v62  ;;  %v781_v0 = vld [vmem:[#allocation2 + $0x34] sm:$0xff]  ;;  %v782_v28 = vld [vmem:[#allocation2 + $0x3c] sm:$0xff]  ;;  %v739_v39 = vld [vmem:[#allocation2 + $0x4b] sm:$0xff]  ;;  %s3893_s21 = sld [smem:[#allocation74_spill]] }
 0x1b7   : > { %v2840_v18 = vmul.f32 %v3871_v38, %v824_v46  ;;  %v2844_v7 = vmul.f32 %v3872_v37, %v684_v2  ;;  %v3873_v5 = vstv %s3865_s12  ;;  %v642_v62 = vld [vmem:[#allocation2 + $0x51] sm:$0xff]  ;;  %v639_v58 = vadd.f32 %v637_v33, %v2675_v51  ;;  %s3906_s12 = sld [smem:[#allocation85_spill]] }
 0x1b8   : > { %v735_v32 = vmul.f32 %v3873_v5, %v732_v24  ;;  %v3875_v4 = vmov %v3873_v5  ;;  %v2854_v12 = vadd.f32 %v2381_v47, %v596_v19  ;;  %v646_v36 = vadd.f32 %v644_v17, %v2753_v31  ;;  %v690_v46 = vld [vmem:[#allocation2 + $0x4a] sm:$0xff]  ;;  %v516_v47 = vpop.permute.xlu0 %515  ;;  %v830_v31 = vld [vmem:[#allocation2 + $0x35] sm:$0xff] }
 0x1b9   : > { %v2851_v21 = vmul.f32 %v3875_v4, %v733_v23  ;;  %v2857_v2 = vadd.f32 %v638_v15, %v612_v26  ;;  %v688_v24 = vadd.f32 %v686_v16, %v660_v1  ;;  %v3877_v38 = vstv %s3862_s7  ;;  %v662_v33 = vld [vmem:[#allocation2 + $0x91] sm:$0xff]  ;;  %v437_v4 = vpop.permute.xlu1 %436  ;;  %520 = vst [vmem:[#allocation2 + $0xd0] sm:$0x3f] %v516_v47  ;;  %s3894_s7 = sld [smem:[#allocation75_spill]] }
 0x1ba   : > { %v645_v37 = vmul.f32 %v3877_v38, %v642_v62  ;;  %v3878_v5 = vstv %s3789_s19  ;;  %v711_v23 = vld [vmem:[#allocation2 + $0x92] sm:$0xff]  ;;  %v3880_v19 = vstv %s3874_s0  ;;  %v674_v26 = vadd.f32 %v2364_v40, %v646_v36  ;;  %s3884_s19 = sld [smem:[#allocation68_spill]]  ;;  %441 = vst [vmem:[#allocation2 + $0xa0] sm:$0x3f] %v437_v4  ;;  %v656_v40 = vld [vmem:[#allocation2 + $0x81] sm:$0xff]  ;;  %s3982_s0 = sld [smem:[#allocation114_spill]] }
 0x1bb   : > { %v617_v51 = vmul.f32 %v3878_v5, %v435_v6  ;;  %v2865_v11 = vmul.f32 %v3880_v19, %v781_v0  ;;  %v879_v17 = vld [vmem:[#allocation2 + $0x36] sm:$0xff]  ;;  %v788_v16 = vld [vmem:[#allocation2 + $0x4c] sm:$0xff]  ;;  %v3882_v1 = vstv %s3876_s5  ;;  %v3883_v62 = vstv %s2431_s1 }
 0x1bc   : > { %v665_v15 = vmul.f32 %v3882_v1, %v662_v33  ;;  %v714_v38 = vmul.f32 %v3883_v62, %v711_v23  ;;  %v737_v6 = vadd.f32 %v735_v32, %v709_v27  ;;  %v3887_v5 = vmov %v3880_v19  ;;  %v886_v23 = vld [vmem:[#allocation2 + $0x4e] sm:$0xff] }
 0x1bd   : > { %v2874_v20 = vmul.f32 %v3887_v5, %v782_v28  ;;  %v3888_v0 = vstv %s3879_s15  ;;  %v619_v13 = vadd.f32 %v617_v51, %v2786_v57  ;;  %v702_v36 = vadd.f32 %v2765_v49, %v674_v26  ;;  %v691_v62 = vld [vmem:[#allocation2 + $0x52] sm:$0xff]  ;;  %v2894_v26 = vpop.permute.xlu1 %533 }
 0x1be   : > { %v693_v19 = vmul.f32 %v3888_v0, %v690_v46  ;;  %v3889_v33 = vstv %s3881_s17  ;;  %v740_v4 = vld [vmem:[#allocation2 + $0x53] sm:$0xff]  ;;  %v667_v47 = vadd.f32 %v665_v15, %v639_v58  ;;  %v716_v63 = vadd.f32 %v714_v38, %v688_v24  ;;  %3895 = vst [vmem:[#allocation136_spill] sm:$0xff] %v2894_v26  ;;  %v2896_v58 = vpop.permute.xlu0 %553  ;;  %v649_v0 = vld [vmem:[#allocation2 + $0x69] sm:$0xff]  ;;  %539 = vst [vmem:[#allocation2 + $0xf8] sm:$0xff] %v2894_v26 }
 0x1bf   : > { %v742_v1 = vmul.f32 %v3889_v33, %v739_v39  ;;  %v3891_v28 = vstv %s3885_s4  ;;  %v3892_v46 = vstv %s3886_s18  ;;  %v789_v49 = vld [vmem:[#allocation2 + $0x54] sm:$0xff]  ;;  %v647_v39 = vadd.f32 %v645_v37, %v619_v13  ;;  %3896 = vst [vmem:[#allocation137_spill] sm:$0xff] %v2896_v58  ;;  %v698_v33 = vld [vmem:[#allocation2 + $0x6a] sm:$0xff]  ;;  %559 = vst [vmem:[#allocation2 + $0x128] sm:$0xff] %v2896_v58  ;;  %s4008_s18 = sld [smem:[#allocation115_spill]] }
 0x1c0   : > { %v3890_v27 = vstv %s3884_s19  ;;  %v2888_v5 = vmul.f32 %v3891_v28, %v879_v17  ;;  %v2892_v57 = vmul.f32 %v3892_v46, %v788_v16  ;;  %v760_v51 = vld [vmem:[#allocation2 + $0x93] sm:$0xff]  ;;  %v695_v24 = vadd.f32 %v693_v19, %v667_v47 }
 0x1c1   : > { %v2884_v32 = vmul.f32 %v3890_v27, %v830_v31  ;;  %v730_v31 = vadd.f32 %v2746_v10, %v702_v36  ;;  %v744_v17 = vadd.f32 %v742_v1, %v716_v63  ;;  %v809_v15 = vld [vmem:[#allocation2 + $0x94] sm:$0xff]  ;;  %v3897_v38 = vstv %s3829_s25  ;;  %s3905_s25 = sld [smem:[#allocation84_spill]] }
 0x1c2   : > { %v659_v16 = vmul.f32 %v3897_v38, %v656_v40  ;;  %v3898_v13 = vstv %s3893_s21  ;;  %v3899_v27 = vstv %s3894_s7  ;;  %v3900_v10 = vstv %s3879_s15  ;;  %v858_v26 = vld [vmem:[#allocation2 + $0x95] sm:$0xff]  ;;  %s3993_s15 = sld [smem:[#allocation109_spill]] }
 0x1c3   : > { %v2905_v37 = vmul.f32 %v3898_v13, %v837_v8  ;;  %v2909_v19 = vmul.f32 %v3899_v27, %v886_v23  ;;  %v694_v63 = vmul.f32 %v3900_v10, %v691_v62  ;;  %v3901_v36 = vstv %s3881_s17  ;;  %v907_v8 = vld [vmem:[#allocation2 + $0x96] sm:$0xff]  ;;  %v705_v62 = vld [vmem:[#allocation2 + $0x82] sm:$0xff]  ;;  %s3994_s17 = sld [smem:[#allocation110_spill]] }
 0x1c4   : > { %v2915_v1 = vmul.f32 %v3901_v36, %v740_v4  ;;  %v3902_v40 = vmov %v3892_v46  ;;  %v723_v28 = vadd.f32 %v2366_v42, %v695_v24  ;;  %v3903_v46 = vstv %s2439_s22  ;;  %v2936_v42 = vpop.permute.xlu0 %563 }
 0x1c5   : > { %v2919_v47 = vmul.f32 %v3902_v40, %v789_v49  ;;  %v763_v38 = vmul.f32 %v3903_v46, %v760_v51  ;;  %v772_v58 = vadd.f32 %v2368_v43, %v744_v17  ;;  %v3904_v13 = vstv %s3756_s13  ;;  %v2934_v40 = vpop.permute.xlu1 %543  ;;  %569 = vst [vmem:[#allocation2 + $0x140] sm:$0xff] %v2936_v42 }
 0x1c6   : > { %v2927_v23 = vmul.f32 %v3904_v13, %v809_v15  ;;  %v3907_v27 = vstv %s3785_s30  ;;  %v675_v10 = vadd.f32 %v2383_v48, %v647_v39  ;;  %v3908_v49 = vstv %s3827_s16  ;;  %v754_v15 = vld [vmem:[#allocation2 + $0x83] sm:$0xff]  ;;  %549 = vst [vmem:[#allocation2 + $0x110] sm:$0xff] %v2934_v40  ;;  %s3940_s16 = sld [smem:[#allocation92_spill]]  ;;  %s3976_s30 = sld [smem:[#allocation113_spill]] }
 0x1c7   : > { %v652_v4 = vmul.f32 %v3907_v27, %v649_v0  ;;  %v701_v36 = vmul.f32 %v3908_v49, %v698_v33  ;;  %v751_v43 = vadd.f32 %v2773_v61, %v723_v28  ;;  %v758_v51 = vadd.f32 %v2794_v60, %v730_v31  ;;  %v663_v0 = vld [vmem:[#allocation2 + $0x99] sm:$0xff] }
 0x1c8   : > { %v800_v24 = vadd.f32 %v2777_v29, %v772_v58  ;;  %v661_v17 = vadd.f32 %v659_v16, %v2836_v25  ;;  %v3909_v48 = vstv %s3905_s25  ;;  %v3910_v33 = vstv %s3906_s12  ;;  %v712_v16 = vld [vmem:[#allocation2 + $0x9a] sm:$0xff] }
 0x1c9   : > { %v861_v39 = vmul.f32 %v3909_v48, %v858_v26  ;;  %v910_v46 = vmul.f32 %v3910_v33, %v907_v8  ;;  %v654_v61 = vadd.f32 %v652_v4, %v2854_v12  ;;  %v703_v28 = vadd.f32 %v701_v36, %v675_v10  ;;  %v761_v33 = vld [vmem:[#allocation2 + $0x9b] sm:$0xff]  ;;  %v2959_v12 = vpop.permute.xlu1 %551 }
 0x1ca   : > { %v765_v60 = vadd.f32 %v763_v38, %v737_v6  ;;  %v779_v31 = vadd.f32 %v2750_v9, %v751_v43  ;;  %v828_v29 = vadd.f32 %v2757_v34, %v800_v24  ;;  %v3911_v25 = vstv %s3832_s10  ;;  %v536_v6 = vpop.permute.xlu0 %535  ;;  %558 = vst [vmem:[#allocation2 + $0x120] sm:$0xff] %v2959_v12  ;;  %v810_v24 = vld [vmem:[#allocation2 + $0x9c] sm:$0xff]  ;;  %s3937_s10 = sld [smem:[#allocation87_spill]] }
 0x1cb   : > { %v708_v58 = vmul.f32 %v3911_v25, %v705_v62  ;;  %v3912_v13 = vstv %s3843_s28  ;;  %v682_v49 = vadd.f32 %v2822_v59, %v654_v61  ;;  %v731_v26 = vadd.f32 %v2826_v30, %v703_v28  ;;  %540 = vst [vmem:[#allocation2 + $0x100] sm:$0x3f] %v536_v6  ;;  %v747_v59 = vld [vmem:[#allocation2 + $0x6b] sm:$0xff]  ;;  %v880_v6 = vld [vmem:[#allocation2 + $0x3e] sm:$0xff]  ;;  %s3970_s28 = sld [smem:[#allocation105_spill]] }
 0x1cc   : > { %v757_v27 = vmul.f32 %v3912_v13, %v754_v15  ;;  %v3913_v48 = vstv %s3876_s5  ;;  %v786_v9 = vadd.f32 %v2865_v11, %v758_v51  ;;  %v807_v34 = vadd.f32 %v2798_v35, %v779_v31  ;;  %v796_v15 = vld [vmem:[#allocation2 + $0x6c] sm:$0xff]  ;;  %v803_v13 = vld [vmem:[#allocation2 + $0x84] sm:$0xff]  ;;  %s3983_s5 = sld [smem:[#allocation106_spill]] }
 0x1cd   : > { %v666_v8 = vmul.f32 %v3913_v48, %v663_v0  ;;  %v856_v38 = vadd.f32 %v2804_v41, %v828_v29  ;;  %v689_v62 = vadd.f32 %v2844_v7, %v661_v17  ;;  %v710_v4 = vadd.f32 %v708_v58, %v682_v49  ;;  %v838_v17 = vld [vmem:[#allocation2 + $0x55] sm:$0xff]  ;;  %v2976_v31 = vpop.permute.xlu1 %561 }
 0x1ce   : > { %v3914_v10 = vstv %s2431_s1  ;;  %v759_v43 = vadd.f32 %v757_v27, %v731_v26  ;;  %v793_v11 = vadd.f32 %v2892_v57, %v765_v60  ;;  %v835_v35 = vadd.f32 %v2884_v32, %v807_v34  ;;  %v556_v29 = vpop.permute.xlu0 %555  ;;  %568 = vst [vmem:[#allocation2 + $0x138] sm:$0xff] %v2976_v31  ;;  %v887_v34 = vld [vmem:[#allocation2 + $0x56] sm:$0xff]  ;;  %s3924_s1 = sld [smem:[#allocation76_spill]] }
 0x1cf   : > { %v668_v30 = vadd.f32 %v666_v8, %v2857_v2  ;;  %v715_v36 = vmul.f32 %v3914_v10, %v712_v16  ;;  %v884_v41 = vadd.f32 %v2888_v5, %v856_v38  ;;  %v3915_v7 = vstv %s2439_s22  ;;  %560 = vst [vmem:[#allocation2 + $0x130] sm:$0x3f] %v556_v29  ;;  %v831_v16 = vld [vmem:[#allocation2 + $0x3d] sm:$0xff]  ;;  %s3955_s22 = sld [smem:[#allocation97_spill]] }
 0x1d0   : > { %v764_v51 = vmul.f32 %v3915_v7, %v761_v33  ;;  %v738_v2 = vadd.f32 %v2851_v21, %v710_v4  ;;  %v787_v28 = vadd.f32 %v2874_v20, %v759_v43  ;;  %v863_v57 = vadd.f32 %v861_v39, %v835_v35  ;;  %v901_v43 = vld [vmem:[#allocation2 + $0x86] sm:$0xff]  ;;  %v894_v35 = vld [vmem:[#allocation2 + $0x6e] sm:$0xff] }
 0x1d1   : > { %v696_v0 = vadd.f32 %v694_v63, %v668_v30  ;;  %v717_v61 = vadd.f32 %v715_v36, %v689_v62  ;;  %v912_v60 = vadd.f32 %v910_v46, %v884_v41  ;;  %v3916_v32 = vstv %s3834_s2  ;;  %v873_v63 = vld [vmem:[#allocation2 + $0x26] sm:$0xff]  ;;  %v526_v62 = vpop.permute.xlu1 %525  ;;  %s3933_s2 = sld [smem:[#allocation35_spill]] }
 0x1d2   : > { %v750_v25 = vmul.f32 %v3916_v32, %v747_v59  ;;  %v3917_v5 = vstv %s3756_s13  ;;  %v814_v21 = vadd.f32 %v2927_v23, %v786_v9  ;;  %v766_v39 = vadd.f32 %v764_v51, %v738_v2  ;;  %v852_v9 = vld [vmem:[#allocation2 + $0x85] sm:$0xff]  ;;  %530 = vst [vmem:[#allocation2 + $0xe8] sm:$0x3f] %v526_v62  ;;  %v859_v2 = vld [vmem:[#allocation2 + $0x9d] sm:$0xff]  ;;  %s3939_s13 = sld [smem:[#allocation91_spill]] }
 0x1d3   : > { %v813_v58 = vmul.f32 %v3917_v5, %v810_v24  ;;  %v724_v20 = vadd.f32 %v2391_v52, %v696_v0  ;;  %v745_v27 = vadd.f32 %v2915_v1, %v717_v61  ;;  %v3918_v46 = vstv %s3893_s21  ;;  %v991_v32 = vld [vmem:[#allocation2 + $0x109] sm:$0xff]  ;;  %s4009_s21 = sld [smem:[#allocation101_spill]] }
 0x1d4   : > { %v841_v49 = vmul.f32 %v3918_v46, %v838_v17  ;;  %v940_v26 = vadd.f32 %v2658_v3, %v912_v60  ;;  %v3919_v48 = vstv %s3836_s14  ;;  %v891_v23 = vadd.f32 %v2909_v19, %v863_v57  ;;  %v908_v60 = vld [vmem:[#allocation2 + $0x9e] sm:$0xff]  ;;  %s3953_s14 = sld [smem:[#allocation93_spill]] }
 0x1d5   : > { %v799_v8 = vmul.f32 %v3919_v48, %v796_v15  ;;  %v815_v33 = vadd.f32 %v813_v58, %v787_v28  ;;  %v752_v38 = vadd.f32 %v750_v25, %v724_v20  ;;  %v773_v52 = vadd.f32 %v2393_v53, %v745_v27  ;;  %v845_v53 = vld [vmem:[#allocation2 + $0x6d] sm:$0xff]  ;;  %v546_v25 = vpop.permute.xlu1 %545 }
 0x1d6   : > { %v794_v1 = vadd.f32 %v2919_v47, %v766_v39  ;;  %v3920_v59 = vstv %s3826_s6  ;;  %v3921_v3 = vstv %s3884_s19  ;;  %v821_v10 = vadd.f32 %v2370_v44, %v793_v11  ;;  %v971_v20 = vld [vmem:[#allocation2 + $0xc9] sm:$0xff]  ;;  %550 = vst [vmem:[#allocation2 + $0x118] sm:$0x3f] %v546_v25  ;;  %s3949_s6 = sld [smem:[#allocation107_spill]]  ;;  %v1180_v25 = vld [vmem:[#allocation2 + $0xf5] sm:$0xff]  ;;  %s3998_s19 = sld [smem:[#allocation111_spill]] }
 0x1d7   : > { %v2996_v30 = vmul.f32 %v3920_v59, %v873_v63  ;;  %v834_v4 = vmul.f32 %v3921_v3, %v831_v16  ;;  %v3922_v36 = vstv %s3844_s9  ;;  %v842_v24 = vadd.f32 %v2905_v37, %v814_v21  ;;  %v1118_v48 = vld [vmem:[#allocation2 + $0xcc] sm:$0xff]  ;;  %s3935_s9 = sld [smem:[#allocation28_spill]] }
 0x1d8   : > { %v806_v19 = vmul.f32 %v3922_v36, %v803_v13  ;;  %v780_v47 = vadd.f32 %v2830_v14, %v752_v38  ;;  %v801_v41 = vadd.f32 %v799_v8, %v773_v52  ;;  %v843_v7 = vadd.f32 %v841_v49, %v815_v33  ;;  %v1069_v49 = vld [vmem:[#allocation2 + $0xcb] sm:$0xff] }
 0x1d9   : > { %v3923_v51 = vstv %s3885_s4  ;;  %v3925_v15 = vstv %s3894_s7  ;;  %v3926_v44 = vstv %s3846_s3  ;;  %v822_v61 = vadd.f32 %v2395_v54, %v794_v1  ;;  %v1033_v3 = vld [vmem:[#allocation2 + $0xf2] sm:$0xff]  ;;  %s3980_s3 = sld [smem:[#allocation98_spill]]  ;;  %s3999_s4 = sld [smem:[#allocation112_spill]] }
 0x1da   : > { %v883_v17 = vmul.f32 %v3923_v51, %v880_v6  ;;  %v890_v0 = vmul.f32 %v3925_v15, %v887_v34  ;;  %v855_v11 = vmul.f32 %v3926_v44, %v852_v9  ;;  %v3927_v28 = vstv %s3848_s24  ;;  %v984_v34 = vld [vmem:[#allocation2 + $0xf1] sm:$0xff]  ;;  %s3962_s24 = sld [smem:[#allocation102_spill]]  ;;  %s4013_s7 = sld [smem:[#allocation39_spill]] }
 0x1db   : > { %v3014_v37 = vmul.f32 %v3927_v28, %v901_v43  ;;  %v919_v14 = vadd.f32 %v2407_v56, %v891_v23  ;;  %v808_v29 = vadd.f32 %v806_v19, %v780_v47  ;;  %v829_v57 = vadd.f32 %v2840_v18, %v801_v41  ;;  %v3934_v23 = vld [vmem:[#allocation77_spill] sm:$0xff]  ;;  %v1047_v28 = vld [vmem:[#allocation2 + $0x122] sm:$0xff] }
 0x1dc   : > { %v3019_v5 = vadd.f32 %v2781_v50, %v821_v10  ;;  %v3928_v58 = vstv %s3838_s27  ;;  %v3929_v54 = vstv %s3841_s23  ;;  %v3930_v21 = vstv %s3924_s1  ;;  %v1020_v50 = vld [vmem:[#allocation2 + $0xca] sm:$0xff]  ;;  %v566_v10 = vpop.permute.xlu1 %565  ;;  %s3952_s23 = sld [smem:[#allocation108_spill]]  ;;  %s3969_s27 = sld [smem:[#allocation104_spill]] }
 0x1dd   : > { %v848_v63 = vmul.f32 %v3928_v58, %v845_v53  ;;  %v897_v16 = vmul.f32 %v3929_v54, %v894_v35  ;;  %v945_v13 = vmul.f32 %v3930_v21, %v2818_v22  ;;  %v870_v56 = vadd.f32 %v2376_v45, %v842_v24  ;;  %v1167_v22 = vld [vmem:[#allocation2 + $0xcd] sm:$0xff]  ;;  %570 = vst [vmem:[#allocation2 + $0x148] sm:$0x3f] %v566_v10  ;;  %v1229_v58 = vld [vmem:[#allocation2 + $0xf6] sm:$0xff] }
 0x1de   : > { %v836_v18 = vadd.f32 %v834_v4, %v808_v29  ;;  %v3931_v27 = vstv %s3905_s25  ;;  %v871_v46 = vadd.f32 %v2397_v55, %v843_v7  ;;  %v3932_v33 = vstv %s3906_s12  ;;  %v1082_v4 = vld [vmem:[#allocation2 + $0xf3] sm:$0xff]  ;;  %v3946_v7 = vld [vmem:[#allocation136_spill] sm:$0xff]  ;;  %s4018_s25 = sld [smem:[#allocation116_spill]] }
 0x1df   : > { %v862_v39 = vmul.f32 %v3931_v27, %v859_v2  ;;  %v850_v8 = vadd.f32 %v848_v63, %v822_v61  ;;  %v911_v6 = vmul.f32 %v3932_v33, %v908_v60  ;;  %v968_v45 = vadd.f32 %v3934_v23, %v940_v26  ;;  %v998_v2 = vld [vmem:[#allocation2 + $0x121] sm:$0xff]  ;;  %v3958_v27 = vld [vmem:[#allocation120_spill] sm:$0xff]  ;;  %s4020_s12 = sld [smem:[#allocation40_spill]] }
 0x1e0   : > { %v3936_v9 = vstv %s3762_s8  ;;  %v947_v52 = vadd.f32 %v945_v13, %v919_v14  ;;  %v857_v55 = vadd.f32 %v855_v11, %v829_v57  ;;  %v3938_v62 = vstv %s3779_s11  ;;  %s3945_s11 = sld [smem:[#allocation88_spill]]  ;;  %v3956_v54 = vld [vmem:[#allocation134_spill] sm:$0xff] }
 0x1e1   : > { %v994_v38 = vmul.f32 %v3936_v9, %v991_v32  ;;  %v864_v1 = vadd.f32 %v862_v39, %v836_v18  ;;  %v3039_v59 = vmul.f32 %v3938_v62, %v971_v20  ;;  %v3941_v36 = vstv %s3780_s26  ;;  %v1131_v32 = vld [vmem:[#allocation2 + $0xf4] sm:$0xff]  ;;  %s3964_s26 = sld [smem:[#allocation103_spill]] }
 0x1e2   : > { %v3043_v19 = vmul.f32 %v3941_v36, %v1020_v50  ;;  %v3942_v43 = vstv %s3782_s20  ;;  %v3943_v26 = vstv %s3787_s29  ;;  %v3944_v47 = vstv %s3933_s2  ;;  %s3954_s20 = sld [smem:[#allocation94_spill]]  ;;  %v1089_v50 = vld [vmem:[#allocation2 + $0x10b] sm:$0xff]  ;;  %v1005_v36 = vld [vmem:[#allocation2 + $0x139] sm:$0xff]  ;;  %s4052_s2 = sld [smem:[#allocation24_spill]] }
 0x1e3   : > { %v3047_v24 = vmul.f32 %v3942_v43, %v1069_v49  ;;  %v3051_v53 = vmul.f32 %v3943_v26, %v1118_v48  ;;  %v996_v35 = vadd.f32 %v994_v38, %v968_v45  ;;  %v3055_v41 = vmul.f32 %v3944_v47, %v1167_v22  ;;  %v3959_v49 = vld [vmem:[#allocation117_spill] sm:$0xff]  ;;  %v3968_v38 = vld [vmem:[#allocation119_spill] sm:$0xff]  ;;  %s3971_s29 = sld [smem:[#allocation81_spill]] }
 0x1e4   : > { %v3947_v51 = vstv %s3935_s9  ;;  %v3948_v44 = vstv %s3937_s10  ;;  %v899_v61 = vadd.f32 %v897_v16, %v871_v46  ;;  %v3950_v14 = vstv %s3939_s13  ;;  %v1040_v46 = vld [vmem:[#allocation2 + $0x10a] sm:$0xff]  ;;  %v3972_v43 = vld [vmem:[#allocation137_spill] sm:$0xff]  ;;  %s4053_s9 = sld [smem:[#allocation36_spill]] }
 0x1e5   : > { %v3060_v15 = vmul.f32 %v3947_v51, %v3946_v7  ;;  %v3064_v11 = vmul.f32 %v3948_v44, %v984_v34  ;;  %v1036_v29 = vmul.f32 %v3950_v14, %v1033_v3  ;;  %v3951_v57 = vstv %s3940_s16  ;;  %v3961_v34 = vld [vmem:[#allocation122_spill] sm:$0xff] }
 0x1e6   : > { %v3070_v60 = vmul.f32 %v3951_v57, %v1082_v4  ;;  %v878_v63 = vadd.f32 %v2996_v30, %v850_v8  ;;  %v898_v21 = vadd.f32 %v3956_v54, %v870_v56  ;;  %v885_v16 = vadd.f32 %v883_v17, %v857_v55  ;;  %v1138_v55 = vld [vmem:[#allocation2 + $0x10c] sm:$0xff]  ;;  %v1103_v54 = vld [vmem:[#allocation2 + $0x13b] sm:$0xff] }
 0x1e7   : > { %v892_v13 = vadd.f32 %v890_v0, %v864_v1  ;;  %v3957_v20 = vstv %s3945_s11  ;;  %v975_v39 = vadd.f32 %v3958_v27, %v947_v52  ;;  %v3960_v33 = vstv %s3949_s6  ;;  %v1187_v1 = vld [vmem:[#allocation2 + $0x10d] sm:$0xff]  ;;  %v3985_v27 = vld [vmem:[#allocation127_spill] sm:$0xff]  ;;  %s1910_s11 = smov 32  }
 0x1e8   : > { %v952_v18 = vmul.f32 %v3957_v20, %v2959_v12  ;;  %v926_v48 = vadd.f32 %v3959_v49, %v898_v21  ;;  %v1001_v22 = vmul.f32 %v3960_v33, %v998_v2  ;;  %v1024_v30 = vadd.f32 %v3961_v34, %v996_v35 }
 0x1e9   : > { %v3963_v8 = vstv %s3952_s23  ;;  %v3965_v0 = vstv %s3953_s14  ;;  %v3966_v23 = vstv %s3954_s20  ;;  %v3967_v45 = vstv %s3955_s22 }
 0x1ea   : > { %v1050_v17 = vmul.f32 %v3963_v8, %v1047_v28  ;;  %v1134_v56 = vmul.f32 %v3965_v0, %v1131_v32  ;;  %v3088_v12 = vmul.f32 %v3966_v23, %v1180_v25  ;;  %v3092_v9 = vmul.f32 %v3967_v45, %v1229_v58  ;;  %v1054_v28 = vld [vmem:[#allocation2 + $0x13a] sm:$0xff]  ;;  %v1145_v8 = vld [vmem:[#allocation2 + $0x124] sm:$0xff] }
 0x1eb   : > { %v927_v52 = vadd.f32 %v3968_v38, %v899_v61  ;;  %v906_v62 = vadd.f32 %v3014_v37, %v878_v63  ;;  %v954_v3 = vadd.f32 %v952_v18, %v926_v48  ;;  %v1003_v4 = vadd.f32 %v1001_v22, %v975_v39  ;;  %v3978_v37 = vld [vmem:[#allocation89_spill] sm:$0xff]  ;;  %v3987_v39 = vld [vmem:[#allocation121_spill] sm:$0xff] }
 0x1ec   : > { %v1052_v10 = vadd.f32 %v1050_v17, %v1024_v30  ;;  %v3973_v26 = vmov %v3957_v20  ;;  %v3974_v47 = vstv %s3924_s1  ;;  %v3975_v51 = vstv %s3962_s24  ;;  %v3984_v20 = vld [vmem:[#allocation133_spill] sm:$0xff]  ;;  %v1096_v30 = vld [vmem:[#allocation2 + $0x123] sm:$0xff]  ;;  %s4031_s1 = sld [smem:[#allocation41_spill]] }
 0x1ed   : > { %v953_v35 = vmul.f32 %v3973_v26, %v3972_v43  ;;  %v946_v7 = vmul.f32 %v3974_v47, %v2934_v40  ;;  %v3104_v44 = vmul.f32 %v3975_v51, %v1040_v46  ;;  %v3977_v61 = vstv %s3964_s26  ;;  %v1236_v40 = vld [vmem:[#allocation2 + $0x10e] sm:$0xff]  ;;  %v3991_v17 = vld [vmem:[#allocation135_spill] sm:$0xff] }
 0x1ee   : > { %v1092_v2 = vmul.f32 %v3977_v61, %v1089_v50  ;;  %v913_v14 = vadd.f32 %v911_v6, %v885_v16  ;;  %v920_v57 = vadd.f32 %v3978_v37, %v892_v13  ;;  %v3979_v32 = vstv %s3969_s27  ;;  %v3988_v50 = vld [vmem:[#allocation128_spill] sm:$0xff]  ;;  %v3990_v22 = vld [vmem:[#allocation129_spill] sm:$0xff] }
 0x1ef   : > { %v1141_v25 = vmul.f32 %v3979_v32, %v1138_v55  ;;  %v3981_v58 = vstv %s3970_s28  ;;  %v3115_v21 = vadd.f32 %v953_v35, %v927_v52  ;;  %v877_v18 = vadd.f32 %v3984_v20, %v3019_v5  ;;  %v985_v35 = vld [vmem:[#allocation2 + $0xf9] sm:$0xff] }
 0x1f0   : > { %v3113_v63 = vmul.f32 %v3981_v58, %v1187_v1  ;;  %v982_v6 = vadd.f32 %v3985_v27, %v954_v3  ;;  %v3986_v16 = vstv %s3971_s29  ;;  %v934_v46 = vadd.f32 %v3987_v39, %v906_v62  ;;  %v1034_v58 = vld [vmem:[#allocation2 + $0xfa] sm:$0xff]  ;;  %v4005_v27 = vld [vmem:[#allocation79_spill] sm:$0xff] }
 0x1f1   : > { %v1008_v13 = vmul.f32 %v3986_v16, %v1005_v36  ;;  %v1031_v49 = vadd.f32 %v3988_v50, %v1003_v4  ;;  %v3989_v48 = vstv %s3976_s30  ;;  %v1080_v34 = vadd.f32 %v3990_v22, %v1052_v10  ;;  %v1194_v10 = vld [vmem:[#allocation2 + $0x125] sm:$0xff] }
 0x1f2   : > { %v1057_v33 = vmul.f32 %v3989_v48, %v1054_v28  ;;  %v905_v0 = vadd.f32 %v3991_v17, %v877_v18  ;;  %v3992_v23 = vstv %s3980_s3  ;;  %v3995_v38 = vstv %s3982_s0  ;;  %v1243_v36 = vld [vmem:[#allocation2 + $0x126] sm:$0xff]  ;;  %v1132_v18 = vld [vmem:[#allocation2 + $0xfc] sm:$0xff] }
 0x1f3   : > { %v959_v5 = vmul.f32 %v3992_v23, %v2976_v31  ;;  %v1010_v45 = vadd.f32 %v1008_v13, %v982_v6  ;;  %v1106_v52 = vmul.f32 %v3995_v38, %v1103_v54  ;;  %v948_v55 = vadd.f32 %v946_v7, %v920_v57  ;;  %v4000_v31 = vld [vmem:[#allocation118_spill] sm:$0xff]  ;;  %v999_v16 = vld [vmem:[#allocation2 + $0x129] sm:$0xff] }
 0x1f4   : > { %v3996_v1 = vstv %s3983_s5  ;;  %v3997_v3 = vmov %v3992_v23  ;;  %v1059_v43 = vadd.f32 %v1057_v33, %v1031_v49  ;;  %v941_v26 = vadd.f32 %v3060_v15, %v913_v14  ;;  %v1152_v48 = vld [vmem:[#allocation2 + $0x13c] sm:$0xff] }
 0x1f5   : > { %v3135_v62 = vmul.f32 %v3996_v1, %v1236_v40  ;;  %v960_v4 = vmul.f32 %v3997_v3, %v2936_v42  ;;  %v933_v47 = vadd.f32 %v4000_v31, %v905_v0  ;;  %v1038_v51 = vadd.f32 %v1036_v29, %v1010_v45  ;;  %v1083_v42 = vld [vmem:[#allocation2 + $0xfb] sm:$0xff]  ;;  %v992_v3 = vld [vmem:[#allocation2 + $0x111] sm:$0xff] }
 0x1f6   : > { %v1108_v61 = vadd.f32 %v1106_v52, %v1080_v34  ;;  %v4001_v28 = vstv %s3993_s15  ;;  %v4002_v57 = vstv %s3994_s17  ;;  %v1087_v54 = vadd.f32 %v3070_v60, %v1059_v43  ;;  %v1201_v60 = vld [vmem:[#allocation2 + $0x13d] sm:$0xff] }
 0x1f7   : > { %v962_v7 = vadd.f32 %v960_v4, %v934_v46  ;;  %v1099_v37 = vmul.f32 %v4001_v28, %v1096_v30  ;;  %v1148_v32 = vmul.f32 %v4002_v57, %v1145_v8  ;;  %v4003_v40 = vstv %s3998_s19  ;;  %v4007_v46 = vld [vmem:[#allocation82_spill] sm:$0xff]  ;;  %v978_v23 = vld [vmem:[#allocation2 + $0xe1] sm:$0xff] }
 0x1f8   : > { %v1197_v20 = vmul.f32 %v4003_v40, %v1194_v10  ;;  %v4004_v15 = vstv %s3999_s4  ;;  %v961_v29 = vadd.f32 %v959_v5, %v933_v47  ;;  %v1066_v6 = vadd.f32 %v4005_v27, %v1038_v51  ;;  %v4016_v4 = vld [vmem:[#allocation124_spill] sm:$0xff]  ;;  %v1027_v31 = vld [vmem:[#allocation2 + $0xe2] sm:$0xff]  ;;  %v1041_v47 = vld [vmem:[#allocation2 + $0x112] sm:$0xff] }
 0x1f9   : > { %v3151_v14 = vmul.f32 %v4004_v15, %v1243_v36  ;;  %v4006_v13 = vstv %s3937_s10  ;;  %v1115_v50 = vadd.f32 %v4007_v46, %v1087_v54  ;;  %v1136_v49 = vadd.f32 %v1134_v56, %v1108_v61  ;;  %v4021_v51 = vld [vmem:[#allocation83_spill] sm:$0xff]  ;;  %v1048_v57 = vld [vmem:[#allocation2 + $0x12a] sm:$0xff]  ;;  %s4054_s10 = sld [smem:[#allocation43_spill]] }
 0x1fa   : > { %v988_v39 = vmul.f32 %v4006_v13, %v985_v35  ;;  %v976_v33 = vadd.f32 %v3039_v59, %v948_v55  ;;  %v4010_v22 = vstv %s3939_s13  ;;  %v4011_v30 = vstv %s3940_s16  ;;  %v4015_v59 = vld [vmem:[#allocation78_spill] sm:$0xff]  ;;  %v4022_v61 = vld [vmem:[#allocation125_spill] sm:$0xff]  ;;  %s4056_s13 = sld [smem:[#allocation44_spill]]  ;;  %s1909_s16 = smov 16  }
 0x1fb   : > { %v3160_v34 = vmul.f32 %v4010_v22, %v1034_v58  ;;  %v3164_v8 = vmul.f32 %v4011_v30, %v1083_v42  ;;  %v989_v17 = vadd.f32 %v3064_v11, %v961_v29  ;;  %v1094_v0 = vadd.f32 %v1092_v2, %v1066_v6  ;;  %v1250_v35 = vld [vmem:[#allocation2 + $0x13e] sm:$0xff]  ;;  %v1097_v15 = vld [vmem:[#allocation2 + $0x12b] sm:$0xff] }
 0x1fc   : > { %v990_v5 = vadd.f32 %v988_v39, %v962_v7  ;;  %v4012_v45 = vstv %s3953_s14  ;;  %v1143_v38 = vadd.f32 %v1141_v25, %v1115_v50  ;;  %v4014_v52 = vstv %s3949_s6  ;;  %v4028_v50 = vld [vmem:[#allocation95_spill] sm:$0xff]  ;;  %s1911_s6 = smov 64   ;;  %s1913_s14 = smov 80  }
 0x1fd   : > { %v3169_v56 = vmul.f32 %v4012_v45, %v1132_v18  ;;  %v1002_v1 = vmul.f32 %v4014_v52, %v999_v16  ;;  %v1017_v55 = vadd.f32 %v4015_v59, %v989_v17  ;;  %v1122_v10 = vadd.f32 %v4016_v4, %v1094_v0  ;;  %v4024_v18 = vld [vmem:[#allocation90_spill] sm:$0xff]  ;;  %v1006_v0 = vld [vmem:[#allocation2 + $0x141] sm:$0xff] }
 0x1fe   : > { %v4017_v36 = vstv %s4008_s18  ;;  %v4019_v11 = vstv %s4009_s21  ;;  %v1164_v25 = vadd.f32 %v4021_v51, %v1136_v49  ;;  %v1171_v7 = vadd.f32 %v4022_v61, %v1143_v38  ;;  %v1076_v17 = vld [vmem:[#allocation2 + $0xe3] sm:$0xff]  ;;  %v4039_v61 = vld [vmem:[#allocation130_spill] sm:$0xff] }
 0x1ff   : > { %v1155_v43 = vmul.f32 %v4017_v36, %v1152_v48  ;;  %v1204_v2 = vmul.f32 %v4019_v11, %v1201_v60  ;;  %v1004_v28 = vadd.f32 %v1002_v1, %v976_v33  ;;  %v4023_v58 = vstv %s4013_s7  ;;  %v4030_v33 = vld [vmem:[#allocation123_spill] sm:$0xff] }
 0x200   : > { %v981_v42 = vmul.f32 %v4023_v58, %v978_v23  ;;  %v1045_v54 = vadd.f32 %v3104_v44, %v1017_v55  ;;  %v1150_v40 = vadd.f32 %v1148_v32, %v1122_v10  ;;  %v969_v29 = vadd.f32 %v4024_v18, %v941_v26  ;;  %v1055_v23 = vld [vmem:[#allocation2 + $0x142] sm:$0xff] }
 0x201   : > { %v4025_v27 = vstv %s3762_s8  ;;  %v4026_v16 = vstv %s4018_s25  ;;  %v4027_v39 = vstv %s4020_s12  ;;  %v1018_v49 = vadd.f32 %v4028_v50, %v990_v5  ;;  %s4034_s8 = sld [smem:[#allocation42_spill]]  ;;  %v1125_v1 = vld [vmem:[#allocation2 + $0xe4] sm:$0xff] }
 0x202   : > { %v995_v6 = vmul.f32 %v4025_v27, %v992_v3  ;;  %v1253_v13 = vmul.f32 %v4026_v16, %v1250_v35  ;;  %v1030_v46 = vmul.f32 %v4027_v39, %v1027_v31  ;;  %v4029_v48 = vstv %s3962_s24  ;;  %v4035_v55 = vld [vmem:[#allocation131_spill] sm:$0xff]  ;;  %s4094_s24 = sld [smem:[#allocation23_spill]] }
 0x203   : > { %v1044_v60 = vmul.f32 %v4029_v48, %v1041_v47  ;;  %v1073_v22 = vadd.f32 %v4030_v33, %v1045_v54  ;;  %v1199_v30 = vadd.f32 %v1197_v20, %v1171_v7  ;;  %v4032_v44 = vstv %s3952_s23  ;;  %s1912_s23 = smov 48  }
 0x204   : > { %v1051_v32 = vmul.f32 %v4032_v44, %v1048_v57  ;;  %v997_v26 = vadd.f32 %v995_v6, %v969_v29  ;;  %v1192_v45 = vadd.f32 %v3113_v63, %v1164_v25  ;;  %v4033_v38 = vstv %s3993_s15  ;;  %v1104_v25 = vld [vmem:[#allocation2 + $0x143] sm:$0xff]  ;;  %v1139_v6 = vld [vmem:[#allocation2 + $0x114] sm:$0xff] }
 0x205   : > { %v1100_v52 = vmul.f32 %v4033_v38, %v1097_v15  ;;  %v1032_v5 = vadd.f32 %v1030_v46, %v1004_v28  ;;  %v1046_v3 = vadd.f32 %v1044_v60, %v1018_v49  ;;  %v1101_v59 = vadd.f32 %v1099_v37, %v1073_v22  ;;  %v4040_v28 = vld [vmem:[#allocation132_spill] sm:$0xff]  ;;  %v1181_v22 = vld [vmem:[#allocation2 + $0xfd] sm:$0xff] }
 0x206   : > { %v1178_v4 = vadd.f32 %v4035_v55, %v1150_v40  ;;  %v983_v20 = vadd.f32 %v981_v42, %v3115_v21  ;;  %v1025_v10 = vadd.f32 %v3043_v19, %v997_v26  ;;  %v4036_v36 = vstv %s4031_s1  ;;  %v1153_v42 = vld [vmem:[#allocation2 + $0x144] sm:$0xff]  ;;  %v4042_v19 = vld [vmem:[#allocation126_spill] sm:$0xff] }
 0x207   : > { %v1079_v11 = vmul.f32 %v4036_v36, %v1076_v17  ;;  %v1074_v35 = vadd.f32 %v3047_v24, %v1046_v3  ;;  %v4037_v31 = vstv %s3971_s29  ;;  %v4038_v63 = vstv %s3976_s30  ;;  %v1090_v40 = vld [vmem:[#allocation2 + $0x113] sm:$0xff]  ;;  %v4048_v38 = vld [vmem:[#allocation99_spill] sm:$0xff] }
 0x208   : > { %v1009_v47 = vmul.f32 %v4037_v31, %v1006_v0  ;;  %v1058_v51 = vmul.f32 %v4038_v63, %v1055_v23  ;;  %v1129_v7 = vadd.f32 %v4039_v61, %v1101_v59  ;;  %v1227_v37 = vadd.f32 %v4040_v28, %v1199_v30  ;;  %v1188_v23 = vld [vmem:[#allocation2 + $0x115] sm:$0xff]  ;;  %v1195_v3 = vld [vmem:[#allocation2 + $0x12d] sm:$0xff]  ;;  %v1174_v63 = vld [vmem:[#allocation2 + $0xe5] sm:$0xff] }
 0x209   : > { %v4041_v57 = vstv %s4034_s8  ;;  %v1053_v21 = vadd.f32 %v1051_v32, %v1025_v10  ;;  %v1220_v54 = vadd.f32 %v4042_v19, %v1192_v45  ;;  %v1102_v18 = vadd.f32 %v1100_v52, %v1074_v35  ;;  %v1146_v32 = vld [vmem:[#allocation2 + $0x12c] sm:$0xff]  ;;  %v4047_v45 = vld [vmem:[#allocation96_spill] sm:$0xff] }
 0x20a   : > { %v1128_v58 = vmul.f32 %v4041_v57, %v1125_v1  ;;  %v1011_v15 = vadd.f32 %v1009_v47, %v983_v20  ;;  %v1060_v24 = vadd.f32 %v1058_v51, %v1032_v5  ;;  %v1157_v29 = vadd.f32 %v1155_v43, %v1129_v7  ;;  %v4049_v5 = vld [vmem:[#allocation86_spill] sm:$0xff] }
 0x20b   : > { %v1206_v27 = vadd.f32 %v1204_v2, %v1178_v4  ;;  %v1081_v16 = vadd.f32 %v1079_v11, %v1053_v21  ;;  %v4043_v39 = vstv %s3982_s0  ;;  %v4044_v60 = vstv %s4008_s18  ;;  %v1209_v55 = vld [vmem:[#allocation2 + $0xb6] sm:$0xff]  ;;  %v1216_v4 = vld [vmem:[#allocation2 + $0xce] sm:$0xff] }
 0x20c   : > { %v1107_v46 = vmul.f32 %v4043_v39, %v1104_v25  ;;  %v1039_v50 = vadd.f32 %v3160_v34, %v1011_v15  ;;  %v1088_v49 = vadd.f32 %v3164_v8, %v1060_v24  ;;  %v1130_v48 = vadd.f32 %v1128_v58, %v1102_v18  ;;  %v4057_v25 = vld [vmem:[#allocation100_spill] sm:$0xff] }
 0x20d   : > { %v1156_v33 = vmul.f32 %v4044_v60, %v1153_v42  ;;  %v1185_v30 = vadd.f32 %v3088_v12, %v1157_v29  ;;  %v1255_v44 = vadd.f32 %v1253_v13, %v1227_v37  ;;  %v4045_v17 = vstv %s3964_s26  ;;  %v1244_v37 = vld [vmem:[#allocation2 + $0x12e] sm:$0xff]  ;;  %v1202_v42 = vld [vmem:[#allocation2 + $0x145] sm:$0xff]  ;;  %s4095_s26 = sld [smem:[#allocation17_spill]] }
 0x20e   : > { %v1093_v43 = vmul.f32 %v4045_v17, %v1090_v40  ;;  %v1109_v2 = vadd.f32 %v1107_v46, %v1081_v16  ;;  %v4046_v26 = vstv %s3969_s27  ;;  %v1067_v34 = vadd.f32 %v4047_v45, %v1039_v50  ;;  %v1251_v18 = vld [vmem:[#allocation2 + $0x146] sm:$0xff]  ;;  %v1230_v46 = vld [vmem:[#allocation2 + $0xfe] sm:$0xff]  ;;  %s4096_s27 = sld [smem:[#allocation22_spill]] }
 0x20f   : > { %v1142_v0 = vmul.f32 %v4046_v26, %v1139_v6  ;;  %v1116_v8 = vadd.f32 %v4048_v38, %v1088_v49  ;;  %v1158_v52 = vadd.f32 %v1156_v33, %v1130_v48  ;;  %v1213_v1 = vadd.f32 %v4049_v5, %v1185_v30  ;;  %v1237_v49 = vld [vmem:[#allocation2 + $0x116] sm:$0xff] }
 0x210   : > { %v1234_v12 = vadd.f32 %v3092_v9, %v1206_v27  ;;  %v1248_v13 = vadd.f32 %v3151_v14, %v1220_v54  ;;  %v1137_v59 = vadd.f32 %v3169_v56, %v1109_v2  ;;  %v4050_v20 = vstv %s3954_s20  ;;  %v1223_v9 = vld [vmem:[#allocation2 + $0xe6] sm:$0xff]  ;;  %s1914_s20 = smov 96  }
 0x211   : > { %v1184_v10 = vmul.f32 %v4050_v20, %v1181_v22  ;;  %v4051_v36 = vstv %s3994_s17  ;;  %v1095_v35 = vadd.f32 %v1093_v43, %v1067_v34  ;;  %v1144_v31 = vadd.f32 %v1142_v0, %v1116_v8  ;;  %s4099_s17 = sld [smem:[#allocation140_spill]] }
 0x212   : > { %v1149_v11 = vmul.f32 %v4051_v36, %v1146_v32  ;;  %v1257_v47 = vadd.f32 %v1255_v44, %v1248_v13  ;;  %v4055_v51 = vstv %s3970_s28  ;;  %v1165_v61 = vadd.f32 %v4057_v25, %v1137_v59  ;;  %s4097_s28 = sld [smem:[#allocation21_spill]] }
 0x213   : > { %v1191_v14 = vmul.f32 %v4055_v51, %v1188_v23  ;;  %v1241_v56 = vadd.f32 %v3135_v62, %v1213_v1  ;;  %v4058_v7 = vstv %s3998_s19  ;;  %v1123_v57 = vadd.f32 %v3051_v53, %v1095_v35  ;;  %s1686_s29 = sshll.u32 %s4095_s26, 7 }
 0x214   : > { %v1198_v28 = vmul.f32 %v4058_v7, %v1195_v3  ;;  %v1172_v58 = vadd.f32 %v3055_v41, %v1144_v31  ;;  %v1186_v21 = vadd.f32 %v1184_v10, %v1158_v52  ;;  %v4059_v19 = vstv %s4052_s2  ;;  %s4098_s30 = sshll.u32 %s4096_s27, 3 }
 0x215   : > { %v1212_v54 = vmul.f32 %v4059_v19, %v1209_v55  ;;  %v4060_v40 = vstv %s4053_s9  ;;  %v1193_v24 = vadd.f32 %v1191_v14, %v1165_v61  ;;  %v1259_v29 = vadd.f32 %v1241_v56, %v1234_v12  ;;  %s171_s3 = scalar_lea.vmem [#allocation9], %s4098_s30 }
 0x216   : > { %v1219_v15 = vmul.f32 %v4060_v40, %v1216_v4  ;;  %v4061_v62 = vstv %s4054_s10  ;;  %v4062_v6 = vstv %s4056_s13  ;;  %v1151_v53 = vadd.f32 %v1149_v11, %v1123_v57  ;;  %s1488_s0 = sshll.u32 %s171_s3, 4  ;;  %s3410_s0 = int_to_ptr.vmem [resolvable:$true] %s1488_s0 }
 0x217   : > { %v1177_v27 = vmul.f32 %v4061_v62, %v1174_v63  ;;  %v1226_v16 = vmul.f32 %v4062_v6, %v1223_v9  ;;  %v1200_v39 = vadd.f32 %v1198_v28, %v1172_v58  ;;  %v4063_v41 = vstv %s3999_s4  ;;  %s3408_s19 = scalar_lea.hbm %s4099_s17, %s1686_s29  ;;  %s1474_s4 = scalar_lea.sflag [#allocation6], %s4096_s27 }
 0x218   : > { %v1247_v50 = vmul.f32 %v4063_v41, %v1244_v37  ;;  %v4064_v48 = vstv %s4009_s21  ;;  %v1221_v33 = vadd.f32 %v1219_v15, %v1193_v24  ;;  %v1261_v22 = vadd.f32 %v1259_v29, %v1257_v47  ;;  %s1819_s18 = scalar_lea.vmem %s3410_s0, 128  ;;  %p4100_p9 = scmp.ne.s32.totalorder %s4097_s28, 0 }
 0x219   : > { %v1205_v60 = vmul.f32 %v4064_v48, %v1202_v42  ;;  %v1179_v30 = vadd.f32 %v1177_v27, %v1151_v53  ;;  %v1214_v44 = vadd.f32 %v1212_v54, %v1186_v21  ;;  %v1228_v32 = vadd.f32 %v1226_v16, %v1200_v39  ;;  %p1820_p8 = scmp.ne.s32.totalorder %s3410_s0, %s1819_s18  ;;  %s1916_s21 = smov [#allocation9]  }
 0x21a   : > { %v4065_v17 = vstv %s4018_s25  ;;  %v1249_v2 = vadd.f32 %v1247_v50, %v1221_v33  ;;  %v1678_v26 = vmul.f32 -1.442695, %v1261_v22  ;;  %v4066_v0 = vstv %s3955_s22  ;;  %s1915_s22 = smov 112   ;;  %s1823_s7 = sshll.u32 %s1916_s21, 4  ;;  %s1824_s7 = int_to_ptr.vmem [resolvable:$false] %s1823_s7 }
 0x21b   : > { %v1254_v43 = vmul.f32 %v4065_v17, %v1251_v18  ;;  %v1233_v23 = vmul.f32 %v4066_v0, %v1230_v46  ;;  %v4067_v45 = vstv %s3983_s5  ;;  %v1207_v38 = vadd.f32 %v1205_v60, %v1179_v30  ;;  %p1821_p11 = pnand %p1820_p8, %p4100_p9  ;;  %s1825_s25 = scalar_lea.vmem %s1824_s7, 256 }
 0x21c   : > { %v1240_v34 = vmul.f32 %v4067_v45, %v1237_v49  ;;  %1768 = vpow2.f32 %v1678_v26  ;;  %v1275_v4 = vlaneseq  ;;  %v1908_v20 = vmov 1966171168   ;;  %p1826_p1 = scmp.lt.s32.totalorder %s3410_s0, %s1824_s7  ;;  %p1827_p2 = scmp.lt.s32.totalorder %s1825_s25, %s1819_s18 }
 0x21d   : > { %v1256_v8 = vadd.f32 %v1254_v43, %v1228_v32  ;;  %v1235_v52 = vadd.f32 %v1233_v23, %v1207_v38  ;;  %v1282_v10 = vunpack.c.l.s4 %v1908_v20  ;;  %p1822_p5 = pneg %p1821_p11 }
 0x21e   : > { %v1242_v1 = vadd.f32 %v1240_v34, %v1214_v44  ;;  %v3263_v11 = vshrl.u32 %v1275_v4, 7  ;;  %vm1277_vm2 = vcmp.lt.s32.totalorder %v1275_v4, 16  ;;  %vm3268_vm3 = vcmp.ge.s32.totalorder %v1275_v4, 16  ;;  %p1828_p12 = por %p1827_p2, %p1826_p1 }
 0x21f   : > { %v1258_v5 = vadd.f32 %v1256_v8, %v1249_v2  ;;  %v1283_v36 = vunpack.c.0.s8 %v1282_v10  ;;  %vm3273_vm4 = vcmp.lt.s32.totalorder %v1275_v4, 32  ;;  %vm3282_vm6 = vcmp.ge.s32.totalorder %v1275_v4, 32 }
 0x220   : > { %v1260_v12 = vadd.f32 %v1242_v1, %v1235_v52  ;;  %vm1308_vm5 = vmand %vm3268_vm3, %vm3273_vm4  ;;  %vm3287_vm7 = vcmp.lt.s32.totalorder %v1275_v4, 48  ;;  %vm3301_vm9 = vcmp.ge.s32.totalorder %v1275_v4, 48  ;;  %vm3306_vm10 = vcmp.lt.s32.totalorder %v1275_v4, 64  ;;  %p1829_p0 = pnand %p1828_p12, %p1822_p5 }
 0x221   : > { %v1286_v31 = vsub.s32 %v1283_v36, %v3263_v11  ;;  %vm1316_vm8 = vmand %vm3282_vm6, %vm3287_vm7  ;;  %vm3311_vm11 = vcmp.ge.s32.totalorder %v1275_v4, 64  ;;  %vm3316_vm12 = vcmp.lt.s32.totalorder %v1275_v4, 80  ;;  %vm3329_vm15 = vcmp.ge.s32.totalorder %v1275_v4, 80 }
 0x222   : > { %v1262_v13 = vadd.f32 %v1260_v12, %v1258_v5  ;;  %vm1324_vm13 = vmand %vm3301_vm9, %vm3306_vm10  ;;  %vm3334_vm0 = vcmp.lt.s32.totalorder %v1275_v4, 96  ;;  %vm3363_vm3 = vcmp.lt.s32.totalorder %v1275_v4, 112  ;;  %vm1376_vm6 = vcmp.lt.s32.totalorder %v1275_v4, 128 }
 0x223   : > { %vm1346_vm14 = vmand %vm3311_vm11, %vm3316_vm12 }
 0x224   : > { %v1679_v3 = vmul.f32 -1.442695, %v1262_v13  ;;  %vm1361_vm1 = vmand %vm3329_vm15, %vm3334_vm0 }
 0x226   : > { %1770 = vpow2.f32 %v1679_v3  ;;  %v1769_v59 = vpop.eup %1768 }
 0x227   : > { %v1269_v55 = vadd.f32 1.0, %v1769_v59 }
 0x229   : > { %1772 = vrcp.f32 %v1269_v55  ;;  %v1463_v55 = vsub.s32 0, %v3263_v11 }
 0x230   : > { %v1771_v35 = vpop.eup %1770 }
 0x231   : > { %v1270_v47 = vadd.f32 1.0, %v1771_v35  ;;  %v1459_v35 = vld [vmem:[%s4094_s24] sm:$0xff] }
 0x233   : > { %1774 = vrcp.f32 %v1270_v47  ;;  %v1773_v63 = vpop.eup %1772 }
 0x234   : > { %v1287_v9 = vrot.slane %v1773_v63, %v1286_v31  ;;  %1279 = vst.msk [vmem:[#allocation3] sm:$0x1] %vm1277_vm2, %v1773_v63  ;;  %v1326_v61 = vcombine.high %v1773_v63, %v1773_v63 }
 0x236   : > { %v1288_v51 = vcombine.high %v1287_v9, %v1287_v9  ;;  %v1295_v25 = vrot.slane %v1287_v9, %v1286_v31  ;;  %v1333_v28 = vrot.slane %v1326_v61, %v1286_v31 }
 0x238   : > { %v1302_v14 = vrot.slane %v1288_v51, %v1286_v31  ;;  %v1310_v7 = vcombine.high %v1295_v25, %v1295_v25  ;;  %v1340_v58 = vrot.slane %v1333_v28, %v1286_v31  ;;  %v1348_v40 = vcombine.high %v1333_v28, %v1333_v28 }
 0x23a   : > { %1303 = vrot.lane.b32.xlu0 %v1302_v14, %s1909_s16  ;;  %v1318_v54 = vcombine.high %v1302_v14, %v1302_v14  ;;  %v1355_v18 = vrot.slane %v1348_v40, %v1286_v31  ;;  %v1363_v62 = vcombine.high %v1340_v58, %v1340_v58 }
 0x23c   : > { %v1371_v16 = vcombine.high %v1355_v18, %v1355_v18 }
 0x23d   : > { %v1775_v56 = vpop.eup %1774 }
 0x23e   : > { %v1387_v37 = vrot.slane %v1775_v56, %v1286_v31  ;;  %1379 = vst.msk [vmem:[#allocation3 + $0x1] sm:$0x1] %vm1277_vm2, %v1775_v56  ;;  %1311 = vrot.lane.b32.xlu0 %v1310_v7, %s1910_s11  ;;  %v1417_v19 = vcombine.high %v1775_v56, %v1775_v56  ;;  %vm3358_vm2 = vcmp.ge.s32.totalorder %v1275_v4, 96 }
 0x23f   : > { %vm1369_vm4 = vmand %vm3358_vm2, %vm3363_vm3 }
 0x240   : > { %v1388_v57 = vcombine.high %v1387_v37, %v1387_v37  ;;  %v1395_v42 = vrot.slane %v1387_v37, %v1286_v31  ;;  %v1424_v24 = vrot.slane %v1417_v19, %v1286_v31 }
 0x242   : > { %v1402_v21 = vrot.slane %v1388_v57, %v1286_v31  ;;  %1341 = vrot.lane.b32.xlu0 %v1340_v58, %s1911_s6  ;;  %v1407_v15 = vcombine.high %v1395_v42, %v1395_v42  ;;  %v1431_v29 = vrot.slane %v1424_v24, %v1286_v31  ;;  %v1436_v6 = vcombine.high %v1424_v24, %v1424_v24 }
 0x244   : > { %1403 = vrot.lane.b32.xlu1 %v1402_v21, %s1909_s16  ;;  %v1412_v27 = vcombine.high %v1402_v21, %v1402_v21  ;;  %v1443_v53 = vrot.slane %v1436_v6, %v1286_v31  ;;  %v1448_v39 = vcombine.high %v1431_v29, %v1431_v29 }
 0x246   : > { %1319 = vrot.lane.b32.xlu0 %v1318_v54, %s1912_s23  ;;  %v1453_v46 = vcombine.high %v1443_v53, %v1443_v53 }
 0x248   : > { %1408 = vrot.lane.b32.xlu1 %v1407_v15, %s1910_s11 }
 0x24a   : > { %1356 = vrot.lane.b32.xlu0 %v1355_v18, %s1913_s14 }
 0x24c   : > { %1432 = vrot.lane.b32.xlu1 %v1431_v29, %s1911_s6 }
 0x24e   : > { %1364 = vrot.lane.b32.xlu0 %v1363_v62, %s1914_s20 }
 0x250   : > { %1413 = vrot.lane.b32.xlu1 %v1412_v27, %s1912_s23 }
 0x252   : > { %1372 = vrot.lane.b32.xlu0 %v1371_v16, %s1915_s22 }
 0x254   : > { %1444 = vrot.lane.b32.xlu1 %v1443_v53, %s1913_s14 }
 0x258   : > { %1449 = vrot.lane.b32.xlu1 %v1448_v39, %s1914_s20 }
 0x25c   : > { %1454 = vrot.lane.b32.xlu1 %v1453_v46, %s1915_s22 }
 0x2ac   : > { %v1304_v60 = vpop.permute.xlu0 %1303 }
 0x2ad   : > { %1309 = vst.msk [vmem:[#allocation3] sm:$0x1] %vm1308_vm5, %v1304_v60 }
 0x2b0   : > { %v1312_v33 = vpop.permute.xlu0 %1311 }
 0x2b1   : > { %1317 = vst.msk [vmem:[#allocation3] sm:$0x1] %vm1316_vm8, %v1312_v33 }
 0x2b4   : > { %v1342_v44 = vpop.permute.xlu0 %1341 }
 0x2b6   : > { %v1404_v43 = vpop.permute.xlu1 %1403 }
 0x2b7   : > { %1406 = vst.msk [vmem:[#allocation3 + $0x1] sm:$0x1] %vm1308_vm5, %v1404_v43  ;;  %vm3377_vm5 = vcmp.ge.s32.totalorder %v1275_v4, 112  ;;  %v1467_v4 = vsub.s32 1, %v3263_v11 }
 0x2b8   : > { %v1320_v0 = vpop.permute.xlu0 %1319  ;;  %vm1377_vm7 = vmand %vm3377_vm5, %vm1376_vm6 }
 0x2b9   : > { %1325 = vst.msk [vmem:[#allocation3] sm:$0x1] %vm1324_vm13, %v1320_v0 }
 0x2ba   : > { %v1409_v23 = vpop.permute.xlu1 %1408  ;;  %1347 = vst.msk [vmem:[#allocation3] sm:$0x1] %vm1346_vm14, %v1342_v44 }
 0x2bb   : > { %1411 = vst.msk [vmem:[#allocation3 + $0x1] sm:$0x1] %vm1316_vm8, %v1409_v23 }
 0x2bc   : > { %v1357_v38 = vpop.permute.xlu0 %1356 }
 0x2bd   : > { %1362 = vst.msk [vmem:[#allocation3] sm:$0x1] %vm1361_vm1, %v1357_v38 }
 0x2be   : > { %v1433_v8 = vpop.permute.xlu1 %1432 }
 0x2c0   : > { %v1365_v5 = vpop.permute.xlu0 %1364 }
 0x2c1   : > { %1370 = vst.msk [vmem:[#allocation3] sm:$0x1] %vm1369_vm4, %v1365_v5 }
 0x2c2   : > { %v1414_v1 = vpop.permute.xlu1 %1413 }
 0x2c3   : > { %1416 = vst.msk [vmem:[#allocation3 + $0x1] sm:$0x1] %vm1324_vm13, %v1414_v1 }
 0x2c4   : > { %1435 = vst.msk [vmem:[#allocation3 + $0x1] sm:$0x1] %vm1346_vm14, %v1433_v8  ;;  %v1373_v12 = vpop.permute.xlu0 %1372 }
 0x2c5   : > { %1378 = vst.msk [vmem:[#allocation3] sm:$0x1] %vm1377_vm7, %v1373_v12 }
 0x2c6   : > { %v1445_v13 = vpop.permute.xlu1 %1444 }
 0x2c7   : > { %1447 = vst.msk [vmem:[#allocation3 + $0x1] sm:$0x1] %vm1361_vm1, %v1445_v13 }
 0x2ca   : > { %v1450_v3 = vpop.permute.xlu1 %1449 }
 0x2cb   : > { %1452 = vst.msk [vmem:[#allocation3 + $0x1] sm:$0x1] %vm1369_vm4, %v1450_v3 }
 0x2ce   : > { %v1455_v59 = vpop.permute.xlu1 %1454 }
 0x2cf   : > { %1457 = vst.msk [vmem:[#allocation3 + $0x1] sm:$0x1] %vm1377_vm7, %v1455_v59 }
 0x2d6   : > { %v1458_v20 = vld [vmem:[#allocation3] sm:$0x3] }
 0x2d7   : > { %v1464_v10 = vrot.slane %v1458_v20, %v1463_v55  ;;  %v1468_v36 = vrot.slane %v1458_v20, %v1467_v4 }
 0x2d9   : > { %v1469_v31 = vcombine.low %v1464_v10, %v1468_v36 }
 0x2db   : > { %v1471_v47 = vmul.f32 %v1469_v31, %v1459_v35 }
 0x2dd   : > { %1472 = vst [vmem:[%s171_s3] sm:$0xff] %v1471_v47 }
 0x2de   : > { %1832 = shalt.err (!%p1829_p0)
}
 0x2df   : > { %s1833_s12 = scalar_lea.hbm %s3408_s19, 128  ;;  %s1837_s2 = scalar_lea.hbm %s4099_s17, 256 }
 0x2e0   : > { %p1834_p3 = scmp.ne.s32.totalorder %s3408_s19, %s1833_s12  ;;  %p1838_p6 = scmp.lt.u32.totalorder %s3408_s19, %s4099_s17 }
 0x2e1   : > { %p1839_p13 = scmp.lt.u32.totalorder %s1837_s2, %s1833_s12  ;;  %p1841_p8 = scmp.lt.u32.totalorder %s1833_s12, %s3408_s19 }
 0x2e2   : > { %p1835_p7 = pnand %p1834_p3, %p4100_p9 }
 0x2e3   : > { %p1840_p4 = por %p1839_p13, %p1838_p6 }
 0x2e4   : > { %p1836_p10 = pneg %p1835_p7 }
 0x2e5   : > { %p1842_p11 = por %p1841_p8, %p1840_p4 }
 0x2e7   : > { %p1843_p5 = pnand %p1842_p11, %p1836_p10 }
 0x2e9   : > { %1846 = shalt.err (!%p1843_p5)
}
 0x2ea   : > { %1693 = dma.vmem_to_hbm [thread:$0]  (%p4100_p9), %s3410_s0, 128, %s3408_s19, %s1474_s4  }
 0x2eb PF: > { %s4101_s13 = sld [smem:[#allocation13_spill]]  ;;  %s4102_s16 = sld [smem:[#allocation18_spill]] }
 0x2ec   : > { %s4103_s11 = sld [smem:[#allocation16_spill]] }
 0x2f1   : > { %s1500_s6 = sand.u32 1, %s4101_s13   ;;  %p4104_p1 = scmp.ne.s32.totalorder %s4102_s16, 0 }
 0x2f2   : > { %p4105_p2 = scmp.ge.s32.totalorder %s4103_s11, 2  ;;  %s1501_s23 = scalar_lea.sflag [#allocation6], %s1500_s6 }
 0x2f4   : > { %p1704_p12 = pnand %p4105_p2, %p4104_p1 }
 0x2f6   : > { %1872 = dma.done.wait (!%p1704_p12), %s1501_s23, 128  }
 0x2f7   : > { %1874 = vsyncadd (!%p1704_p12), %s1501_s23, 4294967168  ;;  %s4106_s12 = sld [smem:[#allocation19_spill]]  ;;  %s4107_s9 = sld [smem:[#allocation14_spill]] }
 0x2f8   : > { %s4108_s10 = sld [smem:[#allocation15_spill]]  ;;  %s4109_s11 = sld [smem:[#allocation20_spill]] }
 0x2fd   : > { %p16_p0 = scmp.ge.s32.totalorder %s4106_s12, 4  }
 0x2ff   :  { %18 = sbr.rel (!%p16_p0) target bundleno = 10 (0xa), region = 91 }
 0x306   :  { %1506 = vsyncpa [#allocation5], 1 }
 0x307   :  { %1508 = vsyncpa [#allocation5 + $0x1], 1 }
 0x308   :  { %1509 = vsyncpa [#allocation6], 1 }
 0x309   :  { %1511 = vsyncpa [#allocation6 + $0x1], 1 }
 0x30a   :  { %1512 = vsyncpa [#allocation7], 1 }
 0x30b   :  { %1514 = vsyncpa [#allocation7 + $0x1], 1 }

</bundles_post_ra>
